<compile_context>
chip_gen: v7x
topology: tpu7x:2x2x1
jax: 0.10.0
libtpu: 0.0.40
codegen_flags: <defaults>
</compile_context>

<pallas_src>
import numpy as np
import jax
import jax.numpy as jnp
from jax.experimental import pallas as pl
from jax.experimental.pallas import tpu as pltpu

P = dict(conv1_k_num=6, pool1_size=3, conv2_k_num=17, pool2_size=2,
         full_num=84, conv_k_size=4)
BN_EPS = 1e-5

# ---- static shape constants (28x28 input is required by the module's feature_num math)
KS = P['conv_k_size']                    # 4
H0 = 28                                  # input spatial
H1 = H0 - KS + 1                         # 25  conv1 output spatial
Q1 = (H1 - P['pool1_size']) // 2 + 1     # 12  pool1 output spatial
H2 = Q1 - KS + 1                         # 9   conv2 output spatial
Q2 = (H2 - P['pool2_size']) // 2 + 1     # 4   pool2 output spatial
C1 = P['conv1_k_num']                    # 6
C2 = P['conv2_k_num']                    # 17
FN = P['full_num']                       # 84
FEAT = Q2 * Q2 * C2                      # 272
NCLS = 10

_KP_ORDER = ('w1', 'b1row', 'sw1', 'sh1', 'bn1s', 'bn1b',
             'w2', 'b2row', 'sw2', 'sh2', 'bn2s', 'bn2b',
             'wf1', 'bf1', 'wf2', 'bf2', 'wf3', 'bf3')


# ---------------------------- fused Pallas kernel ----------------------------

def _lenet5_kernel(x_ref, w1_ref, b1_ref, sw1_ref, sh1_ref, bn1s_ref, bn1b_ref,
                   w2_ref, b2_ref, sw2_ref, sh2_ref, bn2s_ref, bn2b_ref,
                   wf1_ref, bf1_ref, wf2_ref, bf2_ref, wf3_ref, bf3_ref,
                   out_ref):
    """BT MNIST samples per grid step; all intermediates live in VMEM/vregs."""
    bt = x_ref.shape[0]

    def dot(a, b):
        return jnp.dot(a, b, preferred_element_type=jnp.float32)

    rows = []
    for s in range(bt):
        # conv1 + ReLU.  Activation layout: rows = out height, lanes = wo*C1 + co.
        # Banded weight matmul == in-kernel im2col via shifted ref reads (lane-dense).
        a1 = dot(x_ref[s, 0:H1, :], w1_ref[0])
        for kh in range(1, KS):
            a1 = a1 + dot(x_ref[s, kh:kh + H1, :], w1_ref[kh])
        a1 = jnp.maximum(a1 + b1_ref[...], 0.0)                     # (25, 150)

        # pool1 width (lane-selection matmuls) then height (row-selection matmuls),
        # then bn1 affine applied ONCE on the pooled map.
        mw1 = dot(a1, sw1_ref[0])
        for j in range(1, P['pool1_size']):
            mw1 = jnp.maximum(mw1, dot(a1, sw1_ref[j]))             # (25, 72)
        p1 = dot(sh1_ref[0], mw1)
        for i in range(1, P['pool1_size']):
            p1 = jnp.maximum(p1, dot(sh1_ref[i], mw1))              # (12, 72)
        p1 = p1 * bn1s_ref[...] + bn1b_ref[...]

        # conv2 + ReLU on the pooled/normalized map (static row-slices of p1).
        a2 = dot(p1[0:H2, :], w2_ref[0])
        for kh in range(1, KS):
            a2 = a2 + dot(p1[kh:kh + H2, :], w2_ref[kh])
        a2 = jnp.maximum(a2 + b2_ref[...], 0.0)                     # (9, 153)

        # pool2 width, then height, then bn2.
        mw2 = dot(a2, sw2_ref[0])
        for j in range(1, P['pool2_size']):
            mw2 = jnp.maximum(mw2, dot(a2, sw2_ref[j]))             # (9, 68)
        p2 = dot(sh2_ref[0], mw2)
        for i in range(1, P['pool2_size']):
            p2 = jnp.maximum(p2, dot(sh2_ref[i], mw2))              # (4, 68)
        p2 = p2 * bn2s_ref[...] + bn2b_ref[...]

        # fc1: PyTorch NCHW .view(-1, feat) flatten permutation is folded into wf1's
        # row ordering (no activation transpose); sum of per-row dots.
        z1 = dot(p2[0:1, :], wf1_ref[0])
        for p_ in range(1, Q2):
            z1 = z1 + dot(p2[p_:p_ + 1, :], wf1_ref[p_])            # (1, 84)
        rows.append(z1)

    # Batched fc1-bias/ReLU, fc2 + ReLU, Dropout(p=0.5) identity in eval, fc3.
    z1 = jnp.concatenate(rows, axis=0) if bt > 1 else rows[0]       # (BT, 84)
    z1 = jnp.maximum(z1 + bf1_ref[...], 0.0)
    z2 = jnp.maximum(dot(z1, wf2_ref[...]) + bf2_ref[...], 0.0)
    out_ref[0] = (dot(z2, wf3_ref[...]) + bf3_ref[...]).astype(out_ref.dtype)


def _full_spec(arr):
    n = arr.ndim
    return pl.BlockSpec(arr.shape, lambda b, _n=n: (0,) * _n)


def lenet5_forward(x_nchw, kp, block_batch=None):
    """x_nchw: (B, 1, 28, 28) float32; kp: prepared kernel params."""
    b = x_nchw.shape[0]
    if block_batch is None:
        bt = next(d for d in (8, 7, 6, 5, 4, 3, 2, 1) if b % d == 0)
    else:
        bt = block_batch
        assert b % bt == 0
    g = b // bt
    x = x_nchw[:, 0, :, :]                                          # (B, 28, 28), Cin=1
    weights = [kp[name] for name in _KP_ORDER]
    in_specs = [pl.BlockSpec((bt, H0, H0), lambda i: (i, 0, 0))]
    in_specs += [_full_spec(w) for w in weights]
    out = pl.pallas_call(
        _lenet5_kernel,
        out_shape=jax.ShapeDtypeStruct((g, bt, NCLS), jnp.float32),
        grid=(g,),
        in_specs=in_specs,
        out_specs=pl.BlockSpec((1, bt, NCLS), lambda i: (i, 0, 0)),
        compiler_params=pltpu.CompilerParams(
            dimension_semantics=("parallel",)),
    )(x, *weights)
    return out.reshape(b, NCLS)


# --------------------- one-time host-side parameter repack ---------------------

def _band_conv(w_np, win):
    """(Cout,Cin,K,K) -> (K, win*Cin, wout*Cout) banded matrices: conv over width
    becomes a matmul; conv over height becomes a sum over kh of shifted-row reads."""
    cout, cin, k, _ = w_np.shape
    wout = win - k + 1
    m = np.zeros((k, win * cin, wout * cout), np.float32)
    for kh in range(k):
        for wo in range(wout):
            for kw in range(k):
                wi = wo + kw
                m[kh, wi * cin:(wi + 1) * cin, wo * cout:(wo + 1) * cout] = \
                    w_np[:, :, kh, kw].T
    return m


def _lane_pool_select(n_in, c, k, stride, n_out):
    """(k, n_in*c, n_out*c) 0/1 matrices: S[j] selects lane (stride*q+j)*c+ch -> q*c+ch."""
    s = np.zeros((k, n_in * c, n_out * c), np.float32)
    for j in range(k):
        for q in range(n_out):
            for ch in range(c):
                s[j, (stride * q + j) * c + ch, q * c + ch] = 1.0
    return s


def _row_pool_select(n_in, k, stride, n_out):
    """(k, n_out, n_in) 0/1 matrices: S[i] selects input row stride*p+i -> output row p."""
    s = np.zeros((k, n_out, n_in), np.float32)
    for i in range(k):
        for pp in range(n_out):
            s[i, pp, stride * pp + i] = 1.0
    return s


def prepare_kernel_params(p):
    """Repack PyTorch-layout params into lane-dense kernel layouts (host, once)."""
    f = lambda a: np.asarray(a, np.float32)
    kp = {}
    # conv1
    kp['w1'] = _band_conv(f(p['conv1_w']), H0)                       # (4, 28, 150)
    kp['b1row'] = np.tile(f(p['conv1_b']), H1)[None, :]              # (1, 150)
    # pool1 + bn1
    kp['sw1'] = _lane_pool_select(H1, C1, P['pool1_size'], 2, Q1)    # (3, 150, 72)
    kp['sh1'] = _row_pool_select(H1, P['pool1_size'], 2, Q1)         # (3, 12, 25)
    kp['bn1s'] = np.tile(f(p['bn1_scale']), Q1)[None, :]             # (1, 72)
    kp['bn1b'] = np.tile(f(p['bn1_shift']), Q1)[None, :]
    # conv2
    kp['w2'] = _band_conv(f(p['conv2_w']), Q1)                       # (4, 72, 153)
    kp['b2row'] = np.tile(f(p['conv2_b']), H2)[None, :]              # (1, 153)
    # pool2 + bn2
    kp['sw2'] = _lane_pool_select(H2, C2, P['pool2_size'], 2, Q2)    # (2, 153, 68)
    kp['sh2'] = _row_pool_select(H2, P['pool2_size'], 2, Q2)         # (2, 4, 9)
    kp['bn2s'] = np.tile(f(p['bn2_scale']), Q2)[None, :]             # (1, 68)
    kp['bn2b'] = np.tile(f(p['bn2_shift']), Q2)[None, :]
    # fc1: fold the PyTorch NCHW .view(-1, feat) flatten (flat = c*Q2*Q2 + h*Q2 + w)
    # into the weight rows; our per-row activation layout is lane = w*C2 + c.
    fc1 = f(p['fc1_w'])                                              # (84, 272)
    wf1 = np.zeros((Q2, Q2 * C2, FN), np.float32)
    for h in range(Q2):
        for w_ in range(Q2):
            for c in range(C2):
                wf1[h, w_ * C2 + c, :] = fc1[:, c * Q2 * Q2 + h * Q2 + w_]
    kp['wf1'] = wf1                                                  # (4, 68, 84)
    kp['bf1'] = f(p['fc1_b'])[None, :]
    kp['wf2'] = np.ascontiguousarray(f(p['fc2_w']).T)                # (84, 84)
    kp['bf2'] = f(p['fc2_b'])[None, :]
    kp['wf3'] = np.ascontiguousarray(f(p['fc3_w']).T)                # (84, 10)
    kp['bf3'] = f(p['fc3_b'])[None, :]
    return {k: jnp.asarray(v) for k, v in kp.items()}


# ------------------------------ parameter init ------------------------------

def init_params(key):
    keys = iter(jax.random.split(key, 24))
    k = KS

    def unif(kk, shape, fan_in):
        bound = 1.0 / (fan_in ** 0.5)
        return jax.random.uniform(kk, shape, jnp.float32, -bound, bound)

    p = {}
    p['conv1_w'] = unif(next(keys), (C1, 1, k, k), 1 * k * k)
    p['conv1_b'] = unif(next(keys), (C1,), 1 * k * k)
    p['conv2_w'] = unif(next(keys), (C2, C1, k, k), C1 * k * k)
    p['conv2_b'] = unif(next(keys), (C2,), C1 * k * k)
    p['fc1_w'] = unif(next(keys), (FN, FEAT), FEAT)
    p['fc1_b'] = unif(next(keys), (FN,), FEAT)
    p['fc2_w'] = unif(next(keys), (FN, FN), FN)
    p['fc2_b'] = unif(next(keys), (FN,), FN)
    p['fc3_w'] = unif(next(keys), (NCLS, FN), FN)
    p['fc3_b'] = unif(next(keys), (NCLS,), FN)
    for name, c in (('bn1', C1), ('bn2', C2)):
        gamma = jax.random.uniform(next(keys), (c,), jnp.float32, 0.8, 1.2)
        beta = 0.1 * jax.random.normal(next(keys), (c,), jnp.float32)
        mean = 0.1 * jax.random.normal(next(keys), (c,), jnp.float32)
        var = jax.random.uniform(next(keys), (c,), jnp.float32, 0.5, 1.5)
        scale = gamma / jnp.sqrt(var + BN_EPS)
        p[f'{name}_scale'] = scale
        p[f'{name}_shift'] = beta - mean * scale
    return p


# ---------------------------- pure-JAX reference ----------------------------

def ref_forward(x_nchw, p):
    def conv(x, w, b):
        y = jax.lax.conv_general_dilated(
            x, w, (1, 1), 'VALID', dimension_numbers=('NCHW', 'OIHW', 'NCHW'))
        return y + b[None, :, None, None]

    def maxpool(x, k, s):
        return jax.lax.reduce_window(x, -jnp.inf, jax.lax.max,
                                     (1, 1, k, k), (1, 1, s, s), 'VALID')

    def bn(x, scale, shift):
        return x * scale[None, :, None, None] + shift[None, :, None, None]

    x = maxpool(jnp.maximum(conv(x_nchw, p['conv1_w'], p['conv1_b']), 0.0),
                P['pool1_size'], 2)
    x = bn(x, p['bn1_scale'], p['bn1_shift'])
    x = maxpool(jnp.maximum(conv(x, p['conv2_w'], p['conv2_b']), 0.0),
                P['pool2_size'], 2)
    x = bn(x, p['bn2_scale'], p['bn2_shift'])
    x = x.reshape(x.shape[0], -1)
    x = jnp.maximum(x @ p['fc1_w'].T + p['fc1_b'], 0.0)
    x = jnp.maximum(x @ p['fc2_w'].T + p['fc2_b'], 0.0)
    return x @ p['fc3_w'].T + p['fc3_b']


if __name__ == "__main__":
    key = jax.random.PRNGKey(0)
    pkey, xkey = jax.random.split(key)
    params = init_params(pkey)
    kparams = prepare_kernel_params(params)
    # MNIST-style input; 28x28 is required by the module's feature_num arithmetic.
    x = jax.random.normal(xkey, (4, 1, 28, 28), jnp.float32)

    out = jax.jit(lenet5_forward)(x, kparams)
    out = jax.block_until_ready(out)
    assert out.shape == (4, NCLS)

    ref = ref_forward(x, params)
    max_err = float(jnp.max(jnp.abs(out - ref)))
    assert max_err < 2e-3, f"mismatch vs reference: {max_err}"
    print("KERNEL_OK")
</pallas_src>

<mosaic_0001>
module attributes {stable_mosaic.version = 11 : i64} {
  func.func @_lenet5_kernel(%arg0: i32, %arg1: memref<4x28x28xf32, #tpu.memory_space<vmem>>, %arg2: memref<4x28x150xf32, #tpu.memory_space<vmem>>, %arg3: memref<1x150xf32, #tpu.memory_space<vmem>>, %arg4: memref<3x150x72xf32, #tpu.memory_space<vmem>>, %arg5: memref<3x12x25xf32, #tpu.memory_space<vmem>>, %arg6: memref<1x72xf32, #tpu.memory_space<vmem>>, %arg7: memref<1x72xf32, #tpu.memory_space<vmem>>, %arg8: memref<4x72x153xf32, #tpu.memory_space<vmem>>, %arg9: memref<1x153xf32, #tpu.memory_space<vmem>>, %arg10: memref<2x153x68xf32, #tpu.memory_space<vmem>>, %arg11: memref<2x4x9xf32, #tpu.memory_space<vmem>>, %arg12: memref<1x68xf32, #tpu.memory_space<vmem>>, %arg13: memref<1x68xf32, #tpu.memory_space<vmem>>, %arg14: memref<4x68x84xf32, #tpu.memory_space<vmem>>, %arg15: memref<1x84xf32, #tpu.memory_space<vmem>>, %arg16: memref<84x84xf32, #tpu.memory_space<vmem>>, %arg17: memref<1x84xf32, #tpu.memory_space<vmem>>, %arg18: memref<84x10xf32, #tpu.memory_space<vmem>>, %arg19: memref<1x10xf32, #tpu.memory_space<vmem>>, %arg20: memref<1x4x10xf32, #tpu.memory_space<vmem>>) attributes {dimension_semantics = [#tpu.dimension_semantics<parallel>], iteration_bounds = array<i64: 1>, scalar_prefetch = 0 : i64, scratch_operands = 0 : i64, tpu.core_type = #tpu.core_type<tc>, window_params = [{transform_indices = @transform_0, window_bounds = array<i64: 4, 28, 28>}, {pipeline_mode = #tpu.pipeline_mode<synchronous>, transform_indices = @transform_1, window_bounds = array<i64: 4, 28, 150>}, {pipeline_mode = #tpu.pipeline_mode<synchronous>, transform_indices = @transform_2, window_bounds = array<i64: 1, 150>}, {pipeline_mode = #tpu.pipeline_mode<synchronous>, transform_indices = @transform_3, window_bounds = array<i64: 3, 150, 72>}, {pipeline_mode = #tpu.pipeline_mode<synchronous>, transform_indices = @transform_4, window_bounds = array<i64: 3, 12, 25>}, {pipeline_mode = #tpu.pipeline_mode<synchronous>, transform_indices = @transform_5, window_bounds = array<i64: 1, 72>}, {pipeline_mode = #tpu.pipeline_mode<synchronous>, transform_indices = @transform_6, window_bounds = array<i64: 1, 72>}, {pipeline_mode = #tpu.pipeline_mode<synchronous>, transform_indices = @transform_7, window_bounds = array<i64: 4, 72, 153>}, {pipeline_mode = #tpu.pipeline_mode<synchronous>, transform_indices = @transform_8, window_bounds = array<i64: 1, 153>}, {pipeline_mode = #tpu.pipeline_mode<synchronous>, transform_indices = @transform_9, window_bounds = array<i64: 2, 153, 68>}, {pipeline_mode = #tpu.pipeline_mode<synchronous>, transform_indices = @transform_10, window_bounds = array<i64: 2, 4, 9>}, {pipeline_mode = #tpu.pipeline_mode<synchronous>, transform_indices = @transform_11, window_bounds = array<i64: 1, 68>}, {pipeline_mode = #tpu.pipeline_mode<synchronous>, transform_indices = @transform_12, window_bounds = array<i64: 1, 68>}, {pipeline_mode = #tpu.pipeline_mode<synchronous>, transform_indices = @transform_13, window_bounds = array<i64: 4, 68, 84>}, {pipeline_mode = #tpu.pipeline_mode<synchronous>, transform_indices = @transform_14, window_bounds = array<i64: 1, 84>}, {pipeline_mode = #tpu.pipeline_mode<synchronous>, transform_indices = @transform_15, window_bounds = array<i64: 84, 84>}, {pipeline_mode = #tpu.pipeline_mode<synchronous>, transform_indices = @transform_16, window_bounds = array<i64: 1, 84>}, {pipeline_mode = #tpu.pipeline_mode<synchronous>, transform_indices = @transform_17, window_bounds = array<i64: 84, 10>}, {pipeline_mode = #tpu.pipeline_mode<synchronous>, transform_indices = @transform_18, window_bounds = array<i64: 1, 10>}, {transform_indices = @transform_19, window_bounds = array<i64: 1, 4, 10>}]} {
    %c0 = arith.constant 0 : index
    %c0_0 = arith.constant 0 : index
    %c0_1 = arith.constant 0 : index
    %0 = vector.load %arg1[%c0, %c0_0, %c0_1] : memref<4x28x28xf32, #tpu.memory_space<vmem>>, vector<1x25x28xf32>
    %1 = vector.shape_cast %0 : vector<1x25x28xf32> to vector<25x28xf32>
    %c0_2 = arith.constant 0 : index
    %c0_3 = arith.constant 0 : index
    %c0_4 = arith.constant 0 : index
    %2 = vector.load %arg2[%c0_2, %c0_3, %c0_4] : memref<4x28x150xf32, #tpu.memory_space<vmem>>, vector<1x28x150xf32>
    %3 = vector.shape_cast %2 : vector<1x28x150xf32> to vector<28x150xf32>
    %cst = arith.constant dense<0.000000e+00> : vector<25x150xf32>
    %4 = tpu.matmul %1, %3, %cst {dimension_numbers = #tpu.dot_dimension_numbers<[1], [0], [0], [1], [0, 0, 1, 1], [], []>} : vector<25x28xf32>, vector<28x150xf32>, vector<25x150xf32> -> vector<25x150xf32>
    %c0_5 = arith.constant 0 : index
    %c1 = arith.constant 1 : index
    %c0_6 = arith.constant 0 : index
    %5 = vector.load %arg1[%c0_5, %c1, %c0_6] : memref<4x28x28xf32, #tpu.memory_space<vmem>>, vector<1x25x28xf32>
    %6 = vector.shape_cast %5 : vector<1x25x28xf32> to vector<25x28xf32>
    %c1_7 = arith.constant 1 : index
    %c0_8 = arith.constant 0 : index
    %c0_9 = arith.constant 0 : index
    %7 = vector.load %arg2[%c1_7, %c0_8, %c0_9] : memref<4x28x150xf32, #tpu.memory_space<vmem>>, vector<1x28x150xf32>
    %8 = vector.shape_cast %7 : vector<1x28x150xf32> to vector<28x150xf32>
    %cst_10 = arith.constant dense<0.000000e+00> : vector<25x150xf32>
    %9 = tpu.matmul %6, %8, %cst_10 {dimension_numbers = #tpu.dot_dimension_numbers<[1], [0], [0], [1], [0, 0, 1, 1], [], []>} : vector<25x28xf32>, vector<28x150xf32>, vector<25x150xf32> -> vector<25x150xf32>
    %10 = arith.addf %4, %9 : vector<25x150xf32>
    %c0_11 = arith.constant 0 : index
    %c2 = arith.constant 2 : index
    %c0_12 = arith.constant 0 : index
    %11 = vector.load %arg1[%c0_11, %c2, %c0_12] : memref<4x28x28xf32, #tpu.memory_space<vmem>>, vector<1x25x28xf32>
    %12 = vector.shape_cast %11 : vector<1x25x28xf32> to vector<25x28xf32>
    %c2_13 = arith.constant 2 : index
    %c0_14 = arith.constant 0 : index
    %c0_15 = arith.constant 0 : index
    %13 = vector.load %arg2[%c2_13, %c0_14, %c0_15] : memref<4x28x150xf32, #tpu.memory_space<vmem>>, vector<1x28x150xf32>
    %14 = vector.shape_cast %13 : vector<1x28x150xf32> to vector<28x150xf32>
    %cst_16 = arith.constant dense<0.000000e+00> : vector<25x150xf32>
    %15 = tpu.matmul %12, %14, %cst_16 {dimension_numbers = #tpu.dot_dimension_numbers<[1], [0], [0], [1], [0, 0, 1, 1], [], []>} : vector<25x28xf32>, vector<28x150xf32>, vector<25x150xf32> -> vector<25x150xf32>
    %16 = arith.addf %10, %15 : vector<25x150xf32>
    %c0_17 = arith.constant 0 : index
    %c3 = arith.constant 3 : index
    %c0_18 = arith.constant 0 : index
    %17 = vector.load %arg1[%c0_17, %c3, %c0_18] : memref<4x28x28xf32, #tpu.memory_space<vmem>>, vector<1x25x28xf32>
    %18 = vector.shape_cast %17 : vector<1x25x28xf32> to vector<25x28xf32>
    %c3_19 = arith.constant 3 : index
    %c0_20 = arith.constant 0 : index
    %c0_21 = arith.constant 0 : index
    %19 = vector.load %arg2[%c3_19, %c0_20, %c0_21] : memref<4x28x150xf32, #tpu.memory_space<vmem>>, vector<1x28x150xf32>
    %20 = vector.shape_cast %19 : vector<1x28x150xf32> to vector<28x150xf32>
    %cst_22 = arith.constant dense<0.000000e+00> : vector<25x150xf32>
    %21 = tpu.matmul %18, %20, %cst_22 {dimension_numbers = #tpu.dot_dimension_numbers<[1], [0], [0], [1], [0, 0, 1, 1], [], []>} : vector<25x28xf32>, vector<28x150xf32>, vector<25x150xf32> -> vector<25x150xf32>
    %22 = arith.addf %16, %21 : vector<25x150xf32>
    %c0_23 = arith.constant 0 : index
    %c0_24 = arith.constant 0 : index
    %23 = vector.load %arg3[%c0_23, %c0_24] : memref<1x150xf32, #tpu.memory_space<vmem>>, vector<1x150xf32>
    %24 = vector.broadcast %23 : vector<1x150xf32> to vector<25x150xf32>
    %25 = arith.addf %22, %24 : vector<25x150xf32>
    %cst_25 = arith.constant 0.000000e+00 : f32
    %26 = vector.broadcast %cst_25 : f32 to vector<25x150xf32>
    %27 = arith.maximumf %25, %26 : vector<25x150xf32>
    %c0_26 = arith.constant 0 : index
    %c0_27 = arith.constant 0 : index
    %c0_28 = arith.constant 0 : index
    %28 = vector.load %arg4[%c0_26, %c0_27, %c0_28] : memref<3x150x72xf32, #tpu.memory_space<vmem>>, vector<1x150x72xf32>
    %29 = vector.shape_cast %28 : vector<1x150x72xf32> to vector<150x72xf32>
    %cst_29 = arith.constant dense<0.000000e+00> : vector<25x72xf32>
    %30 = tpu.matmul %27, %29, %cst_29 {dimension_numbers = #tpu.dot_dimension_numbers<[1], [0], [0], [1], [0, 0, 1, 1], [], []>} : vector<25x150xf32>, vector<150x72xf32>, vector<25x72xf32> -> vector<25x72xf32>
    %c1_30 = arith.constant 1 : index
    %c0_31 = arith.constant 0 : index
    %c0_32 = arith.constant 0 : index
    %31 = vector.load %arg4[%c1_30, %c0_31, %c0_32] : memref<3x150x72xf32, #tpu.memory_space<vmem>>, vector<1x150x72xf32>
    %32 = vector.shape_cast %31 : vector<1x150x72xf32> to vector<150x72xf32>
    %cst_33 = arith.constant dense<0.000000e+00> : vector<25x72xf32>
    %33 = tpu.matmul %27, %32, %cst_33 {dimension_numbers = #tpu.dot_dimension_numbers<[1], [0], [0], [1], [0, 0, 1, 1], [], []>} : vector<25x150xf32>, vector<150x72xf32>, vector<25x72xf32> -> vector<25x72xf32>
    %34 = arith.maximumf %30, %33 : vector<25x72xf32>
    %c2_34 = arith.constant 2 : index
    %c0_35 = arith.constant 0 : index
    %c0_36 = arith.constant 0 : index
    %35 = vector.load %arg4[%c2_34, %c0_35, %c0_36] : memref<3x150x72xf32, #tpu.memory_space<vmem>>, vector<1x150x72xf32>
    %36 = vector.shape_cast %35 : vector<1x150x72xf32> to vector<150x72xf32>
    %cst_37 = arith.constant dense<0.000000e+00> : vector<25x72xf32>
    %37 = tpu.matmul %27, %36, %cst_37 {dimension_numbers = #tpu.dot_dimension_numbers<[1], [0], [0], [1], [0, 0, 1, 1], [], []>} : vector<25x150xf32>, vector<150x72xf32>, vector<25x72xf32> -> vector<25x72xf32>
    %38 = arith.maximumf %34, %37 : vector<25x72xf32>
    %c0_38 = arith.constant 0 : index
    %c0_39 = arith.constant 0 : index
    %c0_40 = arith.constant 0 : index
    %39 = vector.load %arg5[%c0_38, %c0_39, %c0_40] : memref<3x12x25xf32, #tpu.memory_space<vmem>>, vector<1x12x25xf32>
    %40 = vector.shape_cast %39 : vector<1x12x25xf32> to vector<12x25xf32>
    %cst_41 = arith.constant dense<0.000000e+00> : vector<12x72xf32>
    %41 = tpu.matmul %40, %38, %cst_41 {dimension_numbers = #tpu.dot_dimension_numbers<[1], [0], [0], [1], [0, 0, 1, 1], [], []>} : vector<12x25xf32>, vector<25x72xf32>, vector<12x72xf32> -> vector<12x72xf32>
    %c1_42 = arith.constant 1 : index
    %c0_43 = arith.constant 0 : index
    %c0_44 = arith.constant 0 : index
    %42 = vector.load %arg5[%c1_42, %c0_43, %c0_44] : memref<3x12x25xf32, #tpu.memory_space<vmem>>, vector<1x12x25xf32>
    %43 = vector.shape_cast %42 : vector<1x12x25xf32> to vector<12x25xf32>
    %cst_45 = arith.constant dense<0.000000e+00> : vector<12x72xf32>
    %44 = tpu.matmul %43, %38, %cst_45 {dimension_numbers = #tpu.dot_dimension_numbers<[1], [0], [0], [1], [0, 0, 1, 1], [], []>} : vector<12x25xf32>, vector<25x72xf32>, vector<12x72xf32> -> vector<12x72xf32>
    %45 = arith.maximumf %41, %44 : vector<12x72xf32>
    %c2_46 = arith.constant 2 : index
    %c0_47 = arith.constant 0 : index
    %c0_48 = arith.constant 0 : index
    %46 = vector.load %arg5[%c2_46, %c0_47, %c0_48] : memref<3x12x25xf32, #tpu.memory_space<vmem>>, vector<1x12x25xf32>
    %47 = vector.shape_cast %46 : vector<1x12x25xf32> to vector<12x25xf32>
    %cst_49 = arith.constant dense<0.000000e+00> : vector<12x72xf32>
    %48 = tpu.matmul %47, %38, %cst_49 {dimension_numbers = #tpu.dot_dimension_numbers<[1], [0], [0], [1], [0, 0, 1, 1], [], []>} : vector<12x25xf32>, vector<25x72xf32>, vector<12x72xf32> -> vector<12x72xf32>
    %49 = arith.maximumf %45, %48 : vector<12x72xf32>
    %c0_50 = arith.constant 0 : index
    %c0_51 = arith.constant 0 : index
    %50 = vector.load %arg6[%c0_50, %c0_51] : memref<1x72xf32, #tpu.memory_space<vmem>>, vector<1x72xf32>
    %51 = vector.broadcast %50 : vector<1x72xf32> to vector<12x72xf32>
    %52 = arith.mulf %49, %51 : vector<12x72xf32>
    %c0_52 = arith.constant 0 : index
    %c0_53 = arith.constant 0 : index
    %53 = vector.load %arg7[%c0_52, %c0_53] : memref<1x72xf32, #tpu.memory_space<vmem>>, vector<1x72xf32>
    %54 = vector.broadcast %53 : vector<1x72xf32> to vector<12x72xf32>
    %55 = arith.addf %52, %54 : vector<12x72xf32>
    %56 = vector.extract_strided_slice %55 {offsets = [0, 0], sizes = [9, 72], strides = [1, 1]} : vector<12x72xf32> to vector<9x72xf32>
    %c0_54 = arith.constant 0 : index
    %c0_55 = arith.constant 0 : index
    %c0_56 = arith.constant 0 : index
    %57 = vector.load %arg8[%c0_54, %c0_55, %c0_56] : memref<4x72x153xf32, #tpu.memory_space<vmem>>, vector<1x72x153xf32>
    %58 = vector.shape_cast %57 : vector<1x72x153xf32> to vector<72x153xf32>
    %cst_57 = arith.constant dense<0.000000e+00> : vector<9x153xf32>
    %59 = tpu.matmul %56, %58, %cst_57 {dimension_numbers = #tpu.dot_dimension_numbers<[1], [0], [0], [1], [0, 0, 1, 1], [], []>} : vector<9x72xf32>, vector<72x153xf32>, vector<9x153xf32> -> vector<9x153xf32>
    %60 = vector.extract_strided_slice %55 {offsets = [1, 0], sizes = [9, 72], strides = [1, 1]} : vector<12x72xf32> to vector<9x72xf32>
    %c1_58 = arith.constant 1 : index
    %c0_59 = arith.constant 0 : index
    %c0_60 = arith.constant 0 : index
    %61 = vector.load %arg8[%c1_58, %c0_59, %c0_60] : memref<4x72x153xf32, #tpu.memory_space<vmem>>, vector<1x72x153xf32>
    %62 = vector.shape_cast %61 : vector<1x72x153xf32> to vector<72x153xf32>
    %cst_61 = arith.constant dense<0.000000e+00> : vector<9x153xf32>
    %63 = tpu.matmul %60, %62, %cst_61 {dimension_numbers = #tpu.dot_dimension_numbers<[1], [0], [0], [1], [0, 0, 1, 1], [], []>} : vector<9x72xf32>, vector<72x153xf32>, vector<9x153xf32> -> vector<9x153xf32>
    %64 = arith.addf %59, %63 : vector<9x153xf32>
    %65 = vector.extract_strided_slice %55 {offsets = [2, 0], sizes = [9, 72], strides = [1, 1]} : vector<12x72xf32> to vector<9x72xf32>
    %c2_62 = arith.constant 2 : index
    %c0_63 = arith.constant 0 : index
    %c0_64 = arith.constant 0 : index
    %66 = vector.load %arg8[%c2_62, %c0_63, %c0_64] : memref<4x72x153xf32, #tpu.memory_space<vmem>>, vector<1x72x153xf32>
    %67 = vector.shape_cast %66 : vector<1x72x153xf32> to vector<72x153xf32>
    %cst_65 = arith.constant dense<0.000000e+00> : vector<9x153xf32>
    %68 = tpu.matmul %65, %67, %cst_65 {dimension_numbers = #tpu.dot_dimension_numbers<[1], [0], [0], [1], [0, 0, 1, 1], [], []>} : vector<9x72xf32>, vector<72x153xf32>, vector<9x153xf32> -> vector<9x153xf32>
    %69 = arith.addf %64, %68 : vector<9x153xf32>
    %70 = vector.extract_strided_slice %55 {offsets = [3, 0], sizes = [9, 72], strides = [1, 1]} : vector<12x72xf32> to vector<9x72xf32>
    %c3_66 = arith.constant 3 : index
    %c0_67 = arith.constant 0 : index
    %c0_68 = arith.constant 0 : index
    %71 = vector.load %arg8[%c3_66, %c0_67, %c0_68] : memref<4x72x153xf32, #tpu.memory_space<vmem>>, vector<1x72x153xf32>
    %72 = vector.shape_cast %71 : vector<1x72x153xf32> to vector<72x153xf32>
    %cst_69 = arith.constant dense<0.000000e+00> : vector<9x153xf32>
    %73 = tpu.matmul %70, %72, %cst_69 {dimension_numbers = #tpu.dot_dimension_numbers<[1], [0], [0], [1], [0, 0, 1, 1], [], []>} : vector<9x72xf32>, vector<72x153xf32>, vector<9x153xf32> -> vector<9x153xf32>
    %74 = arith.addf %69, %73 : vector<9x153xf32>
    %c0_70 = arith.constant 0 : index
    %c0_71 = arith.constant 0 : index
    %75 = vector.load %arg9[%c0_70, %c0_71] : memref<1x153xf32, #tpu.memory_space<vmem>>, vector<1x153xf32>
    %76 = vector.broadcast %75 : vector<1x153xf32> to vector<9x153xf32>
    %77 = arith.addf %74, %76 : vector<9x153xf32>
    %cst_72 = arith.constant 0.000000e+00 : f32
    %78 = vector.broadcast %cst_72 : f32 to vector<9x153xf32>
    %79 = arith.maximumf %77, %78 : vector<9x153xf32>
    %c0_73 = arith.constant 0 : index
    %c0_74 = arith.constant 0 : index
    %c0_75 = arith.constant 0 : index
    %80 = vector.load %arg10[%c0_73, %c0_74, %c0_75] : memref<2x153x68xf32, #tpu.memory_space<vmem>>, vector<1x153x68xf32>
    %81 = vector.shape_cast %80 : vector<1x153x68xf32> to vector<153x68xf32>
    %cst_76 = arith.constant dense<0.000000e+00> : vector<9x68xf32>
    %82 = tpu.matmul %79, %81, %cst_76 {dimension_numbers = #tpu.dot_dimension_numbers<[1], [0], [0], [1], [0, 0, 1, 1], [], []>} : vector<9x153xf32>, vector<153x68xf32>, vector<9x68xf32> -> vector<9x68xf32>
    %c1_77 = arith.constant 1 : index
    %c0_78 = arith.constant 0 : index
    %c0_79 = arith.constant 0 : index
    %83 = vector.load %arg10[%c1_77, %c0_78, %c0_79] : memref<2x153x68xf32, #tpu.memory_space<vmem>>, vector<1x153x68xf32>
    %84 = vector.shape_cast %83 : vector<1x153x68xf32> to vector<153x68xf32>
    %cst_80 = arith.constant dense<0.000000e+00> : vector<9x68xf32>
    %85 = tpu.matmul %79, %84, %cst_80 {dimension_numbers = #tpu.dot_dimension_numbers<[1], [0], [0], [1], [0, 0, 1, 1], [], []>} : vector<9x153xf32>, vector<153x68xf32>, vector<9x68xf32> -> vector<9x68xf32>
    %86 = arith.maximumf %82, %85 : vector<9x68xf32>
    %c0_81 = arith.constant 0 : index
    %c0_82 = arith.constant 0 : index
    %c0_83 = arith.constant 0 : index
    %87 = vector.load %arg11[%c0_81, %c0_82, %c0_83] : memref<2x4x9xf32, #tpu.memory_space<vmem>>, vector<1x4x9xf32>
    %88 = vector.shape_cast %87 : vector<1x4x9xf32> to vector<4x9xf32>
    %cst_84 = arith.constant dense<0.000000e+00> : vector<4x68xf32>
    %89 = tpu.matmul %88, %86, %cst_84 {dimension_numbers = #tpu.dot_dimension_numbers<[1], [0], [0], [1], [0, 0, 1, 1], [], []>} : vector<4x9xf32>, vector<9x68xf32>, vector<4x68xf32> -> vector<4x68xf32>
    %c1_85 = arith.constant 1 : index
    %c0_86 = arith.constant 0 : index
    %c0_87 = arith.constant 0 : index
    %90 = vector.load %arg11[%c1_85, %c0_86, %c0_87] : memref<2x4x9xf32, #tpu.memory_space<vmem>>, vector<1x4x9xf32>
    %91 = vector.shape_cast %90 : vector<1x4x9xf32> to vector<4x9xf32>
    %cst_88 = arith.constant dense<0.000000e+00> : vector<4x68xf32>
    %92 = tpu.matmul %91, %86, %cst_88 {dimension_numbers = #tpu.dot_dimension_numbers<[1], [0], [0], [1], [0, 0, 1, 1], [], []>} : vector<4x9xf32>, vector<9x68xf32>, vector<4x68xf32> -> vector<4x68xf32>
    %93 = arith.maximumf %89, %92 : vector<4x68xf32>
    %c0_89 = arith.constant 0 : index
    %c0_90 = arith.constant 0 : index
    %94 = vector.load %arg12[%c0_89, %c0_90] : memref<1x68xf32, #tpu.memory_space<vmem>>, vector<1x68xf32>
    %95 = vector.broadcast %94 : vector<1x68xf32> to vector<4x68xf32>
    %96 = arith.mulf %93, %95 : vector<4x68xf32>
    %c0_91 = arith.constant 0 : index
    %c0_92 = arith.constant 0 : index
    %97 = vector.load %arg13[%c0_91, %c0_92] : memref<1x68xf32, #tpu.memory_space<vmem>>, vector<1x68xf32>
    %98 = vector.broadcast %97 : vector<1x68xf32> to vector<4x68xf32>
    %99 = arith.addf %96, %98 : vector<4x68xf32>
    %100 = vector.extract_strided_slice %99 {offsets = [0, 0], sizes = [1, 68], strides = [1, 1]} : vector<4x68xf32> to vector<1x68xf32>
    %c0_93 = arith.constant 0 : index
    %c0_94 = arith.constant 0 : index
    %c0_95 = arith.constant 0 : index
    %101 = vector.load %arg14[%c0_93, %c0_94, %c0_95] : memref<4x68x84xf32, #tpu.memory_space<vmem>>, vector<1x68x84xf32>
    %102 = vector.shape_cast %101 : vector<1x68x84xf32> to vector<68x84xf32>
    %cst_96 = arith.constant dense<0.000000e+00> : vector<1x84xf32>
    %103 = tpu.matmul %100, %102, %cst_96 {dimension_numbers = #tpu.dot_dimension_numbers<[1], [0], [0], [1], [0, 0, 1, 1], [], []>} : vector<1x68xf32>, vector<68x84xf32>, vector<1x84xf32> -> vector<1x84xf32>
    %104 = vector.extract_strided_slice %99 {offsets = [1, 0], sizes = [1, 68], strides = [1, 1]} : vector<4x68xf32> to vector<1x68xf32>
    %c1_97 = arith.constant 1 : index
    %c0_98 = arith.constant 0 : index
    %c0_99 = arith.constant 0 : index
    %105 = vector.load %arg14[%c1_97, %c0_98, %c0_99] : memref<4x68x84xf32, #tpu.memory_space<vmem>>, vector<1x68x84xf32>
    %106 = vector.shape_cast %105 : vector<1x68x84xf32> to vector<68x84xf32>
    %cst_100 = arith.constant dense<0.000000e+00> : vector<1x84xf32>
    %107 = tpu.matmul %104, %106, %cst_100 {dimension_numbers = #tpu.dot_dimension_numbers<[1], [0], [0], [1], [0, 0, 1, 1], [], []>} : vector<1x68xf32>, vector<68x84xf32>, vector<1x84xf32> -> vector<1x84xf32>
    %108 = arith.addf %103, %107 : vector<1x84xf32>
    %109 = vector.extract_strided_slice %99 {offsets = [2, 0], sizes = [1, 68], strides = [1, 1]} : vector<4x68xf32> to vector<1x68xf32>
    %c2_101 = arith.constant 2 : index
    %c0_102 = arith.constant 0 : index
    %c0_103 = arith.constant 0 : index
    %110 = vector.load %arg14[%c2_101, %c0_102, %c0_103] : memref<4x68x84xf32, #tpu.memory_space<vmem>>, vector<1x68x84xf32>
    %111 = vector.shape_cast %110 : vector<1x68x84xf32> to vector<68x84xf32>
    %cst_104 = arith.constant dense<0.000000e+00> : vector<1x84xf32>
    %112 = tpu.matmul %109, %111, %cst_104 {dimension_numbers = #tpu.dot_dimension_numbers<[1], [0], [0], [1], [0, 0, 1, 1], [], []>} : vector<1x68xf32>, vector<68x84xf32>, vector<1x84xf32> -> vector<1x84xf32>
    %113 = arith.addf %108, %112 : vector<1x84xf32>
    %114 = vector.extract_strided_slice %99 {offsets = [3, 0], sizes = [1, 68], strides = [1, 1]} : vector<4x68xf32> to vector<1x68xf32>
    %c3_105 = arith.constant 3 : index
    %c0_106 = arith.constant 0 : index
    %c0_107 = arith.constant 0 : index
    %115 = vector.load %arg14[%c3_105, %c0_106, %c0_107] : memref<4x68x84xf32, #tpu.memory_space<vmem>>, vector<1x68x84xf32>
    %116 = vector.shape_cast %115 : vector<1x68x84xf32> to vector<68x84xf32>
    %cst_108 = arith.constant dense<0.000000e+00> : vector<1x84xf32>
    %117 = tpu.matmul %114, %116, %cst_108 {dimension_numbers = #tpu.dot_dimension_numbers<[1], [0], [0], [1], [0, 0, 1, 1], [], []>} : vector<1x68xf32>, vector<68x84xf32>, vector<1x84xf32> -> vector<1x84xf32>
    %118 = arith.addf %113, %117 : vector<1x84xf32>
    %c1_109 = arith.constant 1 : index
    %c0_110 = arith.constant 0 : index
    %c0_111 = arith.constant 0 : index
    %119 = vector.load %arg1[%c1_109, %c0_110, %c0_111] : memref<4x28x28xf32, #tpu.memory_space<vmem>>, vector<1x25x28xf32>
    %120 = vector.shape_cast %119 : vector<1x25x28xf32> to vector<25x28xf32>
    %c0_112 = arith.constant 0 : index
    %c0_113 = arith.constant 0 : index
    %c0_114 = arith.constant 0 : index
    %121 = vector.load %arg2[%c0_112, %c0_113, %c0_114] : memref<4x28x150xf32, #tpu.memory_space<vmem>>, vector<1x28x150xf32>
    %122 = vector.shape_cast %121 : vector<1x28x150xf32> to vector<28x150xf32>
    %cst_115 = arith.constant dense<0.000000e+00> : vector<25x150xf32>
    %123 = tpu.matmul %120, %122, %cst_115 {dimension_numbers = #tpu.dot_dimension_numbers<[1], [0], [0], [1], [0, 0, 1, 1], [], []>} : vector<25x28xf32>, vector<28x150xf32>, vector<25x150xf32> -> vector<25x150xf32>
    %c1_116 = arith.constant 1 : index
    %c1_117 = arith.constant 1 : index
    %c0_118 = arith.constant 0 : index
    %124 = vector.load %arg1[%c1_116, %c1_117, %c0_118] : memref<4x28x28xf32, #tpu.memory_space<vmem>>, vector<1x25x28xf32>
    %125 = vector.shape_cast %124 : vector<1x25x28xf32> to vector<25x28xf32>
    %c1_119 = arith.constant 1 : index
    %c0_120 = arith.constant 0 : index
    %c0_121 = arith.constant 0 : index
    %126 = vector.load %arg2[%c1_119, %c0_120, %c0_121] : memref<4x28x150xf32, #tpu.memory_space<vmem>>, vector<1x28x150xf32>
    %127 = vector.shape_cast %126 : vector<1x28x150xf32> to vector<28x150xf32>
    %cst_122 = arith.constant dense<0.000000e+00> : vector<25x150xf32>
    %128 = tpu.matmul %125, %127, %cst_122 {dimension_numbers = #tpu.dot_dimension_numbers<[1], [0], [0], [1], [0, 0, 1, 1], [], []>} : vector<25x28xf32>, vector<28x150xf32>, vector<25x150xf32> -> vector<25x150xf32>
    %129 = arith.addf %123, %128 : vector<25x150xf32>
    %c1_123 = arith.constant 1 : index
    %c2_124 = arith.constant 2 : index
    %c0_125 = arith.constant 0 : index
    %130 = vector.load %arg1[%c1_123, %c2_124, %c0_125] : memref<4x28x28xf32, #tpu.memory_space<vmem>>, vector<1x25x28xf32>
    %131 = vector.shape_cast %130 : vector<1x25x28xf32> to vector<25x28xf32>
    %c2_126 = arith.constant 2 : index
    %c0_127 = arith.constant 0 : index
    %c0_128 = arith.constant 0 : index
    %132 = vector.load %arg2[%c2_126, %c0_127, %c0_128] : memref<4x28x150xf32, #tpu.memory_space<vmem>>, vector<1x28x150xf32>
    %133 = vector.shape_cast %132 : vector<1x28x150xf32> to vector<28x150xf32>
    %cst_129 = arith.constant dense<0.000000e+00> : vector<25x150xf32>
    %134 = tpu.matmul %131, %133, %cst_129 {dimension_numbers = #tpu.dot_dimension_numbers<[1], [0], [0], [1], [0, 0, 1, 1], [], []>} : vector<25x28xf32>, vector<28x150xf32>, vector<25x150xf32> -> vector<25x150xf32>
    %135 = arith.addf %129, %134 : vector<25x150xf32>
    %c1_130 = arith.constant 1 : index
    %c3_131 = arith.constant 3 : index
    %c0_132 = arith.constant 0 : index
    %136 = vector.load %arg1[%c1_130, %c3_131, %c0_132] : memref<4x28x28xf32, #tpu.memory_space<vmem>>, vector<1x25x28xf32>
    %137 = vector.shape_cast %136 : vector<1x25x28xf32> to vector<25x28xf32>
    %c3_133 = arith.constant 3 : index
    %c0_134 = arith.constant 0 : index
    %c0_135 = arith.constant 0 : index
    %138 = vector.load %arg2[%c3_133, %c0_134, %c0_135] : memref<4x28x150xf32, #tpu.memory_space<vmem>>, vector<1x28x150xf32>
    %139 = vector.shape_cast %138 : vector<1x28x150xf32> to vector<28x150xf32>
    %cst_136 = arith.constant dense<0.000000e+00> : vector<25x150xf32>
    %140 = tpu.matmul %137, %139, %cst_136 {dimension_numbers = #tpu.dot_dimension_numbers<[1], [0], [0], [1], [0, 0, 1, 1], [], []>} : vector<25x28xf32>, vector<28x150xf32>, vector<25x150xf32> -> vector<25x150xf32>
    %141 = arith.addf %135, %140 : vector<25x150xf32>
    %c0_137 = arith.constant 0 : index
    %c0_138 = arith.constant 0 : index
    %142 = vector.load %arg3[%c0_137, %c0_138] : memref<1x150xf32, #tpu.memory_space<vmem>>, vector<1x150xf32>
    %143 = vector.broadcast %142 : vector<1x150xf32> to vector<25x150xf32>
    %144 = arith.addf %141, %143 : vector<25x150xf32>
    %cst_139 = arith.constant 0.000000e+00 : f32
    %145 = vector.broadcast %cst_139 : f32 to vector<25x150xf32>
    %146 = arith.maximumf %144, %145 : vector<25x150xf32>
    %c0_140 = arith.constant 0 : index
    %c0_141 = arith.constant 0 : index
    %c0_142 = arith.constant 0 : index
    %147 = vector.load %arg4[%c0_140, %c0_141, %c0_142] : memref<3x150x72xf32, #tpu.memory_space<vmem>>, vector<1x150x72xf32>
    %148 = vector.shape_cast %147 : vector<1x150x72xf32> to vector<150x72xf32>
    %cst_143 = arith.constant dense<0.000000e+00> : vector<25x72xf32>
    %149 = tpu.matmul %146, %148, %cst_143 {dimension_numbers = #tpu.dot_dimension_numbers<[1], [0], [0], [1], [0, 0, 1, 1], [], []>} : vector<25x150xf32>, vector<150x72xf32>, vector<25x72xf32> -> vector<25x72xf32>
    %c1_144 = arith.constant 1 : index
    %c0_145 = arith.constant 0 : index
    %c0_146 = arith.constant 0 : index
    %150 = vector.load %arg4[%c1_144, %c0_145, %c0_146] : memref<3x150x72xf32, #tpu.memory_space<vmem>>, vector<1x150x72xf32>
    %151 = vector.shape_cast %150 : vector<1x150x72xf32> to vector<150x72xf32>
    %cst_147 = arith.constant dense<0.000000e+00> : vector<25x72xf32>
    %152 = tpu.matmul %146, %151, %cst_147 {dimension_numbers = #tpu.dot_dimension_numbers<[1], [0], [0], [1], [0, 0, 1, 1], [], []>} : vector<25x150xf32>, vector<150x72xf32>, vector<25x72xf32> -> vector<25x72xf32>
    %153 = arith.maximumf %149, %152 : vector<25x72xf32>
    %c2_148 = arith.constant 2 : index
    %c0_149 = arith.constant 0 : index
    %c0_150 = arith.constant 0 : index
    %154 = vector.load %arg4[%c2_148, %c0_149, %c0_150] : memref<3x150x72xf32, #tpu.memory_space<vmem>>, vector<1x150x72xf32>
    %155 = vector.shape_cast %154 : vector<1x150x72xf32> to vector<150x72xf32>
    %cst_151 = arith.constant dense<0.000000e+00> : vector<25x72xf32>
    %156 = tpu.matmul %146, %155, %cst_151 {dimension_numbers = #tpu.dot_dimension_numbers<[1], [0], [0], [1], [0, 0, 1, 1], [], []>} : vector<25x150xf32>, vector<150x72xf32>, vector<25x72xf32> -> vector<25x72xf32>
    %157 = arith.maximumf %153, %156 : vector<25x72xf32>
    %c0_152 = arith.constant 0 : index
    %c0_153 = arith.constant 0 : index
    %c0_154 = arith.constant 0 : index
    %158 = vector.load %arg5[%c0_152, %c0_153, %c0_154] : memref<3x12x25xf32, #tpu.memory_space<vmem>>, vector<1x12x25xf32>
    %159 = vector.shape_cast %158 : vector<1x12x25xf32> to vector<12x25xf32>
    %cst_155 = arith.constant dense<0.000000e+00> : vector<12x72xf32>
    %160 = tpu.matmul %159, %157, %cst_155 {dimension_numbers = #tpu.dot_dimension_numbers<[1], [0], [0], [1], [0, 0, 1, 1], [], []>} : vector<12x25xf32>, vector<25x72xf32>, vector<12x72xf32> -> vector<12x72xf32>
    %c1_156 = arith.constant 1 : index
    %c0_157 = arith.constant 0 : index
    %c0_158 = arith.constant 0 : index
    %161 = vector.load %arg5[%c1_156, %c0_157, %c0_158] : memref<3x12x25xf32, #tpu.memory_space<vmem>>, vector<1x12x25xf32>
    %162 = vector.shape_cast %161 : vector<1x12x25xf32> to vector<12x25xf32>
    %cst_159 = arith.constant dense<0.000000e+00> : vector<12x72xf32>
    %163 = tpu.matmul %162, %157, %cst_159 {dimension_numbers = #tpu.dot_dimension_numbers<[1], [0], [0], [1], [0, 0, 1, 1], [], []>} : vector<12x25xf32>, vector<25x72xf32>, vector<12x72xf32> -> vector<12x72xf32>
    %164 = arith.maximumf %160, %163 : vector<12x72xf32>
    %c2_160 = arith.constant 2 : index
    %c0_161 = arith.constant 0 : index
    %c0_162 = arith.constant 0 : index
    %165 = vector.load %arg5[%c2_160, %c0_161, %c0_162] : memref<3x12x25xf32, #tpu.memory_space<vmem>>, vector<1x12x25xf32>
    %166 = vector.shape_cast %165 : vector<1x12x25xf32> to vector<12x25xf32>
    %cst_163 = arith.constant dense<0.000000e+00> : vector<12x72xf32>
    %167 = tpu.matmul %166, %157, %cst_163 {dimension_numbers = #tpu.dot_dimension_numbers<[1], [0], [0], [1], [0, 0, 1, 1], [], []>} : vector<12x25xf32>, vector<25x72xf32>, vector<12x72xf32> -> vector<12x72xf32>
    %168 = arith.maximumf %164, %167 : vector<12x72xf32>
    %c0_164 = arith.constant 0 : index
    %c0_165 = arith.constant 0 : index
    %169 = vector.load %arg6[%c0_164, %c0_165] : memref<1x72xf32, #tpu.memory_space<vmem>>, vector<1x72xf32>
    %170 = vector.broadcast %169 : vector<1x72xf32> to vector<12x72xf32>
    %171 = arith.mulf %168, %170 : vector<12x72xf32>
    %c0_166 = arith.constant 0 : index
    %c0_167 = arith.constant 0 : index
    %172 = vector.load %arg7[%c0_166, %c0_167] : memref<1x72xf32, #tpu.memory_space<vmem>>, vector<1x72xf32>
    %173 = vector.broadcast %172 : vector<1x72xf32> to vector<12x72xf32>
    %174 = arith.addf %171, %173 : vector<12x72xf32>
    %175 = vector.extract_strided_slice %174 {offsets = [0, 0], sizes = [9, 72], strides = [1, 1]} : vector<12x72xf32> to vector<9x72xf32>
    %c0_168 = arith.constant 0 : index
    %c0_169 = arith.constant 0 : index
    %c0_170 = arith.constant 0 : index
    %176 = vector.load %arg8[%c0_168, %c0_169, %c0_170] : memref<4x72x153xf32, #tpu.memory_space<vmem>>, vector<1x72x153xf32>
    %177 = vector.shape_cast %176 : vector<1x72x153xf32> to vector<72x153xf32>
    %cst_171 = arith.constant dense<0.000000e+00> : vector<9x153xf32>
    %178 = tpu.matmul %175, %177, %cst_171 {dimension_numbers = #tpu.dot_dimension_numbers<[1], [0], [0], [1], [0, 0, 1, 1], [], []>} : vector<9x72xf32>, vector<72x153xf32>, vector<9x153xf32> -> vector<9x153xf32>
    %179 = vector.extract_strided_slice %174 {offsets = [1, 0], sizes = [9, 72], strides = [1, 1]} : vector<12x72xf32> to vector<9x72xf32>
    %c1_172 = arith.constant 1 : index
    %c0_173 = arith.constant 0 : index
    %c0_174 = arith.constant 0 : index
    %180 = vector.load %arg8[%c1_172, %c0_173, %c0_174] : memref<4x72x153xf32, #tpu.memory_space<vmem>>, vector<1x72x153xf32>
    %181 = vector.shape_cast %180 : vector<1x72x153xf32> to vector<72x153xf32>
    %cst_175 = arith.constant dense<0.000000e+00> : vector<9x153xf32>
    %182 = tpu.matmul %179, %181, %cst_175 {dimension_numbers = #tpu.dot_dimension_numbers<[1], [0], [0], [1], [0, 0, 1, 1], [], []>} : vector<9x72xf32>, vector<72x153xf32>, vector<9x153xf32> -> vector<9x153xf32>
    %183 = arith.addf %178, %182 : vector<9x153xf32>
    %184 = vector.extract_strided_slice %174 {offsets = [2, 0], sizes = [9, 72], strides = [1, 1]} : vector<12x72xf32> to vector<9x72xf32>
    %c2_176 = arith.constant 2 : index
    %c0_177 = arith.constant 0 : index
    %c0_178 = arith.constant 0 : index
    %185 = vector.load %arg8[%c2_176, %c0_177, %c0_178] : memref<4x72x153xf32, #tpu.memory_space<vmem>>, vector<1x72x153xf32>
    %186 = vector.shape_cast %185 : vector<1x72x153xf32> to vector<72x153xf32>
    %cst_179 = arith.constant dense<0.000000e+00> : vector<9x153xf32>
    %187 = tpu.matmul %184, %186, %cst_179 {dimension_numbers = #tpu.dot_dimension_numbers<[1], [0], [0], [1], [0, 0, 1, 1], [], []>} : vector<9x72xf32>, vector<72x153xf32>, vector<9x153xf32> -> vector<9x153xf32>
    %188 = arith.addf %183, %187 : vector<9x153xf32>
    %189 = vector.extract_strided_slice %174 {offsets = [3, 0], sizes = [9, 72], strides = [1, 1]} : vector<12x72xf32> to vector<9x72xf32>
    %c3_180 = arith.constant 3 : index
    %c0_181 = arith.constant 0 : index
    %c0_182 = arith.constant 0 : index
    %190 = vector.load %arg8[%c3_180, %c0_181, %c0_182] : memref<4x72x153xf32, #tpu.memory_space<vmem>>, vector<1x72x153xf32>
    %191 = vector.shape_cast %190 : vector<1x72x153xf32> to vector<72x153xf32>
    %cst_183 = arith.constant dense<0.000000e+00> : vector<9x153xf32>
    %192 = tpu.matmul %189, %191, %cst_183 {dimension_numbers = #tpu.dot_dimension_numbers<[1], [0], [0], [1], [0, 0, 1, 1], [], []>} : vector<9x72xf32>, vector<72x153xf32>, vector<9x153xf32> -> vector<9x153xf32>
    %193 = arith.addf %188, %192 : vector<9x153xf32>
    %c0_184 = arith.constant 0 : index
    %c0_185 = arith.constant 0 : index
    %194 = vector.load %arg9[%c0_184, %c0_185] : memref<1x153xf32, #tpu.memory_space<vmem>>, vector<1x153xf32>
    %195 = vector.broadcast %194 : vector<1x153xf32> to vector<9x153xf32>
    %196 = arith.addf %193, %195 : vector<9x153xf32>
    %cst_186 = arith.constant 0.000000e+00 : f32
    %197 = vector.broadcast %cst_186 : f32 to vector<9x153xf32>
    %198 = arith.maximumf %196, %197 : vector<9x153xf32>
    %c0_187 = arith.constant 0 : index
    %c0_188 = arith.constant 0 : index
    %c0_189 = arith.constant 0 : index
    %199 = vector.load %arg10[%c0_187, %c0_188, %c0_189] : memref<2x153x68xf32, #tpu.memory_space<vmem>>, vector<1x153x68xf32>
    %200 = vector.shape_cast %199 : vector<1x153x68xf32> to vector<153x68xf32>
    %cst_190 = arith.constant dense<0.000000e+00> : vector<9x68xf32>
    %201 = tpu.matmul %198, %200, %cst_190 {dimension_numbers = #tpu.dot_dimension_numbers<[1], [0], [0], [1], [0, 0, 1, 1], [], []>} : vector<9x153xf32>, vector<153x68xf32>, vector<9x68xf32> -> vector<9x68xf32>
    %c1_191 = arith.constant 1 : index
    %c0_192 = arith.constant 0 : index
    %c0_193 = arith.constant 0 : index
    %202 = vector.load %arg10[%c1_191, %c0_192, %c0_193] : memref<2x153x68xf32, #tpu.memory_space<vmem>>, vector<1x153x68xf32>
    %203 = vector.shape_cast %202 : vector<1x153x68xf32> to vector<153x68xf32>
    %cst_194 = arith.constant dense<0.000000e+00> : vector<9x68xf32>
    %204 = tpu.matmul %198, %203, %cst_194 {dimension_numbers = #tpu.dot_dimension_numbers<[1], [0], [0], [1], [0, 0, 1, 1], [], []>} : vector<9x153xf32>, vector<153x68xf32>, vector<9x68xf32> -> vector<9x68xf32>
    %205 = arith.maximumf %201, %204 : vector<9x68xf32>
    %c0_195 = arith.constant 0 : index
    %c0_196 = arith.constant 0 : index
    %c0_197 = arith.constant 0 : index
    %206 = vector.load %arg11[%c0_195, %c0_196, %c0_197] : memref<2x4x9xf32, #tpu.memory_space<vmem>>, vector<1x4x9xf32>
    %207 = vector.shape_cast %206 : vector<1x4x9xf32> to vector<4x9xf32>
    %cst_198 = arith.constant dense<0.000000e+00> : vector<4x68xf32>
    %208 = tpu.matmul %207, %205, %cst_198 {dimension_numbers = #tpu.dot_dimension_numbers<[1], [0], [0], [1], [0, 0, 1, 1], [], []>} : vector<4x9xf32>, vector<9x68xf32>, vector<4x68xf32> -> vector<4x68xf32>
    %c1_199 = arith.constant 1 : index
    %c0_200 = arith.constant 0 : index
    %c0_201 = arith.constant 0 : index
    %209 = vector.load %arg11[%c1_199, %c0_200, %c0_201] : memref<2x4x9xf32, #tpu.memory_space<vmem>>, vector<1x4x9xf32>
    %210 = vector.shape_cast %209 : vector<1x4x9xf32> to vector<4x9xf32>
    %cst_202 = arith.constant dense<0.000000e+00> : vector<4x68xf32>
    %211 = tpu.matmul %210, %205, %cst_202 {dimension_numbers = #tpu.dot_dimension_numbers<[1], [0], [0], [1], [0, 0, 1, 1], [], []>} : vector<4x9xf32>, vector<9x68xf32>, vector<4x68xf32> -> vector<4x68xf32>
    %212 = arith.maximumf %208, %211 : vector<4x68xf32>
    %c0_203 = arith.constant 0 : index
    %c0_204 = arith.constant 0 : index
    %213 = vector.load %arg12[%c0_203, %c0_204] : memref<1x68xf32, #tpu.memory_space<vmem>>, vector<1x68xf32>
    %214 = vector.broadcast %213 : vector<1x68xf32> to vector<4x68xf32>
    %215 = arith.mulf %212, %214 : vector<4x68xf32>
    %c0_205 = arith.constant 0 : index
    %c0_206 = arith.constant 0 : index
    %216 = vector.load %arg13[%c0_205, %c0_206] : memref<1x68xf32, #tpu.memory_space<vmem>>, vector<1x68xf32>
    %217 = vector.broadcast %216 : vector<1x68xf32> to vector<4x68xf32>
    %218 = arith.addf %215, %217 : vector<4x68xf32>
    %219 = vector.extract_strided_slice %218 {offsets = [0, 0], sizes = [1, 68], strides = [1, 1]} : vector<4x68xf32> to vector<1x68xf32>
    %c0_207 = arith.constant 0 : index
    %c0_208 = arith.constant 0 : index
    %c0_209 = arith.constant 0 : index
    %220 = vector.load %arg14[%c0_207, %c0_208, %c0_209] : memref<4x68x84xf32, #tpu.memory_space<vmem>>, vector<1x68x84xf32>
    %221 = vector.shape_cast %220 : vector<1x68x84xf32> to vector<68x84xf32>
    %cst_210 = arith.constant dense<0.000000e+00> : vector<1x84xf32>
    %222 = tpu.matmul %219, %221, %cst_210 {dimension_numbers = #tpu.dot_dimension_numbers<[1], [0], [0], [1], [0, 0, 1, 1], [], []>} : vector<1x68xf32>, vector<68x84xf32>, vector<1x84xf32> -> vector<1x84xf32>
    %223 = vector.extract_strided_slice %218 {offsets = [1, 0], sizes = [1, 68], strides = [1, 1]} : vector<4x68xf32> to vector<1x68xf32>
    %c1_211 = arith.constant 1 : index
    %c0_212 = arith.constant 0 : index
    %c0_213 = arith.constant 0 : index
    %224 = vector.load %arg14[%c1_211, %c0_212, %c0_213] : memref<4x68x84xf32, #tpu.memory_space<vmem>>, vector<1x68x84xf32>
    %225 = vector.shape_cast %224 : vector<1x68x84xf32> to vector<68x84xf32>
    %cst_214 = arith.constant dense<0.000000e+00> : vector<1x84xf32>
    %226 = tpu.matmul %223, %225, %cst_214 {dimension_numbers = #tpu.dot_dimension_numbers<[1], [0], [0], [1], [0, 0, 1, 1], [], []>} : vector<1x68xf32>, vector<68x84xf32>, vector<1x84xf32> -> vector<1x84xf32>
    %227 = arith.addf %222, %226 : vector<1x84xf32>
    %228 = vector.extract_strided_slice %218 {offsets = [2, 0], sizes = [1, 68], strides = [1, 1]} : vector<4x68xf32> to vector<1x68xf32>
    %c2_215 = arith.constant 2 : index
    %c0_216 = arith.constant 0 : index
    %c0_217 = arith.constant 0 : index
    %229 = vector.load %arg14[%c2_215, %c0_216, %c0_217] : memref<4x68x84xf32, #tpu.memory_space<vmem>>, vector<1x68x84xf32>
    %230 = vector.shape_cast %229 : vector<1x68x84xf32> to vector<68x84xf32>
    %cst_218 = arith.constant dense<0.000000e+00> : vector<1x84xf32>
    %231 = tpu.matmul %228, %230, %cst_218 {dimension_numbers = #tpu.dot_dimension_numbers<[1], [0], [0], [1], [0, 0, 1, 1], [], []>} : vector<1x68xf32>, vector<68x84xf32>, vector<1x84xf32> -> vector<1x84xf32>
    %232 = arith.addf %227, %231 : vector<1x84xf32>
    %233 = vector.extract_strided_slice %218 {offsets = [3, 0], sizes = [1, 68], strides = [1, 1]} : vector<4x68xf32> to vector<1x68xf32>
    %c3_219 = arith.constant 3 : index
    %c0_220 = arith.constant 0 : index
    %c0_221 = arith.constant 0 : index
    %234 = vector.load %arg14[%c3_219, %c0_220, %c0_221] : memref<4x68x84xf32, #tpu.memory_space<vmem>>, vector<1x68x84xf32>
    %235 = vector.shape_cast %234 : vector<1x68x84xf32> to vector<68x84xf32>
    %cst_222 = arith.constant dense<0.000000e+00> : vector<1x84xf32>
    %236 = tpu.matmul %233, %235, %cst_222 {dimension_numbers = #tpu.dot_dimension_numbers<[1], [0], [0], [1], [0, 0, 1, 1], [], []>} : vector<1x68xf32>, vector<68x84xf32>, vector<1x84xf32> -> vector<1x84xf32>
    %237 = arith.addf %232, %236 : vector<1x84xf32>
    %c2_223 = arith.constant 2 : index
    %c0_224 = arith.constant 0 : index
    %c0_225 = arith.constant 0 : index
    %238 = vector.load %arg1[%c2_223, %c0_224, %c0_225] : memref<4x28x28xf32, #tpu.memory_space<vmem>>, vector<1x25x28xf32>
    %239 = vector.shape_cast %238 : vector<1x25x28xf32> to vector<25x28xf32>
    %c0_226 = arith.constant 0 : index
    %c0_227 = arith.constant 0 : index
    %c0_228 = arith.constant 0 : index
    %240 = vector.load %arg2[%c0_226, %c0_227, %c0_228] : memref<4x28x150xf32, #tpu.memory_space<vmem>>, vector<1x28x150xf32>
    %241 = vector.shape_cast %240 : vector<1x28x150xf32> to vector<28x150xf32>
    %cst_229 = arith.constant dense<0.000000e+00> : vector<25x150xf32>
    %242 = tpu.matmul %239, %241, %cst_229 {dimension_numbers = #tpu.dot_dimension_numbers<[1], [0], [0], [1], [0, 0, 1, 1], [], []>} : vector<25x28xf32>, vector<28x150xf32>, vector<25x150xf32> -> vector<25x150xf32>
    %c2_230 = arith.constant 2 : index
    %c1_231 = arith.constant 1 : index
    %c0_232 = arith.constant 0 : index
    %243 = vector.load %arg1[%c2_230, %c1_231, %c0_232] : memref<4x28x28xf32, #tpu.memory_space<vmem>>, vector<1x25x28xf32>
    %244 = vector.shape_cast %243 : vector<1x25x28xf32> to vector<25x28xf32>
    %c1_233 = arith.constant 1 : index
    %c0_234 = arith.constant 0 : index
    %c0_235 = arith.constant 0 : index
    %245 = vector.load %arg2[%c1_233, %c0_234, %c0_235] : memref<4x28x150xf32, #tpu.memory_space<vmem>>, vector<1x28x150xf32>
    %246 = vector.shape_cast %245 : vector<1x28x150xf32> to vector<28x150xf32>
    %cst_236 = arith.constant dense<0.000000e+00> : vector<25x150xf32>
    %247 = tpu.matmul %244, %246, %cst_236 {dimension_numbers = #tpu.dot_dimension_numbers<[1], [0], [0], [1], [0, 0, 1, 1], [], []>} : vector<25x28xf32>, vector<28x150xf32>, vector<25x150xf32> -> vector<25x150xf32>
    %248 = arith.addf %242, %247 : vector<25x150xf32>
    %c2_237 = arith.constant 2 : index
    %c2_238 = arith.constant 2 : index
    %c0_239 = arith.constant 0 : index
    %249 = vector.load %arg1[%c2_237, %c2_238, %c0_239] : memref<4x28x28xf32, #tpu.memory_space<vmem>>, vector<1x25x28xf32>
    %250 = vector.shape_cast %249 : vector<1x25x28xf32> to vector<25x28xf32>
    %c2_240 = arith.constant 2 : index
    %c0_241 = arith.constant 0 : index
    %c0_242 = arith.constant 0 : index
    %251 = vector.load %arg2[%c2_240, %c0_241, %c0_242] : memref<4x28x150xf32, #tpu.memory_space<vmem>>, vector<1x28x150xf32>
    %252 = vector.shape_cast %251 : vector<1x28x150xf32> to vector<28x150xf32>
    %cst_243 = arith.constant dense<0.000000e+00> : vector<25x150xf32>
    %253 = tpu.matmul %250, %252, %cst_243 {dimension_numbers = #tpu.dot_dimension_numbers<[1], [0], [0], [1], [0, 0, 1, 1], [], []>} : vector<25x28xf32>, vector<28x150xf32>, vector<25x150xf32> -> vector<25x150xf32>
    %254 = arith.addf %248, %253 : vector<25x150xf32>
    %c2_244 = arith.constant 2 : index
    %c3_245 = arith.constant 3 : index
    %c0_246 = arith.constant 0 : index
    %255 = vector.load %arg1[%c2_244, %c3_245, %c0_246] : memref<4x28x28xf32, #tpu.memory_space<vmem>>, vector<1x25x28xf32>
    %256 = vector.shape_cast %255 : vector<1x25x28xf32> to vector<25x28xf32>
    %c3_247 = arith.constant 3 : index
    %c0_248 = arith.constant 0 : index
    %c0_249 = arith.constant 0 : index
    %257 = vector.load %arg2[%c3_247, %c0_248, %c0_249] : memref<4x28x150xf32, #tpu.memory_space<vmem>>, vector<1x28x150xf32>
    %258 = vector.shape_cast %257 : vector<1x28x150xf32> to vector<28x150xf32>
    %cst_250 = arith.constant dense<0.000000e+00> : vector<25x150xf32>
    %259 = tpu.matmul %256, %258, %cst_250 {dimension_numbers = #tpu.dot_dimension_numbers<[1], [0], [0], [1], [0, 0, 1, 1], [], []>} : vector<25x28xf32>, vector<28x150xf32>, vector<25x150xf32> -> vector<25x150xf32>
    %260 = arith.addf %254, %259 : vector<25x150xf32>
    %c0_251 = arith.constant 0 : index
    %c0_252 = arith.constant 0 : index
    %261 = vector.load %arg3[%c0_251, %c0_252] : memref<1x150xf32, #tpu.memory_space<vmem>>, vector<1x150xf32>
    %262 = vector.broadcast %261 : vector<1x150xf32> to vector<25x150xf32>
    %263 = arith.addf %260, %262 : vector<25x150xf32>
    %cst_253 = arith.constant 0.000000e+00 : f32
    %264 = vector.broadcast %cst_253 : f32 to vector<25x150xf32>
    %265 = arith.maximumf %263, %264 : vector<25x150xf32>
    %c0_254 = arith.constant 0 : index
    %c0_255 = arith.constant 0 : index
    %c0_256 = arith.constant 0 : index
    %266 = vector.load %arg4[%c0_254, %c0_255, %c0_256] : memref<3x150x72xf32, #tpu.memory_space<vmem>>, vector<1x150x72xf32>
    %267 = vector.shape_cast %266 : vector<1x150x72xf32> to vector<150x72xf32>
    %cst_257 = arith.constant dense<0.000000e+00> : vector<25x72xf32>
    %268 = tpu.matmul %265, %267, %cst_257 {dimension_numbers = #tpu.dot_dimension_numbers<[1], [0], [0], [1], [0, 0, 1, 1], [], []>} : vector<25x150xf32>, vector<150x72xf32>, vector<25x72xf32> -> vector<25x72xf32>
    %c1_258 = arith.constant 1 : index
    %c0_259 = arith.constant 0 : index
    %c0_260 = arith.constant 0 : index
    %269 = vector.load %arg4[%c1_258, %c0_259, %c0_260] : memref<3x150x72xf32, #tpu.memory_space<vmem>>, vector<1x150x72xf32>
    %270 = vector.shape_cast %269 : vector<1x150x72xf32> to vector<150x72xf32>
    %cst_261 = arith.constant dense<0.000000e+00> : vector<25x72xf32>
    %271 = tpu.matmul %265, %270, %cst_261 {dimension_numbers = #tpu.dot_dimension_numbers<[1], [0], [0], [1], [0, 0, 1, 1], [], []>} : vector<25x150xf32>, vector<150x72xf32>, vector<25x72xf32> -> vector<25x72xf32>
    %272 = arith.maximumf %268, %271 : vector<25x72xf32>
    %c2_262 = arith.constant 2 : index
    %c0_263 = arith.constant 0 : index
    %c0_264 = arith.constant 0 : index
    %273 = vector.load %arg4[%c2_262, %c0_263, %c0_264] : memref<3x150x72xf32, #tpu.memory_space<vmem>>, vector<1x150x72xf32>
    %274 = vector.shape_cast %273 : vector<1x150x72xf32> to vector<150x72xf32>
    %cst_265 = arith.constant dense<0.000000e+00> : vector<25x72xf32>
    %275 = tpu.matmul %265, %274, %cst_265 {dimension_numbers = #tpu.dot_dimension_numbers<[1], [0], [0], [1], [0, 0, 1, 1], [], []>} : vector<25x150xf32>, vector<150x72xf32>, vector<25x72xf32> -> vector<25x72xf32>
    %276 = arith.maximumf %272, %275 : vector<25x72xf32>
    %c0_266 = arith.constant 0 : index
    %c0_267 = arith.constant 0 : index
    %c0_268 = arith.constant 0 : index
    %277 = vector.load %arg5[%c0_266, %c0_267, %c0_268] : memref<3x12x25xf32, #tpu.memory_space<vmem>>, vector<1x12x25xf32>
    %278 = vector.shape_cast %277 : vector<1x12x25xf32> to vector<12x25xf32>
    %cst_269 = arith.constant dense<0.000000e+00> : vector<12x72xf32>
    %279 = tpu.matmul %278, %276, %cst_269 {dimension_numbers = #tpu.dot_dimension_numbers<[1], [0], [0], [1], [0, 0, 1, 1], [], []>} : vector<12x25xf32>, vector<25x72xf32>, vector<12x72xf32> -> vector<12x72xf32>
    %c1_270 = arith.constant 1 : index
    %c0_271 = arith.constant 0 : index
    %c0_272 = arith.constant 0 : index
    %280 = vector.load %arg5[%c1_270, %c0_271, %c0_272] : memref<3x12x25xf32, #tpu.memory_space<vmem>>, vector<1x12x25xf32>
    %281 = vector.shape_cast %280 : vector<1x12x25xf32> to vector<12x25xf32>
    %cst_273 = arith.constant dense<0.000000e+00> : vector<12x72xf32>
    %282 = tpu.matmul %281, %276, %cst_273 {dimension_numbers = #tpu.dot_dimension_numbers<[1], [0], [0], [1], [0, 0, 1, 1], [], []>} : vector<12x25xf32>, vector<25x72xf32>, vector<12x72xf32> -> vector<12x72xf32>
    %283 = arith.maximumf %279, %282 : vector<12x72xf32>
    %c2_274 = arith.constant 2 : index
    %c0_275 = arith.constant 0 : index
    %c0_276 = arith.constant 0 : index
    %284 = vector.load %arg5[%c2_274, %c0_275, %c0_276] : memref<3x12x25xf32, #tpu.memory_space<vmem>>, vector<1x12x25xf32>
    %285 = vector.shape_cast %284 : vector<1x12x25xf32> to vector<12x25xf32>
    %cst_277 = arith.constant dense<0.000000e+00> : vector<12x72xf32>
    %286 = tpu.matmul %285, %276, %cst_277 {dimension_numbers = #tpu.dot_dimension_numbers<[1], [0], [0], [1], [0, 0, 1, 1], [], []>} : vector<12x25xf32>, vector<25x72xf32>, vector<12x72xf32> -> vector<12x72xf32>
    %287 = arith.maximumf %283, %286 : vector<12x72xf32>
    %c0_278 = arith.constant 0 : index
    %c0_279 = arith.constant 0 : index
    %288 = vector.load %arg6[%c0_278, %c0_279] : memref<1x72xf32, #tpu.memory_space<vmem>>, vector<1x72xf32>
    %289 = vector.broadcast %288 : vector<1x72xf32> to vector<12x72xf32>
    %290 = arith.mulf %287, %289 : vector<12x72xf32>
    %c0_280 = arith.constant 0 : index
    %c0_281 = arith.constant 0 : index
    %291 = vector.load %arg7[%c0_280, %c0_281] : memref<1x72xf32, #tpu.memory_space<vmem>>, vector<1x72xf32>
    %292 = vector.broadcast %291 : vector<1x72xf32> to vector<12x72xf32>
    %293 = arith.addf %290, %292 : vector<12x72xf32>
    %294 = vector.extract_strided_slice %293 {offsets = [0, 0], sizes = [9, 72], strides = [1, 1]} : vector<12x72xf32> to vector<9x72xf32>
    %c0_282 = arith.constant 0 : index
    %c0_283 = arith.constant 0 : index
    %c0_284 = arith.constant 0 : index
    %295 = vector.load %arg8[%c0_282, %c0_283, %c0_284] : memref<4x72x153xf32, #tpu.memory_space<vmem>>, vector<1x72x153xf32>
    %296 = vector.shape_cast %295 : vector<1x72x153xf32> to vector<72x153xf32>
    %cst_285 = arith.constant dense<0.000000e+00> : vector<9x153xf32>
    %297 = tpu.matmul %294, %296, %cst_285 {dimension_numbers = #tpu.dot_dimension_numbers<[1], [0], [0], [1], [0, 0, 1, 1], [], []>} : vector<9x72xf32>, vector<72x153xf32>, vector<9x153xf32> -> vector<9x153xf32>
    %298 = vector.extract_strided_slice %293 {offsets = [1, 0], sizes = [9, 72], strides = [1, 1]} : vector<12x72xf32> to vector<9x72xf32>
    %c1_286 = arith.constant 1 : index
    %c0_287 = arith.constant 0 : index
    %c0_288 = arith.constant 0 : index
    %299 = vector.load %arg8[%c1_286, %c0_287, %c0_288] : memref<4x72x153xf32, #tpu.memory_space<vmem>>, vector<1x72x153xf32>
    %300 = vector.shape_cast %299 : vector<1x72x153xf32> to vector<72x153xf32>
    %cst_289 = arith.constant dense<0.000000e+00> : vector<9x153xf32>
    %301 = tpu.matmul %298, %300, %cst_289 {dimension_numbers = #tpu.dot_dimension_numbers<[1], [0], [0], [1], [0, 0, 1, 1], [], []>} : vector<9x72xf32>, vector<72x153xf32>, vector<9x153xf32> -> vector<9x153xf32>
    %302 = arith.addf %297, %301 : vector<9x153xf32>
    %303 = vector.extract_strided_slice %293 {offsets = [2, 0], sizes = [9, 72], strides = [1, 1]} : vector<12x72xf32> to vector<9x72xf32>
    %c2_290 = arith.constant 2 : index
    %c0_291 = arith.constant 0 : index
    %c0_292 = arith.constant 0 : index
    %304 = vector.load %arg8[%c2_290, %c0_291, %c0_292] : memref<4x72x153xf32, #tpu.memory_space<vmem>>, vector<1x72x153xf32>
    %305 = vector.shape_cast %304 : vector<1x72x153xf32> to vector<72x153xf32>
    %cst_293 = arith.constant dense<0.000000e+00> : vector<9x153xf32>
    %306 = tpu.matmul %303, %305, %cst_293 {dimension_numbers = #tpu.dot_dimension_numbers<[1], [0], [0], [1], [0, 0, 1, 1], [], []>} : vector<9x72xf32>, vector<72x153xf32>, vector<9x153xf32> -> vector<9x153xf32>
    %307 = arith.addf %302, %306 : vector<9x153xf32>
    %308 = vector.extract_strided_slice %293 {offsets = [3, 0], sizes = [9, 72], strides = [1, 1]} : vector<12x72xf32> to vector<9x72xf32>
    %c3_294 = arith.constant 3 : index
    %c0_295 = arith.constant 0 : index
    %c0_296 = arith.constant 0 : index
    %309 = vector.load %arg8[%c3_294, %c0_295, %c0_296] : memref<4x72x153xf32, #tpu.memory_space<vmem>>, vector<1x72x153xf32>
    %310 = vector.shape_cast %309 : vector<1x72x153xf32> to vector<72x153xf32>
    %cst_297 = arith.constant dense<0.000000e+00> : vector<9x153xf32>
    %311 = tpu.matmul %308, %310, %cst_297 {dimension_numbers = #tpu.dot_dimension_numbers<[1], [0], [0], [1], [0, 0, 1, 1], [], []>} : vector<9x72xf32>, vector<72x153xf32>, vector<9x153xf32> -> vector<9x153xf32>
    %312 = arith.addf %307, %311 : vector<9x153xf32>
    %c0_298 = arith.constant 0 : index
    %c0_299 = arith.constant 0 : index
    %313 = vector.load %arg9[%c0_298, %c0_299] : memref<1x153xf32, #tpu.memory_space<vmem>>, vector<1x153xf32>
    %314 = vector.broadcast %313 : vector<1x153xf32> to vector<9x153xf32>
    %315 = arith.addf %312, %314 : vector<9x153xf32>
    %cst_300 = arith.constant 0.000000e+00 : f32
    %316 = vector.broadcast %cst_300 : f32 to vector<9x153xf32>
    %317 = arith.maximumf %315, %316 : vector<9x153xf32>
    %c0_301 = arith.constant 0 : index
    %c0_302 = arith.constant 0 : index
    %c0_303 = arith.constant 0 : index
    %318 = vector.load %arg10[%c0_301, %c0_302, %c0_303] : memref<2x153x68xf32, #tpu.memory_space<vmem>>, vector<1x153x68xf32>
    %319 = vector.shape_cast %318 : vector<1x153x68xf32> to vector<153x68xf32>
    %cst_304 = arith.constant dense<0.000000e+00> : vector<9x68xf32>
    %320 = tpu.matmul %317, %319, %cst_304 {dimension_numbers = #tpu.dot_dimension_numbers<[1], [0], [0], [1], [0, 0, 1, 1], [], []>} : vector<9x153xf32>, vector<153x68xf32>, vector<9x68xf32> -> vector<9x68xf32>
    %c1_305 = arith.constant 1 : index
    %c0_306 = arith.constant 0 : index
    %c0_307 = arith.constant 0 : index
    %321 = vector.load %arg10[%c1_305, %c0_306, %c0_307] : memref<2x153x68xf32, #tpu.memory_space<vmem>>, vector<1x153x68xf32>
    %322 = vector.shape_cast %321 : vector<1x153x68xf32> to vector<153x68xf32>
    %cst_308 = arith.constant dense<0.000000e+00> : vector<9x68xf32>
    %323 = tpu.matmul %317, %322, %cst_308 {dimension_numbers = #tpu.dot_dimension_numbers<[1], [0], [0], [1], [0, 0, 1, 1], [], []>} : vector<9x153xf32>, vector<153x68xf32>, vector<9x68xf32> -> vector<9x68xf32>
    %324 = arith.maximumf %320, %323 : vector<9x68xf32>
    %c0_309 = arith.constant 0 : index
    %c0_310 = arith.constant 0 : index
    %c0_311 = arith.constant 0 : index
    %325 = vector.load %arg11[%c0_309, %c0_310, %c0_311] : memref<2x4x9xf32, #tpu.memory_space<vmem>>, vector<1x4x9xf32>
    %326 = vector.shape_cast %325 : vector<1x4x9xf32> to vector<4x9xf32>
    %cst_312 = arith.constant dense<0.000000e+00> : vector<4x68xf32>
    %327 = tpu.matmul %326, %324, %cst_312 {dimension_numbers = #tpu.dot_dimension_numbers<[1], [0], [0], [1], [0, 0, 1, 1], [], []>} : vector<4x9xf32>, vector<9x68xf32>, vector<4x68xf32> -> vector<4x68xf32>
    %c1_313 = arith.constant 1 : index
    %c0_314 = arith.constant 0 : index
    %c0_315 = arith.constant 0 : index
    %328 = vector.load %arg11[%c1_313, %c0_314, %c0_315] : memref<2x4x9xf32, #tpu.memory_space<vmem>>, vector<1x4x9xf32>
    %329 = vector.shape_cast %328 : vector<1x4x9xf32> to vector<4x9xf32>
    %cst_316 = arith.constant dense<0.000000e+00> : vector<4x68xf32>
    %330 = tpu.matmul %329, %324, %cst_316 {dimension_numbers = #tpu.dot_dimension_numbers<[1], [0], [0], [1], [0, 0, 1, 1], [], []>} : vector<4x9xf32>, vector<9x68xf32>, vector<4x68xf32> -> vector<4x68xf32>
    %331 = arith.maximumf %327, %330 : vector<4x68xf32>
    %c0_317 = arith.constant 0 : index
    %c0_318 = arith.constant 0 : index
    %332 = vector.load %arg12[%c0_317, %c0_318] : memref<1x68xf32, #tpu.memory_space<vmem>>, vector<1x68xf32>
    %333 = vector.broadcast %332 : vector<1x68xf32> to vector<4x68xf32>
    %334 = arith.mulf %331, %333 : vector<4x68xf32>
    %c0_319 = arith.constant 0 : index
    %c0_320 = arith.constant 0 : index
    %335 = vector.load %arg13[%c0_319, %c0_320] : memref<1x68xf32, #tpu.memory_space<vmem>>, vector<1x68xf32>
    %336 = vector.broadcast %335 : vector<1x68xf32> to vector<4x68xf32>
    %337 = arith.addf %334, %336 : vector<4x68xf32>
    %338 = vector.extract_strided_slice %337 {offsets = [0, 0], sizes = [1, 68], strides = [1, 1]} : vector<4x68xf32> to vector<1x68xf32>
    %c0_321 = arith.constant 0 : index
    %c0_322 = arith.constant 0 : index
    %c0_323 = arith.constant 0 : index
    %339 = vector.load %arg14[%c0_321, %c0_322, %c0_323] : memref<4x68x84xf32, #tpu.memory_space<vmem>>, vector<1x68x84xf32>
    %340 = vector.shape_cast %339 : vector<1x68x84xf32> to vector<68x84xf32>
    %cst_324 = arith.constant dense<0.000000e+00> : vector<1x84xf32>
    %341 = tpu.matmul %338, %340, %cst_324 {dimension_numbers = #tpu.dot_dimension_numbers<[1], [0], [0], [1], [0, 0, 1, 1], [], []>} : vector<1x68xf32>, vector<68x84xf32>, vector<1x84xf32> -> vector<1x84xf32>
    %342 = vector.extract_strided_slice %337 {offsets = [1, 0], sizes = [1, 68], strides = [1, 1]} : vector<4x68xf32> to vector<1x68xf32>
    %c1_325 = arith.constant 1 : index
    %c0_326 = arith.constant 0 : index
    %c0_327 = arith.constant 0 : index
    %343 = vector.load %arg14[%c1_325, %c0_326, %c0_327] : memref<4x68x84xf32, #tpu.memory_space<vmem>>, vector<1x68x84xf32>
    %344 = vector.shape_cast %343 : vector<1x68x84xf32> to vector<68x84xf32>
    %cst_328 = arith.constant dense<0.000000e+00> : vector<1x84xf32>
    %345 = tpu.matmul %342, %344, %cst_328 {dimension_numbers = #tpu.dot_dimension_numbers<[1], [0], [0], [1], [0, 0, 1, 1], [], []>} : vector<1x68xf32>, vector<68x84xf32>, vector<1x84xf32> -> vector<1x84xf32>
    %346 = arith.addf %341, %345 : vector<1x84xf32>
    %347 = vector.extract_strided_slice %337 {offsets = [2, 0], sizes = [1, 68], strides = [1, 1]} : vector<4x68xf32> to vector<1x68xf32>
    %c2_329 = arith.constant 2 : index
    %c0_330 = arith.constant 0 : index
    %c0_331 = arith.constant 0 : index
    %348 = vector.load %arg14[%c2_329, %c0_330, %c0_331] : memref<4x68x84xf32, #tpu.memory_space<vmem>>, vector<1x68x84xf32>
    %349 = vector.shape_cast %348 : vector<1x68x84xf32> to vector<68x84xf32>
    %cst_332 = arith.constant dense<0.000000e+00> : vector<1x84xf32>
    %350 = tpu.matmul %347, %349, %cst_332 {dimension_numbers = #tpu.dot_dimension_numbers<[1], [0], [0], [1], [0, 0, 1, 1], [], []>} : vector<1x68xf32>, vector<68x84xf32>, vector<1x84xf32> -> vector<1x84xf32>
    %351 = arith.addf %346, %350 : vector<1x84xf32>
    %352 = vector.extract_strided_slice %337 {offsets = [3, 0], sizes = [1, 68], strides = [1, 1]} : vector<4x68xf32> to vector<1x68xf32>
    %c3_333 = arith.constant 3 : index
    %c0_334 = arith.constant 0 : index
    %c0_335 = arith.constant 0 : index
    %353 = vector.load %arg14[%c3_333, %c0_334, %c0_335] : memref<4x68x84xf32, #tpu.memory_space<vmem>>, vector<1x68x84xf32>
    %354 = vector.shape_cast %353 : vector<1x68x84xf32> to vector<68x84xf32>
    %cst_336 = arith.constant dense<0.000000e+00> : vector<1x84xf32>
    %355 = tpu.matmul %352, %354, %cst_336 {dimension_numbers = #tpu.dot_dimension_numbers<[1], [0], [0], [1], [0, 0, 1, 1], [], []>} : vector<1x68xf32>, vector<68x84xf32>, vector<1x84xf32> -> vector<1x84xf32>
    %356 = arith.addf %351, %355 : vector<1x84xf32>
    %c3_337 = arith.constant 3 : index
    %c0_338 = arith.constant 0 : index
    %c0_339 = arith.constant 0 : index
    %357 = vector.load %arg1[%c3_337, %c0_338, %c0_339] : memref<4x28x28xf32, #tpu.memory_space<vmem>>, vector<1x25x28xf32>
    %358 = vector.shape_cast %357 : vector<1x25x28xf32> to vector<25x28xf32>
    %c0_340 = arith.constant 0 : index
    %c0_341 = arith.constant 0 : index
    %c0_342 = arith.constant 0 : index
    %359 = vector.load %arg2[%c0_340, %c0_341, %c0_342] : memref<4x28x150xf32, #tpu.memory_space<vmem>>, vector<1x28x150xf32>
    %360 = vector.shape_cast %359 : vector<1x28x150xf32> to vector<28x150xf32>
    %cst_343 = arith.constant dense<0.000000e+00> : vector<25x150xf32>
    %361 = tpu.matmul %358, %360, %cst_343 {dimension_numbers = #tpu.dot_dimension_numbers<[1], [0], [0], [1], [0, 0, 1, 1], [], []>} : vector<25x28xf32>, vector<28x150xf32>, vector<25x150xf32> -> vector<25x150xf32>
    %c3_344 = arith.constant 3 : index
    %c1_345 = arith.constant 1 : index
    %c0_346 = arith.constant 0 : index
    %362 = vector.load %arg1[%c3_344, %c1_345, %c0_346] : memref<4x28x28xf32, #tpu.memory_space<vmem>>, vector<1x25x28xf32>
    %363 = vector.shape_cast %362 : vector<1x25x28xf32> to vector<25x28xf32>
    %c1_347 = arith.constant 1 : index
    %c0_348 = arith.constant 0 : index
    %c0_349 = arith.constant 0 : index
    %364 = vector.load %arg2[%c1_347, %c0_348, %c0_349] : memref<4x28x150xf32, #tpu.memory_space<vmem>>, vector<1x28x150xf32>
    %365 = vector.shape_cast %364 : vector<1x28x150xf32> to vector<28x150xf32>
    %cst_350 = arith.constant dense<0.000000e+00> : vector<25x150xf32>
    %366 = tpu.matmul %363, %365, %cst_350 {dimension_numbers = #tpu.dot_dimension_numbers<[1], [0], [0], [1], [0, 0, 1, 1], [], []>} : vector<25x28xf32>, vector<28x150xf32>, vector<25x150xf32> -> vector<25x150xf32>
    %367 = arith.addf %361, %366 : vector<25x150xf32>
    %c3_351 = arith.constant 3 : index
    %c2_352 = arith.constant 2 : index
    %c0_353 = arith.constant 0 : index
    %368 = vector.load %arg1[%c3_351, %c2_352, %c0_353] : memref<4x28x28xf32, #tpu.memory_space<vmem>>, vector<1x25x28xf32>
    %369 = vector.shape_cast %368 : vector<1x25x28xf32> to vector<25x28xf32>
    %c2_354 = arith.constant 2 : index
    %c0_355 = arith.constant 0 : index
    %c0_356 = arith.constant 0 : index
    %370 = vector.load %arg2[%c2_354, %c0_355, %c0_356] : memref<4x28x150xf32, #tpu.memory_space<vmem>>, vector<1x28x150xf32>
    %371 = vector.shape_cast %370 : vector<1x28x150xf32> to vector<28x150xf32>
    %cst_357 = arith.constant dense<0.000000e+00> : vector<25x150xf32>
    %372 = tpu.matmul %369, %371, %cst_357 {dimension_numbers = #tpu.dot_dimension_numbers<[1], [0], [0], [1], [0, 0, 1, 1], [], []>} : vector<25x28xf32>, vector<28x150xf32>, vector<25x150xf32> -> vector<25x150xf32>
    %373 = arith.addf %367, %372 : vector<25x150xf32>
    %c3_358 = arith.constant 3 : index
    %c3_359 = arith.constant 3 : index
    %c0_360 = arith.constant 0 : index
    %374 = vector.load %arg1[%c3_358, %c3_359, %c0_360] : memref<4x28x28xf32, #tpu.memory_space<vmem>>, vector<1x25x28xf32>
    %375 = vector.shape_cast %374 : vector<1x25x28xf32> to vector<25x28xf32>
    %c3_361 = arith.constant 3 : index
    %c0_362 = arith.constant 0 : index
    %c0_363 = arith.constant 0 : index
    %376 = vector.load %arg2[%c3_361, %c0_362, %c0_363] : memref<4x28x150xf32, #tpu.memory_space<vmem>>, vector<1x28x150xf32>
    %377 = vector.shape_cast %376 : vector<1x28x150xf32> to vector<28x150xf32>
    %cst_364 = arith.constant dense<0.000000e+00> : vector<25x150xf32>
    %378 = tpu.matmul %375, %377, %cst_364 {dimension_numbers = #tpu.dot_dimension_numbers<[1], [0], [0], [1], [0, 0, 1, 1], [], []>} : vector<25x28xf32>, vector<28x150xf32>, vector<25x150xf32> -> vector<25x150xf32>
    %379 = arith.addf %373, %378 : vector<25x150xf32>
    %c0_365 = arith.constant 0 : index
    %c0_366 = arith.constant 0 : index
    %380 = vector.load %arg3[%c0_365, %c0_366] : memref<1x150xf32, #tpu.memory_space<vmem>>, vector<1x150xf32>
    %381 = vector.broadcast %380 : vector<1x150xf32> to vector<25x150xf32>
    %382 = arith.addf %379, %381 : vector<25x150xf32>
    %cst_367 = arith.constant 0.000000e+00 : f32
    %383 = vector.broadcast %cst_367 : f32 to vector<25x150xf32>
    %384 = arith.maximumf %382, %383 : vector<25x150xf32>
    %c0_368 = arith.constant 0 : index
    %c0_369 = arith.constant 0 : index
    %c0_370 = arith.constant 0 : index
    %385 = vector.load %arg4[%c0_368, %c0_369, %c0_370] : memref<3x150x72xf32, #tpu.memory_space<vmem>>, vector<1x150x72xf32>
    %386 = vector.shape_cast %385 : vector<1x150x72xf32> to vector<150x72xf32>
    %cst_371 = arith.constant dense<0.000000e+00> : vector<25x72xf32>
    %387 = tpu.matmul %384, %386, %cst_371 {dimension_numbers = #tpu.dot_dimension_numbers<[1], [0], [0], [1], [0, 0, 1, 1], [], []>} : vector<25x150xf32>, vector<150x72xf32>, vector<25x72xf32> -> vector<25x72xf32>
    %c1_372 = arith.constant 1 : index
    %c0_373 = arith.constant 0 : index
    %c0_374 = arith.constant 0 : index
    %388 = vector.load %arg4[%c1_372, %c0_373, %c0_374] : memref<3x150x72xf32, #tpu.memory_space<vmem>>, vector<1x150x72xf32>
    %389 = vector.shape_cast %388 : vector<1x150x72xf32> to vector<150x72xf32>
    %cst_375 = arith.constant dense<0.000000e+00> : vector<25x72xf32>
    %390 = tpu.matmul %384, %389, %cst_375 {dimension_numbers = #tpu.dot_dimension_numbers<[1], [0], [0], [1], [0, 0, 1, 1], [], []>} : vector<25x150xf32>, vector<150x72xf32>, vector<25x72xf32> -> vector<25x72xf32>
    %391 = arith.maximumf %387, %390 : vector<25x72xf32>
    %c2_376 = arith.constant 2 : index
    %c0_377 = arith.constant 0 : index
    %c0_378 = arith.constant 0 : index
    %392 = vector.load %arg4[%c2_376, %c0_377, %c0_378] : memref<3x150x72xf32, #tpu.memory_space<vmem>>, vector<1x150x72xf32>
    %393 = vector.shape_cast %392 : vector<1x150x72xf32> to vector<150x72xf32>
    %cst_379 = arith.constant dense<0.000000e+00> : vector<25x72xf32>
    %394 = tpu.matmul %384, %393, %cst_379 {dimension_numbers = #tpu.dot_dimension_numbers<[1], [0], [0], [1], [0, 0, 1, 1], [], []>} : vector<25x150xf32>, vector<150x72xf32>, vector<25x72xf32> -> vector<25x72xf32>
    %395 = arith.maximumf %391, %394 : vector<25x72xf32>
    %c0_380 = arith.constant 0 : index
    %c0_381 = arith.constant 0 : index
    %c0_382 = arith.constant 0 : index
    %396 = vector.load %arg5[%c0_380, %c0_381, %c0_382] : memref<3x12x25xf32, #tpu.memory_space<vmem>>, vector<1x12x25xf32>
    %397 = vector.shape_cast %396 : vector<1x12x25xf32> to vector<12x25xf32>
    %cst_383 = arith.constant dense<0.000000e+00> : vector<12x72xf32>
    %398 = tpu.matmul %397, %395, %cst_383 {dimension_numbers = #tpu.dot_dimension_numbers<[1], [0], [0], [1], [0, 0, 1, 1], [], []>} : vector<12x25xf32>, vector<25x72xf32>, vector<12x72xf32> -> vector<12x72xf32>
    %c1_384 = arith.constant 1 : index
    %c0_385 = arith.constant 0 : index
    %c0_386 = arith.constant 0 : index
    %399 = vector.load %arg5[%c1_384, %c0_385, %c0_386] : memref<3x12x25xf32, #tpu.memory_space<vmem>>, vector<1x12x25xf32>
    %400 = vector.shape_cast %399 : vector<1x12x25xf32> to vector<12x25xf32>
    %cst_387 = arith.constant dense<0.000000e+00> : vector<12x72xf32>
    %401 = tpu.matmul %400, %395, %cst_387 {dimension_numbers = #tpu.dot_dimension_numbers<[1], [0], [0], [1], [0, 0, 1, 1], [], []>} : vector<12x25xf32>, vector<25x72xf32>, vector<12x72xf32> -> vector<12x72xf32>
    %402 = arith.maximumf %398, %401 : vector<12x72xf32>
    %c2_388 = arith.constant 2 : index
    %c0_389 = arith.constant 0 : index
    %c0_390 = arith.constant 0 : index
    %403 = vector.load %arg5[%c2_388, %c0_389, %c0_390] : memref<3x12x25xf32, #tpu.memory_space<vmem>>, vector<1x12x25xf32>
    %404 = vector.shape_cast %403 : vector<1x12x25xf32> to vector<12x25xf32>
    %cst_391 = arith.constant dense<0.000000e+00> : vector<12x72xf32>
    %405 = tpu.matmul %404, %395, %cst_391 {dimension_numbers = #tpu.dot_dimension_numbers<[1], [0], [0], [1], [0, 0, 1, 1], [], []>} : vector<12x25xf32>, vector<25x72xf32>, vector<12x72xf32> -> vector<12x72xf32>
    %406 = arith.maximumf %402, %405 : vector<12x72xf32>
    %c0_392 = arith.constant 0 : index
    %c0_393 = arith.constant 0 : index
    %407 = vector.load %arg6[%c0_392, %c0_393] : memref<1x72xf32, #tpu.memory_space<vmem>>, vector<1x72xf32>
    %408 = vector.broadcast %407 : vector<1x72xf32> to vector<12x72xf32>
    %409 = arith.mulf %406, %408 : vector<12x72xf32>
    %c0_394 = arith.constant 0 : index
    %c0_395 = arith.constant 0 : index
    %410 = vector.load %arg7[%c0_394, %c0_395] : memref<1x72xf32, #tpu.memory_space<vmem>>, vector<1x72xf32>
    %411 = vector.broadcast %410 : vector<1x72xf32> to vector<12x72xf32>
    %412 = arith.addf %409, %411 : vector<12x72xf32>
    %413 = vector.extract_strided_slice %412 {offsets = [0, 0], sizes = [9, 72], strides = [1, 1]} : vector<12x72xf32> to vector<9x72xf32>
    %c0_396 = arith.constant 0 : index
    %c0_397 = arith.constant 0 : index
    %c0_398 = arith.constant 0 : index
    %414 = vector.load %arg8[%c0_396, %c0_397, %c0_398] : memref<4x72x153xf32, #tpu.memory_space<vmem>>, vector<1x72x153xf32>
    %415 = vector.shape_cast %414 : vector<1x72x153xf32> to vector<72x153xf32>
    %cst_399 = arith.constant dense<0.000000e+00> : vector<9x153xf32>
    %416 = tpu.matmul %413, %415, %cst_399 {dimension_numbers = #tpu.dot_dimension_numbers<[1], [0], [0], [1], [0, 0, 1, 1], [], []>} : vector<9x72xf32>, vector<72x153xf32>, vector<9x153xf32> -> vector<9x153xf32>
    %417 = vector.extract_strided_slice %412 {offsets = [1, 0], sizes = [9, 72], strides = [1, 1]} : vector<12x72xf32> to vector<9x72xf32>
    %c1_400 = arith.constant 1 : index
    %c0_401 = arith.constant 0 : index
    %c0_402 = arith.constant 0 : index
    %418 = vector.load %arg8[%c1_400, %c0_401, %c0_402] : memref<4x72x153xf32, #tpu.memory_space<vmem>>, vector<1x72x153xf32>
    %419 = vector.shape_cast %418 : vector<1x72x153xf32> to vector<72x153xf32>
    %cst_403 = arith.constant dense<0.000000e+00> : vector<9x153xf32>
    %420 = tpu.matmul %417, %419, %cst_403 {dimension_numbers = #tpu.dot_dimension_numbers<[1], [0], [0], [1], [0, 0, 1, 1], [], []>} : vector<9x72xf32>, vector<72x153xf32>, vector<9x153xf32> -> vector<9x153xf32>
    %421 = arith.addf %416, %420 : vector<9x153xf32>
    %422 = vector.extract_strided_slice %412 {offsets = [2, 0], sizes = [9, 72], strides = [1, 1]} : vector<12x72xf32> to vector<9x72xf32>
    %c2_404 = arith.constant 2 : index
    %c0_405 = arith.constant 0 : index
    %c0_406 = arith.constant 0 : index
    %423 = vector.load %arg8[%c2_404, %c0_405, %c0_406] : memref<4x72x153xf32, #tpu.memory_space<vmem>>, vector<1x72x153xf32>
    %424 = vector.shape_cast %423 : vector<1x72x153xf32> to vector<72x153xf32>
    %cst_407 = arith.constant dense<0.000000e+00> : vector<9x153xf32>
    %425 = tpu.matmul %422, %424, %cst_407 {dimension_numbers = #tpu.dot_dimension_numbers<[1], [0], [0], [1], [0, 0, 1, 1], [], []>} : vector<9x72xf32>, vector<72x153xf32>, vector<9x153xf32> -> vector<9x153xf32>
    %426 = arith.addf %421, %425 : vector<9x153xf32>
    %427 = vector.extract_strided_slice %412 {offsets = [3, 0], sizes = [9, 72], strides = [1, 1]} : vector<12x72xf32> to vector<9x72xf32>
    %c3_408 = arith.constant 3 : index
    %c0_409 = arith.constant 0 : index
    %c0_410 = arith.constant 0 : index
    %428 = vector.load %arg8[%c3_408, %c0_409, %c0_410] : memref<4x72x153xf32, #tpu.memory_space<vmem>>, vector<1x72x153xf32>
    %429 = vector.shape_cast %428 : vector<1x72x153xf32> to vector<72x153xf32>
    %cst_411 = arith.constant dense<0.000000e+00> : vector<9x153xf32>
    %430 = tpu.matmul %427, %429, %cst_411 {dimension_numbers = #tpu.dot_dimension_numbers<[1], [0], [0], [1], [0, 0, 1, 1], [], []>} : vector<9x72xf32>, vector<72x153xf32>, vector<9x153xf32> -> vector<9x153xf32>
    %431 = arith.addf %426, %430 : vector<9x153xf32>
    %c0_412 = arith.constant 0 : index
    %c0_413 = arith.constant 0 : index
    %432 = vector.load %arg9[%c0_412, %c0_413] : memref<1x153xf32, #tpu.memory_space<vmem>>, vector<1x153xf32>
    %433 = vector.broadcast %432 : vector<1x153xf32> to vector<9x153xf32>
    %434 = arith.addf %431, %433 : vector<9x153xf32>
    %cst_414 = arith.constant 0.000000e+00 : f32
    %435 = vector.broadcast %cst_414 : f32 to vector<9x153xf32>
    %436 = arith.maximumf %434, %435 : vector<9x153xf32>
    %c0_415 = arith.constant 0 : index
    %c0_416 = arith.constant 0 : index
    %c0_417 = arith.constant 0 : index
    %437 = vector.load %arg10[%c0_415, %c0_416, %c0_417] : memref<2x153x68xf32, #tpu.memory_space<vmem>>, vector<1x153x68xf32>
    %438 = vector.shape_cast %437 : vector<1x153x68xf32> to vector<153x68xf32>
    %cst_418 = arith.constant dense<0.000000e+00> : vector<9x68xf32>
    %439 = tpu.matmul %436, %438, %cst_418 {dimension_numbers = #tpu.dot_dimension_numbers<[1], [0], [0], [1], [0, 0, 1, 1], [], []>} : vector<9x153xf32>, vector<153x68xf32>, vector<9x68xf32> -> vector<9x68xf32>
    %c1_419 = arith.constant 1 : index
    %c0_420 = arith.constant 0 : index
    %c0_421 = arith.constant 0 : index
    %440 = vector.load %arg10[%c1_419, %c0_420, %c0_421] : memref<2x153x68xf32, #tpu.memory_space<vmem>>, vector<1x153x68xf32>
    %441 = vector.shape_cast %440 : vector<1x153x68xf32> to vector<153x68xf32>
    %cst_422 = arith.constant dense<0.000000e+00> : vector<9x68xf32>
    %442 = tpu.matmul %436, %441, %cst_422 {dimension_numbers = #tpu.dot_dimension_numbers<[1], [0], [0], [1], [0, 0, 1, 1], [], []>} : vector<9x153xf32>, vector<153x68xf32>, vector<9x68xf32> -> vector<9x68xf32>
    %443 = arith.maximumf %439, %442 : vector<9x68xf32>
    %c0_423 = arith.constant 0 : index
    %c0_424 = arith.constant 0 : index
    %c0_425 = arith.constant 0 : index
    %444 = vector.load %arg11[%c0_423, %c0_424, %c0_425] : memref<2x4x9xf32, #tpu.memory_space<vmem>>, vector<1x4x9xf32>
    %445 = vector.shape_cast %444 : vector<1x4x9xf32> to vector<4x9xf32>
    %cst_426 = arith.constant dense<0.000000e+00> : vector<4x68xf32>
    %446 = tpu.matmul %445, %443, %cst_426 {dimension_numbers = #tpu.dot_dimension_numbers<[1], [0], [0], [1], [0, 0, 1, 1], [], []>} : vector<4x9xf32>, vector<9x68xf32>, vector<4x68xf32> -> vector<4x68xf32>
    %c1_427 = arith.constant 1 : index
    %c0_428 = arith.constant 0 : index
    %c0_429 = arith.constant 0 : index
    %447 = vector.load %arg11[%c1_427, %c0_428, %c0_429] : memref<2x4x9xf32, #tpu.memory_space<vmem>>, vector<1x4x9xf32>
    %448 = vector.shape_cast %447 : vector<1x4x9xf32> to vector<4x9xf32>
    %cst_430 = arith.constant dense<0.000000e+00> : vector<4x68xf32>
    %449 = tpu.matmul %448, %443, %cst_430 {dimension_numbers = #tpu.dot_dimension_numbers<[1], [0], [0], [1], [0, 0, 1, 1], [], []>} : vector<4x9xf32>, vector<9x68xf32>, vector<4x68xf32> -> vector<4x68xf32>
    %450 = arith.maximumf %446, %449 : vector<4x68xf32>
    %c0_431 = arith.constant 0 : index
    %c0_432 = arith.constant 0 : index
    %451 = vector.load %arg12[%c0_431, %c0_432] : memref<1x68xf32, #tpu.memory_space<vmem>>, vector<1x68xf32>
    %452 = vector.broadcast %451 : vector<1x68xf32> to vector<4x68xf32>
    %453 = arith.mulf %450, %452 : vector<4x68xf32>
    %c0_433 = arith.constant 0 : index
    %c0_434 = arith.constant 0 : index
    %454 = vector.load %arg13[%c0_433, %c0_434] : memref<1x68xf32, #tpu.memory_space<vmem>>, vector<1x68xf32>
    %455 = vector.broadcast %454 : vector<1x68xf32> to vector<4x68xf32>
    %456 = arith.addf %453, %455 : vector<4x68xf32>
    %457 = vector.extract_strided_slice %456 {offsets = [0, 0], sizes = [1, 68], strides = [1, 1]} : vector<4x68xf32> to vector<1x68xf32>
    %c0_435 = arith.constant 0 : index
    %c0_436 = arith.constant 0 : index
    %c0_437 = arith.constant 0 : index
    %458 = vector.load %arg14[%c0_435, %c0_436, %c0_437] : memref<4x68x84xf32, #tpu.memory_space<vmem>>, vector<1x68x84xf32>
    %459 = vector.shape_cast %458 : vector<1x68x84xf32> to vector<68x84xf32>
    %cst_438 = arith.constant dense<0.000000e+00> : vector<1x84xf32>
    %460 = tpu.matmul %457, %459, %cst_438 {dimension_numbers = #tpu.dot_dimension_numbers<[1], [0], [0], [1], [0, 0, 1, 1], [], []>} : vector<1x68xf32>, vector<68x84xf32>, vector<1x84xf32> -> vector<1x84xf32>
    %461 = vector.extract_strided_slice %456 {offsets = [1, 0], sizes = [1, 68], strides = [1, 1]} : vector<4x68xf32> to vector<1x68xf32>
    %c1_439 = arith.constant 1 : index
    %c0_440 = arith.constant 0 : index
    %c0_441 = arith.constant 0 : index
    %462 = vector.load %arg14[%c1_439, %c0_440, %c0_441] : memref<4x68x84xf32, #tpu.memory_space<vmem>>, vector<1x68x84xf32>
    %463 = vector.shape_cast %462 : vector<1x68x84xf32> to vector<68x84xf32>
    %cst_442 = arith.constant dense<0.000000e+00> : vector<1x84xf32>
    %464 = tpu.matmul %461, %463, %cst_442 {dimension_numbers = #tpu.dot_dimension_numbers<[1], [0], [0], [1], [0, 0, 1, 1], [], []>} : vector<1x68xf32>, vector<68x84xf32>, vector<1x84xf32> -> vector<1x84xf32>
    %465 = arith.addf %460, %464 : vector<1x84xf32>
    %466 = vector.extract_strided_slice %456 {offsets = [2, 0], sizes = [1, 68], strides = [1, 1]} : vector<4x68xf32> to vector<1x68xf32>
    %c2_443 = arith.constant 2 : index
    %c0_444 = arith.constant 0 : index
    %c0_445 = arith.constant 0 : index
    %467 = vector.load %arg14[%c2_443, %c0_444, %c0_445] : memref<4x68x84xf32, #tpu.memory_space<vmem>>, vector<1x68x84xf32>
    %468 = vector.shape_cast %467 : vector<1x68x84xf32> to vector<68x84xf32>
    %cst_446 = arith.constant dense<0.000000e+00> : vector<1x84xf32>
    %469 = tpu.matmul %466, %468, %cst_446 {dimension_numbers = #tpu.dot_dimension_numbers<[1], [0], [0], [1], [0, 0, 1, 1], [], []>} : vector<1x68xf32>, vector<68x84xf32>, vector<1x84xf32> -> vector<1x84xf32>
    %470 = arith.addf %465, %469 : vector<1x84xf32>
    %471 = vector.extract_strided_slice %456 {offsets = [3, 0], sizes = [1, 68], strides = [1, 1]} : vector<4x68xf32> to vector<1x68xf32>
    %c3_447 = arith.constant 3 : index
    %c0_448 = arith.constant 0 : index
    %c0_449 = arith.constant 0 : index
    %472 = vector.load %arg14[%c3_447, %c0_448, %c0_449] : memref<4x68x84xf32, #tpu.memory_space<vmem>>, vector<1x68x84xf32>
    %473 = vector.shape_cast %472 : vector<1x68x84xf32> to vector<68x84xf32>
    %cst_450 = arith.constant dense<0.000000e+00> : vector<1x84xf32>
    %474 = tpu.matmul %471, %473, %cst_450 {dimension_numbers = #tpu.dot_dimension_numbers<[1], [0], [0], [1], [0, 0, 1, 1], [], []>} : vector<1x68xf32>, vector<68x84xf32>, vector<1x84xf32> -> vector<1x84xf32>
    %475 = arith.addf %470, %474 : vector<1x84xf32>
    %476 = tpu.concatenate %118, %237, %356, %475 in 0 : vector<1x84xf32>, vector<1x84xf32>, vector<1x84xf32>, vector<1x84xf32> -> vector<4x84xf32>
    %c0_451 = arith.constant 0 : index
    %c0_452 = arith.constant 0 : index
    %477 = vector.load %arg15[%c0_451, %c0_452] : memref<1x84xf32, #tpu.memory_space<vmem>>, vector<1x84xf32>
    %478 = vector.broadcast %477 : vector<1x84xf32> to vector<4x84xf32>
    %479 = arith.addf %476, %478 : vector<4x84xf32>
    %cst_453 = arith.constant 0.000000e+00 : f32
    %480 = vector.broadcast %cst_453 : f32 to vector<4x84xf32>
    %481 = arith.maximumf %479, %480 : vector<4x84xf32>
    %c0_454 = arith.constant 0 : index
    %c0_455 = arith.constant 0 : index
    %482 = vector.load %arg16[%c0_454, %c0_455] : memref<84x84xf32, #tpu.memory_space<vmem>>, vector<84x84xf32>
    %cst_456 = arith.constant dense<0.000000e+00> : vector<4x84xf32>
    %483 = tpu.matmul %481, %482, %cst_456 {dimension_numbers = #tpu.dot_dimension_numbers<[1], [0], [0], [1], [0, 0, 1, 1], [], []>} : vector<4x84xf32>, vector<84x84xf32>, vector<4x84xf32> -> vector<4x84xf32>
    %c0_457 = arith.constant 0 : index
    %c0_458 = arith.constant 0 : index
    %484 = vector.load %arg17[%c0_457, %c0_458] : memref<1x84xf32, #tpu.memory_space<vmem>>, vector<1x84xf32>
    %485 = vector.broadcast %484 : vector<1x84xf32> to vector<4x84xf32>
    %486 = arith.addf %483, %485 : vector<4x84xf32>
    %cst_459 = arith.constant 0.000000e+00 : f32
    %487 = vector.broadcast %cst_459 : f32 to vector<4x84xf32>
    %488 = arith.maximumf %486, %487 : vector<4x84xf32>
    %c0_460 = arith.constant 0 : index
    %c0_461 = arith.constant 0 : index
    %489 = vector.load %arg18[%c0_460, %c0_461] : memref<84x10xf32, #tpu.memory_space<vmem>>, vector<84x10xf32>
    %cst_462 = arith.constant dense<0.000000e+00> : vector<4x10xf32>
    %490 = tpu.matmul %488, %489, %cst_462 {dimension_numbers = #tpu.dot_dimension_numbers<[1], [0], [0], [1], [0, 0, 1, 1], [], []>} : vector<4x84xf32>, vector<84x10xf32>, vector<4x10xf32> -> vector<4x10xf32>
    %c0_463 = arith.constant 0 : index
    %c0_464 = arith.constant 0 : index
    %491 = vector.load %arg19[%c0_463, %c0_464] : memref<1x10xf32, #tpu.memory_space<vmem>>, vector<1x10xf32>
    %492 = vector.broadcast %491 : vector<1x10xf32> to vector<4x10xf32>
    %493 = arith.addf %490, %492 : vector<4x10xf32>
    %c0_465 = arith.constant 0 : index
    %c0_466 = arith.constant 0 : index
    %c0_467 = arith.constant 0 : index
    %494 = vector.load %arg20[%c0_465, %c0_466, %c0_467] : memref<1x4x10xf32, #tpu.memory_space<vmem>>, vector<1x4x10xf32>
    %495 = vector.shape_cast %494 : vector<1x4x10xf32> to vector<4x10xf32>
    %496 = vector.shape_cast %493 : vector<4x10xf32> to vector<1x4x10xf32>
    tpu.vector_store %arg20[%c0_465, %c0_466, %c0_467], %496 {strides = array<i32>} : memref<1x4x10xf32, #tpu.memory_space<vmem>>, vector<1x4x10xf32>,
    return
  }
  func.func @transform_0(%arg0: i32) -> (i32, i32, i32) {
    %c0_i32 = arith.constant 0 : i32
    %c0_i32_0 = arith.constant 0 : i32
    %c0_i32_1 = arith.constant 0 : i32
    return %arg0, %c0_i32, %c0_i32_0 : i32, i32, i32
  }
  func.func @transform_1(%arg0: i32) -> (i32, i32, i32) {
    %c0_i32 = arith.constant 0 : i32
    %c0_i32_0 = arith.constant 0 : i32
    %c0_i32_1 = arith.constant 0 : i32
    %c0_i32_2 = arith.constant 0 : i32
    return %c0_i32, %c0_i32_0, %c0_i32_1 : i32, i32, i32
  }
  func.func @transform_2(%arg0: i32) -> (i32, i32) {
    %c0_i32 = arith.constant 0 : i32
    %c0_i32_0 = arith.constant 0 : i32
    %c0_i32_1 = arith.constant 0 : i32
    return %c0_i32, %c0_i32_0 : i32, i32
  }
  func.func @transform_3(%arg0: i32) -> (i32, i32, i32) {
    %c0_i32 = arith.constant 0 : i32
    %c0_i32_0 = arith.constant 0 : i32
    %c0_i32_1 = arith.constant 0 : i32
    %c0_i32_2 = arith.constant 0 : i32
    return %c0_i32, %c0_i32_0, %c0_i32_1 : i32, i32, i32
  }
  func.func @transform_4(%arg0: i32) -> (i32, i32, i32) {
    %c0_i32 = arith.constant 0 : i32
    %c0_i32_0 = arith.constant 0 : i32
    %c0_i32_1 = arith.constant 0 : i32
    %c0_i32_2 = arith.constant 0 : i32
    return %c0_i32, %c0_i32_0, %c0_i32_1 : i32, i32, i32
  }
  func.func @transform_5(%arg0: i32) -> (i32, i32) {
    %c0_i32 = arith.constant 0 : i32
    %c0_i32_0 = arith.constant 0 : i32
    %c0_i32_1 = arith.constant 0 : i32
    return %c0_i32, %c0_i32_0 : i32, i32
  }
  func.func @transform_6(%arg0: i32) -> (i32, i32) {
    %c0_i32 = arith.constant 0 : i32
    %c0_i32_0 = arith.constant 0 : i32
    %c0_i32_1 = arith.constant 0 : i32
    return %c0_i32, %c0_i32_0 : i32, i32
  }
  func.func @transform_7(%arg0: i32) -> (i32, i32, i32) {
    %c0_i32 = arith.constant 0 : i32
    %c0_i32_0 = arith.constant 0 : i32
    %c0_i32_1 = arith.constant 0 : i32
    %c0_i32_2 = arith.constant 0 : i32
    return %c0_i32, %c0_i32_0, %c0_i32_1 : i32, i32, i32
  }
  func.func @transform_8(%arg0: i32) -> (i32, i32) {
    %c0_i32 = arith.constant 0 : i32
    %c0_i32_0 = arith.constant 0 : i32
    %c0_i32_1 = arith.constant 0 : i32
    return %c0_i32, %c0_i32_0 : i32, i32
  }
  func.func @transform_9(%arg0: i32) -> (i32, i32, i32) {
    %c0_i32 = arith.constant 0 : i32
    %c0_i32_0 = arith.constant 0 : i32
    %c0_i32_1 = arith.constant 0 : i32
    %c0_i32_2 = arith.constant 0 : i32
    return %c0_i32, %c0_i32_0, %c0_i32_1 : i32, i32, i32
  }
  func.func @transform_10(%arg0: i32) -> (i32, i32, i32) {
    %c0_i32 = arith.constant 0 : i32
    %c0_i32_0 = arith.constant 0 : i32
    %c0_i32_1 = arith.constant 0 : i32
    %c0_i32_2 = arith.constant 0 : i32
    return %c0_i32, %c0_i32_0, %c0_i32_1 : i32, i32, i32
  }
  func.func @transform_11(%arg0: i32) -> (i32, i32) {
    %c0_i32 = arith.constant 0 : i32
    %c0_i32_0 = arith.constant 0 : i32
    %c0_i32_1 = arith.constant 0 : i32
    return %c0_i32, %c0_i32_0 : i32, i32
  }
  func.func @transform_12(%arg0: i32) -> (i32, i32) {
    %c0_i32 = arith.constant 0 : i32
    %c0_i32_0 = arith.constant 0 : i32
    %c0_i32_1 = arith.constant 0 : i32
    return %c0_i32, %c0_i32_0 : i32, i32
  }
  func.func @transform_13(%arg0: i32) -> (i32, i32, i32) {
    %c0_i32 = arith.constant 0 : i32
    %c0_i32_0 = arith.constant 0 : i32
    %c0_i32_1 = arith.constant 0 : i32
    %c0_i32_2 = arith.constant 0 : i32
    return %c0_i32, %c0_i32_0, %c0_i32_1 : i32, i32, i32
  }
  func.func @transform_14(%arg0: i32) -> (i32, i32) {
    %c0_i32 = arith.constant 0 : i32
    %c0_i32_0 = arith.constant 0 : i32
    %c0_i32_1 = arith.constant 0 : i32
    return %c0_i32, %c0_i32_0 : i32, i32
  }
  func.func @transform_15(%arg0: i32) -> (i32, i32) {
    %c0_i32 = arith.constant 0 : i32
    %c0_i32_0 = arith.constant 0 : i32
    %c0_i32_1 = arith.constant 0 : i32
    return %c0_i32, %c0_i32_0 : i32, i32
  }
  func.func @transform_16(%arg0: i32) -> (i32, i32) {
    %c0_i32 = arith.constant 0 : i32
    %c0_i32_0 = arith.constant 0 : i32
    %c0_i32_1 = arith.constant 0 : i32
    return %c0_i32, %c0_i32_0 : i32, i32
  }
  func.func @transform_17(%arg0: i32) -> (i32, i32) {
    %c0_i32 = arith.constant 0 : i32
    %c0_i32_0 = arith.constant 0 : i32
    %c0_i32_1 = arith.constant 0 : i32
    return %c0_i32, %c0_i32_0 : i32, i32
  }
  func.func @transform_18(%arg0: i32) -> (i32, i32) {
    %c0_i32 = arith.constant 0 : i32
    %c0_i32_0 = arith.constant 0 : i32
    %c0_i32_1 = arith.constant 0 : i32
    return %c0_i32, %c0_i32_0 : i32, i32
  }
  func.func @transform_19(%arg0: i32) -> (i32, i32, i32) {
    %c0_i32 = arith.constant 0 : i32
    %c0_i32_0 = arith.constant 0 : i32
    %c0_i32_1 = arith.constant 0 : i32
    return %arg0, %c0_i32, %c0_i32_0 : i32, i32, i32
  }
}

</mosaic_0001>

<bundles_post_ra>
// kernel: lenet5_forward.1
= control target key start
LH: loop header
LB: loop body
LE: loop exit
PB: predicated region body
PF: predicated region fallthrough
CT: control target
= control target key end

     0   :  { %s14436_s0 = inlined_call_operand.vmem [shape: f32[4,28,28], index: 0, kind: input, shape index: {}]   ;;  %s14437_s1 = inlined_call_operand.vmem [shape: f32[4,28,150], index: 1, kind: input, shape index: {}]   ;;  %s14438_s2 = inlined_call_operand.vmem [shape: f32[1,150], index: 2, kind: input, shape index: {}]   ;;  %s14439_s3 = inlined_call_operand.vmem [shape: f32[3,150,72], index: 3, kind: input, shape index: {}]   ;;  %s14440_s4 = inlined_call_operand.vmem [shape: f32[3,12,25], index: 4, kind: input, shape index: {}]   ;;  %s14441_s5 = inlined_call_operand.vmem [shape: f32[1,72], index: 5, kind: input, shape index: {}]   ;;  %s14442_s6 = inlined_call_operand.vmem [shape: f32[1,72], index: 6, kind: input, shape index: {}]   ;;  %s14443_s7 = inlined_call_operand.vmem [shape: f32[4,72,153], index: 7, kind: input, shape index: {}]   ;;  %s14444_s8 = inlined_call_operand.vmem [shape: f32[1,153], index: 8, kind: input, shape index: {}]   ;;  %s14445_s9 = inlined_call_operand.vmem [shape: f32[2,153,68], index: 9, kind: input, shape index: {}]   ;;  %s14446_s10 = inlined_call_operand.vmem [shape: f32[2,4,9], index: 10, kind: input, shape index: {}]   ;;  %s14447_s11 = inlined_call_operand.vmem [shape: f32[1,68], index: 11, kind: input, shape index: {}]   ;;  %s14448_s12 = inlined_call_operand.vmem [shape: f32[1,68], index: 12, kind: input, shape index: {}]   ;;  %s14449_s13 = inlined_call_operand.vmem [shape: f32[4,68,84], index: 13, kind: input, shape index: {}]   ;;  %s14450_s14 = inlined_call_operand.vmem [shape: f32[1,84], index: 14, kind: input, shape index: {}]   ;;  %s14451_s15 = inlined_call_operand.vmem [shape: f32[84,84], index: 15, kind: input, shape index: {}]   ;;  %s14452_s16 = inlined_call_operand.vmem [shape: f32[1,84], index: 16, kind: input, shape index: {}]   ;;  %s14453_s17 = inlined_call_operand.vmem [shape: f32[84,10], index: 17, kind: input, shape index: {}]   ;;  %s14454_s18 = inlined_call_operand.vmem [shape: f32[1,10], index: 18, kind: input, shape index: {}]   ;;  %s14455_s19 = inlined_call_operand.hbm [shape: f32[1,4,10], index: 19, kind: output, shape index: {}]  }
   0x1   :  { %14686 = sst [smem:[#allocation114_spill]] %s14436_s0 }
   0x2   :  { %14687 = sst [smem:[#allocation115_spill]] %s14437_s1 }
   0x3   :  { %14688 = sst [smem:[#allocation116_spill]] %s14438_s2 }
   0x4   :  { %14689 = sst [smem:[#allocation117_spill]] %s14439_s3 }
   0x5   :  { %s14690_s20 = sld [smem:[#allocation115_spill]]  ;;  %vm101_vm0 = vcmask 1043456   ;;  %vm11327_vm1 = vmmov 1   ;;  %v14461_v12 = vmov 0.0   ;;  %v14463_v13 = vmov 0.0|0.0   ;;  %s14694_s21 = sld [smem:[#allocation114_spill]] }
   0x6   :  { %vm11458_vm2 = vmpackc.low %vm101_vm0, %vm11327_vm1  ;;  %172 = vmatprep.mubr.f32.mxu0 %v14461_v12  ;;  %9758 = vmatprep.subr.bf16.mxu1 %v14463_v13  ;;  %vm88_vm3 = vcmask 228352   ;;  %s14698_s22 = sld [smem:[#allocation117_spill]] }
   0xb   :  { %v8342_v0 = vld [vmem:[%s14690_s20 + $0x48] sm:$0xff]  ;;  %v8344_v1 = vld [vmem:[%s14690_s20 + $0x58] sm:$0xff]  ;;  %v8341_v2 = vld [vmem:[%s14690_s20 + $0x40] sm:$0xff] }
   0xc   :  { %v11441_v3 = vpack.c.bf16 %v8344_v1, %v8342_v0  ;;  %v8343_v4 = vld [vmem:[%s14690_s20 + $0x50] sm:$0xff]  ;;  %v8346_v5 = vld [vmem:[%s14690_s20 + $0x68] sm:$0xff]  ;;  %v8348_v6 = vld [vmem:[%s14690_s20 + $0x78] sm:$0xf] }
   0xd   :  { %v11452_v7 = vpack.c.bf16 %v8343_v4, %v8341_v2  ;;  %v11454_v8 = vpack.c.bf16 %v8348_v6, %v8346_v5  ;;  %v8345_v10 = vld [vmem:[%s14690_s20 + $0x60] sm:$0xff]  ;;  %v8347_v11 = vld [vmem:[%s14690_s20 + $0x70] sm:$0xf]  ;;  %v68_v15 = vld [vmem:[%s14690_s20 + $0x8] sm:$0xff] }
   0xe   :  { %9719 = vmatprep.subr.bf16.mxu0 %v11441_v3  ;;  %v11472_v14 = vpack.c.bf16 %v8347_v11, %v8345_v10  ;;  %v70_v16 = vld [vmem:[%s14690_s20 + $0x18] sm:$0xff]  ;;  %v67_v18 = vld [vmem:[%s14690_s20] sm:$0xff]  ;;  %v69_v19 = vld [vmem:[%s14690_s20 + $0x10] sm:$0xff] }
   0xf   :  { %9721 = vmatpush1.bf16.msra.mxu0 %v11452_v7  ;;  %v11483_v17 = vpack.c.bf16 %v70_v16, %v68_v15  ;;  %v72_v20 = vld [vmem:[%s14690_s20 + $0x28] sm:$0xff]  ;;  %v74_v21 = vld [vmem:[%s14690_s20 + $0x38] sm:$0xf]  ;;  %v11503_v23 = vpack.c.bf16 %v69_v19, %v67_v18  ;;  %v71_v25 = vld [vmem:[%s14690_s20 + $0x20] sm:$0xff] }
  0x10   :  { %9724 = vmatprep.subr.msk.bf16.mxu0 %vm11458_vm2, %v11454_v8  ;;  %v75_v22 = vld [vmem:[%s14694_s21 + $0x1] sm:$0xff]  ;;  %v11506_v24 = vpack.c.bf16 %v74_v21, %v72_v20  ;;  %v73_v26 = vld [vmem:[%s14690_s20 + $0x30] sm:$0xf]  ;;  %v8364_v28 = vld [vmem:[%s14690_s20 + $0x98] sm:$0xff] }
  0x11   :  { %14693 = vst [vmem:[#allocation5_spill] sm:$0xff] %v11483_v17  ;;  %14695 = vst [vmem:[#allocation6_spill] sm:$0xff] %v11503_v23  ;;  %v8362_v27 = vld [vmem:[%s14690_s20 + $0x88] sm:$0xff]  ;;  %v11526_v30 = vpack.c.bf16 %v73_v26, %v71_v25  ;;  %v77_v32 = vld [vmem:[%s14694_s21 + $0x11] sm:$0xff] }
  0x12   :  { %14696 = vst [vmem:[#allocation7_spill] sm:$0xff] %v11506_v24  ;;  %v76_v29 = vld [vmem:[%s14694_s21 + $0x9] sm:$0xff]  ;;  %v11531_v31 = vpack.c.bf16 %v8364_v28, %v8362_v27  ;;  %v588_v33 = vld [vmem:[%s14698_s22] sm:$0xff]  ;;  %v591_v37 = vld [vmem:[%s14698_s22 + $0x18] sm:$0xff] }
  0x13   :  { %9727 = vmatpush1.bf16.msk.msra.mxu0 %vm11458_vm2, %v11472_v14  ;;  %v589_v34 = vld [vmem:[%s14698_s22 + $0x8] sm:$0xff]  ;;  %v590_v36 = vld [vmem:[%s14698_s22 + $0x10] sm:$0xff]  ;;  %v78_v38 = vld [vmem:[%s14694_s21 + $0x19] sm:$0x1] }
  0x14   :  { %9729 = vmatprep.subr.bf16.mxu0 %v11483_v17  ;;  %14697 = vst [vmem:[#allocation8_spill] sm:$0xff] %v11531_v31  ;;  %v11548_v35 = vpack.c.bf16 %v589_v34, %v588_v33  ;;  %v11562_v39 = vpack.c.bf16 %v591_v37, %v590_v36  ;;  %v8361_v40 = vld [vmem:[%s14690_s20 + $0x80] sm:$0xff]  ;;  %v8363_v41 = vld [vmem:[%s14690_s20 + $0x90] sm:$0xff]  ;;  %v8366_v42 = vld [vmem:[%s14690_s20 + $0xa8] sm:$0xff] }
  0x15   :  { %v8368_v43 = vld [vmem:[%s14690_s20 + $0xb8] sm:$0xf]  ;;  %v592_v44 = vld [vmem:[%s14698_s22 + $0x20] sm:$0xff]  ;;  %v593_v45 = vld [vmem:[%s14698_s22 + $0x28] sm:$0xff]  ;;  %v11588_v47 = vpack.c.bf16 %v8363_v41, %v8361_v40 }
  0x16   :  { %8351 = vmatmul.mubr.msk.f32.vlgmr.msra.gmra.mrb[0].mxu0 %vm88_vm3, %v75_v22  ;;  %14699 = vst [vmem:[#allocation9_spill] sm:$0xff] %v11548_v35  ;;  %9760 = vmatpush1.bf16.msra.mxu1 %v11548_v35  ;;  %14700 = vst [vmem:[#allocation10_spill] sm:$0xff] %v11562_v39  ;;  %v63_v46 = vld [vmem:[%s14694_s21] sm:$0xff]  ;;  %v11591_v48 = vpack.c.bf16 %v8368_v43, %v8366_v42  ;;  %v8367_v50 = vld [vmem:[%s14690_s20 + $0xb0] sm:$0xf]  ;;  %v11603_v52 = vpack.c.bf16 %v593_v45, %v592_v44 }
  0x17   :  { %178 = vmatprep.mubr.f32.mxu0 %v14461_v12  ;;  %9731 = vmatpush1.bf16.msra.mxu0 %v11503_v23  ;;  %v8365_v49 = vld [vmem:[%s14690_s20 + $0xa0] sm:$0xff]  ;;  %v8376_v51 = vld [vmem:[%s14690_s20 + $0xc8] sm:$0xff]  ;;  %v8378_v53 = vld [vmem:[%s14690_s20 + $0xd8] sm:$0xff] }
  0x18   :  { %9734 = vmatprep.subr.msk.bf16.mxu0 %vm11458_vm2, %v11506_v24  ;;  %9761 = vmatprep.subr.bf16.mxu1 %v14463_v13  ;;  %14701 = vst [vmem:[#allocation11_spill] sm:$0xff] %v11603_v52  ;;  %v594_v54 = vld [vmem:[%s14698_s22 + $0x30] sm:$0xff]  ;;  %v595_v55 = vld [vmem:[%s14698_s22 + $0x38] sm:$0xff] }
  0x1a   :  { %8352 = vmatmul.mubr.msk.f32.gmra.mrb[2].mxu0 %vm88_vm3, %v76_v29  ;;  %9763 = vmatpush1.bf16.msra.mxu1 %v11562_v39 }
  0x1b   :  { %184 = vmatprep.mubr.f32.mxu0 %v14461_v12  ;;  %9737 = vmatpush1.bf16.msk.msra.mxu0 %vm11458_vm2, %v11526_v30 }
  0x1c   :  { %9739 = vmatprep.subr.bf16.mxu0 %v11531_v31  ;;  %9764 = vmatprep.subr.bf16.mxu1 %v14463_v13 }
  0x1e   :  { %8353 = vmatmul.mubr.msk.f32.gmra.mrb[4].mxu0 %vm88_vm3, %v77_v32 }
  0x1f   :  { %190 = vmatprep.mubr.f32.mxu0 %v14461_v12 }
  0x22   :  { %8354 = vmatmul.mubr.msk.f32.gmra.mrb[6].mxu0 %vm88_vm3, %v78_v38 }
  0x23   :  { %279 = vmatprep.mubr.f32.mxu0 %v14461_v12 }
  0x26   :  { %8357 = vmatmul.mubr.msk.f32.vlgmr.msra.gmra.mrb[0].mxu0 %vm88_vm3, %v63_v46 }
  0x27   :  { %24 = vsyncpa [#allocation3], 0  ;;  %285 = vmatprep.mubr.f32.mxu0 %v14461_v12  ;;  %v64_v56 = vld [vmem:[%s14694_s21 + $0x8] sm:$0xff]  ;;  %9741 = vmatpush1.bf16.msra.mxu0 %v11588_v47  ;;  %v11620_v57 = vpack.c.bf16 %v8367_v50, %v8365_v49  ;;  %v11625_v58 = vpack.c.bf16 %v8378_v53, %v8376_v51  ;;  %v11628_v59 = vpack.c.bf16 %v595_v55, %v594_v54  ;;  %v596_v60 = vld [vmem:[%s14698_s22 + $0x40] sm:$0xff]  ;;  %vm620_vm4 = vcmask 1045504   ;;  %s14720_s26 = sld [smem:[#allocation116_spill]] }
  0x28   :  { %9744 = vmatprep.subr.msk.bf16.mxu0 %vm11458_vm2, %v11591_v48  ;;  %9766 = vmatpush1.bf16.msra.mxu1 %v11603_v52  ;;  %v597_v61 = vld [vmem:[%s14698_s22 + $0x48] sm:$0xff]  ;;  %v65_v62 = vld [vmem:[%s14694_s21 + $0x10] sm:$0xff]  ;;  %v599_v1 = vld [vmem:[%s14698_s22 + $0x58] sm:$0xff]  ;;  %vm607_vm5 = vcmask 179200   ;;  %vm935_vm6 = vcmask 203776   ;;  %vm942_vm7 = vcmask 1040384  }
  0x29   :  { %14702 = vst [vmem:[#allocation12_spill] sm:$0xff] %v11625_v58  ;;  %14703 = vst [vmem:[#allocation13_spill] sm:$0xff] %v11628_v59  ;;  %9767 = vmatprep.subr.bf16.mxu1 %v14463_v13  ;;  %v11647_v63 = vpack.c.bf16 %v597_v61, %v596_v60  ;;  %v598_v0 = vld [vmem:[%s14698_s22 + $0x50] sm:$0xff]  ;;  %v66_v2 = vld [vmem:[%s14694_s21 + $0x18] sm:$0x1]  ;;  %vm1250_vm9 = vcmask 1046528  }
  0x2a   :  { %8358 = vmatmul.mubr.msk.f32.gmra.mrb[2].mxu0 %vm88_vm3, %v64_v56  ;;  %v8375_v4 = vld [vmem:[%s14690_s20 + $0xc0] sm:$0xff]  ;;  %v8377_v5 = vld [vmem:[%s14690_s20 + $0xd0] sm:$0xff]  ;;  %v8380_v6 = vld [vmem:[%s14690_s20 + $0xe8] sm:$0xff]  ;;  %v11671_v10 = vpack.c.bf16 %v599_v1, %v598_v0  ;;  %vm1543_vm10 = vcmask 1044480   ;;  %vm1254_vm11 = vcmask 588800   ;;  %vm11330_vm12 = vmmov 0  }
  0x2b   :  { %291 = vmatprep.mubr.f32.mxu0 %v14461_v12  ;;  %9747 = vmatpush1.bf16.msk.msra.mxu0 %vm11458_vm2, %v11620_v57  ;;  %14704 = vst [vmem:[#allocation14_spill] sm:$0xff] %v11647_v63  ;;  %v8382_v11 = vld [vmem:[%s14690_s20 + $0xf8] sm:$0xf]  ;;  %v600_v15 = vld [vmem:[%s14698_s22 + $0x60] sm:$0xff]  ;;  %v601_v16 = vld [vmem:[%s14698_s22 + $0x68] sm:$0xff]  ;;  %v11688_v19 = vpack.c.bf16 %v8377_v5, %v8375_v4  ;;  %vm1858_vm13 = vcmask 72704  }
  0x2c   :  { %9749 = vmatprep.subr.bf16.mxu0 %v11625_v58  ;;  %9769 = vmatpush1.bf16.msra.mxu1 %v11628_v59  ;;  %14705 = vst [vmem:[#allocation15_spill] sm:$0xff] %v11671_v10  ;;  %v304_v18 = vld [vmem:[%s14694_s21 + $0x2] sm:$0xff]  ;;  %v11690_v20 = vpack.c.bf16 %v8382_v11, %v8380_v6  ;;  %v8381_v22 = vld [vmem:[%s14690_s20 + $0xf0] sm:$0xf]  ;;  %v11699_v25 = vpack.c.bf16 %v601_v16, %v600_v15  ;;  %v603_v27 = vld [vmem:[%s14698_s22 + $0x78] sm:$0xff]  ;;  %vm2048_vm14 = vcmask 556032  }
  0x2d   :  { %9770 = vmatprep.subr.bf16.mxu1 %v14463_v13  ;;  %14706 = vst [vmem:[#allocation16_spill] sm:$0xff] %v11688_v19  ;;  %v8379_v21 = vld [vmem:[%s14690_s20 + $0xe0] sm:$0xff]  ;;  %v602_v26 = vld [vmem:[%s14698_s22 + $0x70] sm:$0xff]  ;;  %v307_v34 = vld [vmem:[%s14694_s21 + $0x1a] sm:$0x1]  ;;  %vm8122_vm15 = vcmask 1041408  }
  0x2e   :  { %8359 = vmatmul.mubr.msk.f32.gmra.mrb[4].mxu0 %vm88_vm3, %v65_v62  ;;  %14707 = vst [vmem:[#allocation17_spill] sm:$0xff] %v11690_v20  ;;  %14708 = vst [vmem:[#allocation18_spill] sm:$0xff] %v11699_v25  ;;  %v305_v28 = vld [vmem:[%s14694_s21 + $0xa] sm:$0xff]  ;;  %v11714_v29 = vpack.c.bf16 %v8381_v22, %v8379_v21  ;;  %v11720_v32 = vpack.c.bf16 %v603_v27, %v602_v26  ;;  %v306_v33 = vld [vmem:[%s14694_s21 + $0x12] sm:$0xff]  ;;  %s11331_s20 = smov [#allocation2]  }
  0x2f   :  { %297 = vmatprep.mubr.f32.mxu0 %v14461_v12  ;;  %v8418_v36 = vld [vmem:[%s14698_s22 + $0x130] sm:$0xff]  ;;  %v8419_v37 = vld [vmem:[%s14698_s22 + $0x138] sm:$0xff]  ;;  %v432_v38 = vld [vmem:[%s14694_s21 + $0x3] sm:$0xff]  ;;  %s8333_s1 = sshll.u32 %s11331_s20, 4  ;;  %s8334_s1 = int_to_ptr.vmem [resolvable:$true] %s8333_s1 }
  0x30   :  { %9772 = vmatpush1.bf16.msra.mxu1 %v11647_v63  ;;  %14709 = vst [vmem:[#allocation19_spill] sm:$0xff] %v11714_v29  ;;  %14710 = vst [vmem:[#allocation20_spill] sm:$0xff] %v11720_v32  ;;  %v11750_v40 = vpack.c.bf16 %v8419_v37, %v8418_v36  ;;  %v8420_v41 = vld [vmem:[%s14698_s22 + $0x140] sm:$0xff]  ;;  %v8421_v42 = vld [vmem:[%s14698_s22 + $0x148] sm:$0xff]  ;;  %p11308_p1 = scmp.lt.s32.totalorder %s8334_s1, %s8334_s1 }
  0x31   :  { %9773 = vmatprep.subr.bf16.mxu1 %v14463_v13  ;;  %v433_v43 = vld [vmem:[%s14694_s21 + $0xb] sm:$0xff]  ;;  %v11764_v44 = vpack.c.bf16 %v8421_v42, %v8420_v41  ;;  %v8423_v46 = vld [vmem:[%s14698_s22 + $0x158] sm:$0xff]  ;;  %v8424_v51 = vld [vmem:[%s14698_s22 + $0x160] sm:$0xff] }
  0x32   :  { %8360 = vmatmul.mubr.msk.f32.gmra.mrb[6].mxu0 %vm88_vm3, %v66_v2  ;;  %v8422_v45 = vld [vmem:[%s14698_s22 + $0x150] sm:$0xff]  ;;  %v8425_v53 = vld [vmem:[%s14698_s22 + $0x168] sm:$0xff]  ;;  %v435_v54 = vld [vmem:[%s14694_s21 + $0x1b] sm:$0x1] }
  0x33   :  { %399 = vmatprep.mubr.f32.mxu0 %v14461_v12  ;;  %14711 = vst [vmem:[#allocation21_spill] sm:$0xff] %v11764_v44  ;;  %v434_v49 = vld [vmem:[%s14694_s21 + $0x13] sm:$0xff]  ;;  %v11779_v50 = vpack.c.bf16 %v8423_v46, %v8422_v45  ;;  %v11794_v55 = vpack.c.bf16 %v8425_v53, %v8424_v51  ;;  %v8428_v62 = vld [vmem:[%s14698_s22 + $0x180] sm:$0xff]  ;;  %v8429_v0 = vld [vmem:[%s14698_s22 + $0x188] sm:$0xff] }
  0x34   :  { %9775 = vmatpush1.bf16.msra.mxu1 %v11671_v10  ;;  %v8426_v56 = vld [vmem:[%s14698_s22 + $0x170] sm:$0xff]  ;;  %v8427_v60 = vld [vmem:[%s14698_s22 + $0x178] sm:$0xff]  ;;  %v11815_v1 = vpack.c.bf16 %v8429_v0, %v8428_v62  ;;  %v8432_v6 = vld [vmem:[%s14698_s22 + $0x1a0] sm:$0xff] }
  0x35   :  { %9776 = vmatprep.subr.bf16.mxu1 %v14463_v13  ;;  %14712 = vst [vmem:[#allocation22_spill] sm:$0xff] %v11779_v50  ;;  %14713 = vst [vmem:[#allocation23_spill] sm:$0xff] %v11794_v55  ;;  %v11805_v61 = vpack.c.bf16 %v8427_v60, %v8426_v56  ;;  %v8430_v2 = vld [vmem:[%s14698_s22 + $0x190] sm:$0xff]  ;;  %v8431_v4 = vld [vmem:[%s14698_s22 + $0x198] sm:$0xff] }
  0x36   :  { %8371 = vmatmul.mubr.msk.f32.vlgmr.msra.gmra.mrb[0].mxu0 %vm88_vm3, %v304_v18  ;;  %14715 = vst [vmem:[#allocation25_spill] sm:$0xff] %v11815_v1  ;;  %v11825_v5 = vpack.c.bf16 %v8431_v4, %v8430_v2  ;;  %v8433_v11 = vld [vmem:[%s14698_s22 + $0x1a8] sm:$0xff]  ;;  %v604_v16 = vld [vmem:[%s14698_s22 + $0x80] sm:$0xff]  ;;  %v8434_v22 = vld [vmem:[%s14698_s22 + $0x1b0] sm:$0xff] }
  0x37   :  { %405 = vmatprep.mubr.f32.mxu0 %v14461_v12  ;;  %9751 = vmatpush1.bf16.msra.mxu0 %v11688_v19  ;;  %14714 = vst [vmem:[#allocation24_spill] sm:$0xff] %v11805_v61  ;;  %v11835_v15 = vpack.c.bf16 %v8433_v11, %v8432_v6  ;;  %v605_v18 = vld [vmem:[%s14698_s22 + $0x88] sm:$0xff]  ;;  %v8435_v26 = vld [vmem:[%s14698_s22 + $0x1b8] sm:$0xff]  ;;  %v8395_v53 = vld [vmem:[%s14698_s22 + $0xa0] sm:$0xff] }
  0x38   :  { %9754 = vmatprep.subr.msk.bf16.mxu0 %vm11458_vm2, %v11690_v20  ;;  %9778 = vmatpush1.bf16.msra.mxu1 %v11699_v25  ;;  %14716 = vst [vmem:[#allocation26_spill] sm:$0xff] %v11825_v5  ;;  %v11846_v21 = vpack.c.bf16 %v605_v18, %v604_v16  ;;  %v11854_v27 = vpack.c.bf16 %v8435_v26, %v8434_v22  ;;  %v8394_v51 = vld [vmem:[%s14698_s22 + $0x98] sm:$0xff]  ;;  %v8396_v6 = vld [vmem:[%s14698_s22 + $0xa8] sm:$0xff]  ;;  %v8397_v11 = vld [vmem:[%s14698_s22 + $0xb0] sm:$0xff] }
  0x39   :  { %9779 = vmatprep.subr.bf16.mxu1 %v14463_v13  ;;  %14717 = vst [vmem:[#allocation27_spill] sm:$0xff] %v11835_v15  ;;  %v11892_v62 = vpack.c.bf16 %v8395_v53, %v8394_v51  ;;  %v11911_v26 = vpack.c.bf16 %v8397_v11, %v8396_v6  ;;  %v8401_v6 = vld [vmem:[%s14698_s22 + $0xd0] sm:$0xff]  ;;  %vm12020_vm8 = vmpackc.low %vm942_vm7, %vm11327_vm1  ;;  %v14960_v9 = vld [vmem:[#allocation9_spill] sm:$0xff]  ;;  %vm8124_vm1 = vcmask 1042432  }
  0x3a   :  { %8372 = vmatmul.mubr.msk.f32.gmra.mrb[2].mxu0 %vm88_vm3, %v305_v28  ;;  %14718 = vst [vmem:[#allocation28_spill] sm:$0xff] %v11846_v21  ;;  %14719 = vst [vmem:[#allocation29_spill] sm:$0xff] %v11854_v27  ;;  %v606_v28 = vld [vmem:[%s14698_s22 + $0x90] sm:$0x3f] }
  0x3b   :  { %411 = vmatprep.mubr.f32.mxu0 %v14461_v12  ;;  %9757 = vmatpush1.bf16.msk.msra.mxu0 %vm11458_vm2, %v11714_v29  ;;  %14721 = vst [vmem:[#allocation30_spill] sm:$0xff] %v11892_v62  ;;  %14722 = vst [vmem:[#allocation31_spill] sm:$0xff] %v11911_v26 }
  0x3c   :  { %9812 = vmatprep.subr.bf16.mxu0 %v14463_v13  ;;  %9781 = vmatpush1.bf16.msra.mxu1 %v11720_v32 }
  0x3d   :  { %9782 = vmatprep.subr.bf16.mxu1 %v14463_v13 }
  0x3e   :  { %8373 = vmatmul.mubr.msk.f32.gmra.mrb[4].mxu0 %vm88_vm3, %v306_v33  ;;  %v8436_v33 = vld [vmem:[%s14698_s22 + $0x1c0] sm:$0x3f] }
  0x3f   :  { %417 = vmatprep.mubr.f32.mxu0 %v14461_v12 }
  0x40   :  { %9784 = vmatpush1.bf16.msra.mxu1 %v11846_v21 }
  0x41   :  { %660 = vmatprep.subr.mxu1 %v14461_v12 }
  0x42   :  { %8374 = vmatmul.mubr.msk.f32.gmra.mrb[6].mxu0 %vm88_vm3, %v307_v34  ;;  %v562_v34 = vlaneseq }
  0x43   :  { %527 = vmatprep.mubr.f32.mxu0 %v14461_v12 }
  0x44   :  { %8389 = vmatpush1.msk.msra.mxu1 %vm620_vm4, %v606_v28  ;;  %v11869_v36 = vshrl.u32 %v562_v34, 7 }
  0x45   :  { %9785 = vmatprep.subr.bf16.mxu1 %v14463_v13 }
  0x46   :  { %8385 = vmatmul.mubr.msk.f32.vlgmr.msra.gmra.mrb[0].mxu0 %vm88_vm3, %v432_v38  ;;  %v14460_v37 = vsub.s32 0, %v11869_v36  ;;  %v560_v38 = vld [vmem:[%s14720_s26] sm:$0x3]  ;;  %v14459_v41 = vsub.s32 1, %v11869_v36 }
  0x47   :  { %533 = vmatprep.mubr.f32.mxu0 %v14461_v12  ;;  %9814 = vmatpush1.bf16.msra.mxu0 %v11750_v40 }
  0x48   :  { %9815 = vmatprep.subr.bf16.mxu0 %v14463_v13  ;;  %v11878_v42 = vrot.slane %v560_v38, %v14460_v37 }
  0x4a   :  { %8386 = vmatmul.mubr.msk.f32.gmra.mrb[2].mxu0 %vm88_vm3, %v433_v43  ;;  %v11882_v43 = vrot.slane %v560_v38, %v14459_v41  ;;  %v8398_v38 = vld [vmem:[%s14698_s22 + $0xb8] sm:$0xff] }
  0x4b   :  { %539 = vmatprep.mubr.f32.mxu0 %v14461_v12  ;;  %9817 = vmatpush1.bf16.msra.mxu0 %v11764_v44 }
  0x4c   :  { %9818 = vmatprep.subr.bf16.mxu0 %v14463_v13 }
  0x4e   :  { %8387 = vmatmul.mubr.msk.f32.gmra.mrb[4].mxu0 %vm88_vm3, %v434_v49 }
  0x4f   :  { %545 = vmatprep.mubr.f32.mxu0 %v14461_v12  ;;  %9820 = vmatpush1.bf16.msra.mxu0 %v11779_v50 }
  0x50   :  { %9821 = vmatprep.subr.bf16.mxu0 %v14463_v13 }
  0x52   :  { %8388 = vmatmul.mubr.msk.f32.gmra.mrb[6].mxu0 %vm88_vm3, %v435_v54 }
  0x53   :  { %9823 = vmatpush1.bf16.msra.mxu0 %v11794_v55 }
  0x54   :  { %9824 = vmatprep.subr.bf16.mxu0 %v14463_v13 }
  0x57   :  { %9826 = vmatpush1.bf16.msra.mxu0 %v11805_v61 }
  0x58   :  { %9827 = vmatprep.subr.bf16.mxu0 %v14463_v13 }
  0x5b   :  { %9829 = vmatpush1.bf16.msra.mxu0 %v11815_v1 }
  0x5c   :  { %9830 = vmatprep.subr.bf16.mxu0 %v14463_v13 }
  0x5f   :  { %9832 = vmatpush1.bf16.msra.mxu0 %v11825_v5 }
  0x60   :  { %9833 = vmatprep.subr.bf16.mxu0 %v14463_v13 }
  0x63   :  { %9835 = vmatpush1.bf16.msra.mxu0 %v11835_v15 }
  0x64   :  { %9836 = vmatprep.subr.bf16.mxu0 %v14463_v13 }
  0x67   :  { %9838 = vmatpush1.bf16.msra.mxu0 %v11854_v27 }
  0x68   :  { %880 = vmatprep.subr.mxu0 %v14461_v12 }
  0x6b   :  { %8437 = vmatpush1.msk.msra.mxu0 %vm620_vm4, %v8436_v33 }
 0x119   :  { %v529_v45 = vpop.f32.mrb[0].mxu0 }
 0x11a   :  { %v572_v46 = vadd.f32 %v11878_v42, %v529_v45  ;;  %v531_v49 = vpop.f32.mrb[1].mxu0  ;;  %v8399_v45 = vld [vmem:[%s14698_s22 + $0xc0] sm:$0xff] }
 0x11b   :  { %v573_v54 = vadd.f32 %v11882_v43, %v531_v49  ;;  %v11931_v53 = vpack.c.bf16 %v8399_v45, %v8398_v38  ;;  %v8403_v38 = vld [vmem:[%s14698_s22 + $0xe0] sm:$0xff] }
 0x11c   :  { %v11894_v0 = vmax.f32 %v572_v46, 0.0 }
 0x11d   :  { %v581_v56 = vmax.f32 %v573_v54, 0.0  ;;  %v535_v60 = vpop.f32.mrb[2].mxu0  ;;  %14723 = vst [vmem:[#allocation32_spill] sm:$0xff] %v11931_v53 }
 0x11e   :  { %v574_v2 = vadd.f32 %v11878_v42, %v535_v60  ;;  %v537_v4 = vpop.f32.mrb[3].mxu0 }
 0x11f   :  { %v575_v16 = vadd.f32 %v11882_v43, %v537_v4  ;;  %8390 = vmatprep.mubr.msk.f32.mxu1 %vm607_vm5, %v581_v56  ;;  %8438 = vmatprep.mubr.msk.f32.mxu0 %vm607_vm5, %v581_v56  ;;  %v8400_v4 = vld [vmem:[%s14698_s22 + $0xc8] sm:$0xff] }
 0x120   :  { %689 = vmatmul.mubr.f32.vlgmr.msra.gmra.mrb[0].mxu1 %v11894_v0  ;;  %909 = vmatmul.mubr.f32.vlgmr.msra.gmra.mrb[8].mxu0 %v11894_v0  ;;  %v11913_v28 = vmax.f32 %v574_v2, 0.0 }
 0x121   :  { %v11908_v18 = vmax.f32 %v575_v16, 0.0  ;;  %9787 = vmatpush1.bf16.msra.mxu1 %v11892_v62  ;;  %v541_v22 = vpop.f32.mrb[4].mxu0 }
 0x122   :  { %v576_v33 = vadd.f32 %v11878_v42, %v541_v22  ;;  %v543_v34 = vpop.f32.mrb[5].mxu0  ;;  %9788 = vmatprep.subr.bf16.mxu1 %v14463_v13  ;;  %v11945_v22 = vpack.c.bf16 %v8401_v6, %v8400_v4  ;;  %v8408_v6 = vld [vmem:[%s14698_s22 + $0x108] sm:$0xff] }
 0x123   :  { %v577_v46 = vadd.f32 %v11882_v43, %v543_v34  ;;  %8391 = vmatprep.mubr.msk.f32.mxu1 %vm607_vm5, %v11908_v18  ;;  %8439 = vmatprep.mubr.msk.f32.mxu0 %vm607_vm5, %v11908_v18  ;;  %v8402_v34 = vld [vmem:[%s14698_s22 + $0xd8] sm:$0xff] }
 0x124   :  { %694 = vmatmul.mubr.f32.gmra.mrb[2].mxu1 %v11913_v28  ;;  %914 = vmatmul.mubr.f32.gmra.mrb[10].mxu0 %v11913_v28  ;;  %v584_v54 = vmax.f32 %v576_v33, 0.0  ;;  %14724 = vst [vmem:[#allocation33_spill] sm:$0xff] %v11945_v22  ;;  %v11958_v45 = vpack.c.bf16 %v8403_v38, %v8402_v34  ;;  %v8410_v38 = vld [vmem:[%s14698_s22 + $0x118] sm:$0xff] }
 0x125   :  { %v585_v49 = vmax.f32 %v577_v46, 0.0  ;;  %9790 = vmatpush1.bf16.msra.mxu1 %v11911_v26  ;;  %v547_v51 = vpop.f32.mrb[6].mxu0  ;;  %v8404_v46 = vld [vmem:[%s14698_s22 + $0xe8] sm:$0xff] }
 0x126   :  { %v578_v60 = vadd.f32 %v11878_v42, %v547_v51  ;;  %v549_v2 = vpop.f32.mrb[7].mxu0  ;;  %9791 = vmatprep.subr.bf16.mxu1 %v14463_v13  ;;  %14725 = vst [vmem:[#allocation34_spill] sm:$0xff] %v11958_v45  ;;  %v8405_v51 = vld [vmem:[%s14698_s22 + $0xf0] sm:$0xff] }
 0x127   :  { %v579_v11 = vadd.f32 %v11882_v43, %v549_v2  ;;  %8392 = vmatprep.mubr.msk.f32.mxu1 %vm607_vm5, %v585_v49  ;;  %8440 = vmatprep.mubr.msk.f32.mxu0 %vm607_vm5, %v585_v49  ;;  %v8407_v2 = vld [vmem:[%s14698_s22 + $0x100] sm:$0xff] }
 0x128   :  { %699 = vmatmul.mubr.f32.gmra.mrb[4].mxu1 %v584_v54  ;;  %919 = vmatmul.mubr.f32.gmra.mrb[12].mxu0 %v584_v54  ;;  %v586_v33 = vmax.f32 %v578_v60, 0.0  ;;  %v11969_v60 = vpack.c.bf16 %v8405_v51, %v8404_v46  ;;  %v8411_v46 = vld [vmem:[%s14698_s22 + $0x120] sm:$0xff] }
 0x129   :  { %v587_v16 = vmax.f32 %v579_v11, 0.0  ;;  %9793 = vmatpush1.bf16.msra.mxu1 %v11931_v53  ;;  %v8409_v11 = vld [vmem:[%s14698_s22 + $0x110] sm:$0xff]  ;;  %v11999_v51 = vpack.c.bf16 %v8411_v46, %v8410_v38 }
 0x12a   :  { %9794 = vmatprep.subr.bf16.mxu1 %v14463_v13  ;;  %14726 = vst [vmem:[#allocation35_spill] sm:$0xff] %v11969_v60  ;;  %v11989_v34 = vpack.c.bf16 %v8409_v11, %v8408_v6 }
 0x12b   :  { %8393 = vmatprep.mubr.msk.f32.mxu1 %vm607_vm5, %v587_v16  ;;  %8441 = vmatprep.mubr.msk.f32.mxu0 %vm607_vm5, %v587_v16  ;;  %14729 = vst [vmem:[#allocation38_spill] sm:$0xff] %v11999_v51 }
 0x12c   :  { %704 = vmatmul.mubr.f32.gmra.mrb[6].mxu1 %v586_v33  ;;  %924 = vmatmul.mubr.f32.gmra.mrb[14].mxu0 %v586_v33  ;;  %14728 = vst [vmem:[#allocation37_spill] sm:$0xff] %v11989_v34 }
 0x12d   :  { %9796 = vmatpush1.bf16.msra.mxu1 %v11945_v22  ;;  %8414 = vmatprep.mubr.msk.f32.mxu1 %vm607_vm5, %v581_v56  ;;  %v8406_v56 = vld [vmem:[%s14698_s22 + $0xf8] sm:$0xff] }
 0x12e   :  { %9797 = vmatprep.subr.bf16.mxu1 %v14463_v13  ;;  %1323 = vmatprep.mubr.f32.mxu0 %v14461_v12  ;;  %v11979_v4 = vpack.c.bf16 %v8407_v2, %v8406_v56  ;;  %v8412_v56 = vld [vmem:[%s14698_s22 + $0x128] sm:$0x3f]  ;;  %v933_v2 = vld [vmem:[%s14440_s4] sm:$0xff] }
 0x130   :  { %14727 = vst [vmem:[#allocation36_spill] sm:$0xff] %v11979_v4 }
 0x131   :  { %9799 = vmatpush1.bf16.msra.mxu1 %v11958_v45 }
 0x132   :  { %9800 = vmatprep.subr.bf16.mxu1 %v14463_v13 }
 0x135   :  { %9802 = vmatpush1.bf16.msra.mxu1 %v11969_v60 }
 0x136   :  { %9803 = vmatprep.subr.bf16.mxu1 %v14463_v13 }
 0x139   :  { %9805 = vmatpush1.bf16.msra.mxu1 %v11979_v4 }
 0x13a   :  { %9806 = vmatprep.subr.bf16.mxu1 %v14463_v13 }
 0x13d   :  { %9808 = vmatpush1.bf16.msra.mxu1 %v11989_v34 }
 0x13e   :  { %9809 = vmatprep.subr.bf16.mxu1 %v14463_v13 }
 0x141   :  { %9811 = vmatpush1.bf16.msra.mxu1 %v11999_v51 }
 0x142   :  { %768 = vmatprep.subr.mxu1 %v14461_v12 }
 0x145   :  { %8413 = vmatpush1.msk.msra.mxu1 %vm620_vm4, %v8412_v56 }
 0x146   :  { %797 = vmatmul.mubr.f32.vlgmr.msra.gmra.mrb[8].mxu1 %v11894_v0 }
 0x147   :  { %8415 = vmatprep.mubr.msk.f32.mxu1 %vm607_vm5, %v11908_v18 }
 0x14a   :  { %802 = vmatmul.mubr.f32.gmra.mrb[10].mxu1 %v11913_v28 }
 0x14b   :  { %8416 = vmatprep.mubr.msk.f32.mxu1 %vm607_vm5, %v585_v49 }
 0x14e   :  { %807 = vmatmul.mubr.f32.gmra.mrb[12].mxu1 %v584_v54 }
 0x14f   :  { %8417 = vmatprep.mubr.msk.f32.mxu1 %vm607_vm5, %v587_v16 }
 0x152   :  { %812 = vmatmul.mubr.f32.gmra.mrb[14].mxu1 %v586_v33 }
 0x153   :  { %9152 = vmatprep.mubr.msk.f32.mxu1 %vm935_vm6, %v933_v2 }
 0x1f3   :  { %v690_v6 = vpop.f32.mrb[0].mxu1  ;;  %v910_v0 = vpop.f32.mrb[8].mxu0 }
 0x1f4   :  { %v692_v11 = vpop.f32.mrb[1].mxu1  ;;  %v912_v38 = vpop.f32.mrb[9].mxu0 }
 0x1f7   :  { %v695_v18 = vpop.f32.mrb[2].mxu1  ;;  %v915_v46 = vpop.f32.mrb[10].mxu0 }
 0x1f8   :  { %v697_v28 = vpop.f32.mrb[3].mxu1  ;;  %v917_v56 = vpop.f32.mrb[11].mxu0 }
 0x1fb   :  { %v700_v49 = vpop.f32.mrb[4].mxu1  ;;  %v920_v54 = vpop.f32.mrb[12].mxu0 }
 0x1fc   :  { %v702_v41 = vpop.f32.mrb[5].mxu1  ;;  %v922_v16 = vpop.f32.mrb[13].mxu0 }
 0x1ff   :  { %v705_v33 = vpop.f32.mrb[6].mxu1  ;;  %v925_v37 = vpop.f32.mrb[14].mxu0 }
 0x200   :  { %v707_v12 = vpop.f32.mrb[7].mxu1  ;;  %v927_v13 = vpop.f32.mrb[15].mxu0 }
 0x219   :  { %v798_v27 = vpop.f32.mrb[8].mxu1 }
 0x21a   :  { %v817_v15 = vmax.f32 %v690_v6, %v798_v27  ;;  %v800_v5 = vpop.f32.mrb[9].mxu1  ;;  %v8451_v27 = vld [vmem:[%s14440_s4 + $0x28] sm:$0xf] }
 0x21b   :  { %v8460_v6 = vld [vmem:[%s14443_s7 + $0xa8] sm:$0xff] }
 0x21c   :  { %v929_v2 = vmax.f32 %v817_v15, %v910_v0  ;;  %v8450_v15 = vld [vmem:[%s14440_s4 + $0x20] sm:$0xff] }
 0x21d   :  { %v803_v1 = vpop.f32.mrb[10].mxu1 }
 0x21e   :  { %v818_v61 = vmax.f32 %v695_v18, %v803_v1  ;;  %v805_v11 = vpop.f32.mrb[11].mxu1  ;;  %v8457_v18 = vld [vmem:[%s14443_s7 + $0x90] sm:$0xff] }
 0x21f   :  { %v8461_v11 = vld [vmem:[%s14443_s7 + $0xb0] sm:$0xff] }
 0x220   :  { %v930_v38 = vmax.f32 %v818_v61, %v915_v46  ;;  %v8445_v61 = vld [vmem:[%s14440_s4 + $0x10] sm:$0xff]  ;;  %v8459_v46 = vld [vmem:[%s14443_s7 + $0xa0] sm:$0xff] }
 0x221   :  { %v808_v55 = vpop.f32.mrb[12].mxu1 }
 0x222   :  { %v9839_v50 = vpack.c.bf16 %v930_v38, %v929_v2  ;;  %v819_v28 = vmax.f32 %v700_v49, %v808_v55  ;;  %v810_v56 = vpop.f32.mrb[13].mxu1  ;;  %v934_v55 = vld [vmem:[%s14440_s4 + $0x8] sm:$0xf]  ;;  %v12071_v49 = vpack.c.bf16 %v8459_v46, %v8457_v18  ;;  %v8463_v38 = vld [vmem:[%s14443_s7 + $0xc0] sm:$0xff]  ;;  %v1214_v46 = vld [vmem:[%s14443_s7 + $0x18] sm:$0xff] }
 0x223   :  { %v8466_v56 = vld [vmem:[%s14443_s7 + $0xd8] sm:$0xff]  ;;  %v1212_v18 = vld [vmem:[%s14443_s7 + $0x8] sm:$0xff] }
 0x224   :  { %v931_v44 = vmax.f32 %v819_v28, %v920_v54  ;;  %9840 = vmatprep.subr.bf16.mxu1 %v9839_v50  ;;  %14734 = vst [vmem:[#allocation40_spill] sm:$0xff] %v12071_v49  ;;  %v8462_v54 = vld [vmem:[%s14443_s7 + $0xb8] sm:$0xff]  ;;  %v12089_v28 = vpack.c.bf16 %v8463_v38, %v8461_v11  ;;  %v1652_v11 = vld [vmem:[%s14445_s9] sm:$0xff]  ;;  %v1653_v38 = vld [vmem:[%s14445_s9 + $0x8] sm:$0xff] }
 0x225   :  { %v813_v41 = vpop.f32.mrb[14].mxu1  ;;  %9842 = vmatpush3.bf16.msra.mxu1 %v9839_v50 }
 0x226   :  { %v820_v16 = vmax.f32 %v705_v33, %v813_v41  ;;  %v815_v12 = vpop.f32.mrb[15].mxu1  ;;  %v8464_v33 = vld [vmem:[%s14443_s7 + $0xc8] sm:$0xff]  ;;  %14736 = vst [vmem:[#allocation42_spill] sm:$0xff] %v12089_v28 }
 0x227   :  { %v12081_v2 = vpack.c.bf16 %v8464_v33, %v8462_v54  ;;  %v8468_v41 = vld [vmem:[%s14443_s7 + $0xe8] sm:$0xff]  ;;  %v8465_v12 = vld [vmem:[%s14443_s7 + $0xd0] sm:$0xff]  ;;  %v12141_v33 = vpack.c.bf16 %v1214_v46, %v1212_v18  ;;  %v1660_v46 = vld [vmem:[%s14445_s9 + $0x40] sm:$0xff] }
 0x228   :  { %v932_v13 = vmax.f32 %v820_v16, %v925_v37  ;;  %v14732_v37 = vmov 0.0|0.0   ;;  %v12099_v16 = vpack.c.bf16 %v8468_v41, %v8466_v56  ;;  %v8473_v54 = vld [vmem:[%s14443_s7 + $0x110] sm:$0xff]  ;;  %v12153_v41 = vpack.c.bf16 %v1653_v38, %v1652_v11 }
 0x229   :  { %14735 = vst [vmem:[#allocation41_spill] sm:$0xff] %v12081_v2  ;;  %14741 = vst [vmem:[#allocation47_spill] sm:$0xff] %v12141_v33  ;;  %v1654_v56 = vld [vmem:[%s14445_s9 + $0x10] sm:$0xff] }
 0x22a   :  { %v9843_v1 = vpack.c.bf16 %v932_v13, %v931_v44  ;;  %v8446_v44 = vld [vmem:[%s14440_s4 + $0x18] sm:$0xf]  ;;  %14737 = vst [vmem:[#allocation43_spill] sm:$0xff] %v12099_v16  ;;  %v8467_v13 = vld [vmem:[%s14443_s7 + $0xe0] sm:$0xff]  ;;  %14742 = vst [vmem:[#allocation48_spill] sm:$0xff] %v12153_v41 }
 0x22b   :  { %v1662_v38 = vld [vmem:[%s14445_s9 + $0x50] sm:$0xff] }
 0x22c   :  { %9845 = vmatprep.subr.msk.bf16.mxu1 %vm12020_vm8, %v9843_v1 }
 0x22d   :  { %9848 = vmatpush3.bf16.msk.msra.mxu1 %vm12020_vm8, %v9843_v1 }
 0x22e   :  { %9850 = vmatprep.subr.bf16.mxu1 %v9839_v50 }
 0x230   :  { %9153 = vmatmul.mubr.msk.f32.vlgmr.msra.gmra.mrb[16].mxu1 %vm935_vm6, %v934_v55  ;;  %v8470_v55 = vld [vmem:[%s14443_s7 + $0xf8] sm:$0xff] }
 0x231   :  { %9852 = vmatpush3.bf16.msra.mxu1 %v9839_v50  ;;  %9163 = vmatprep.mubr.msk.f32.mxu1 %vm935_vm6, %v8445_v61  ;;  %v8472_v61 = vld [vmem:[%s14443_s7 + $0x108] sm:$0xff] }
 0x232   :  { %9855 = vmatprep.subr.msk.bf16.mxu1 %vm12020_vm8, %v9843_v1 }
 0x235   :  { %9858 = vmatpush3.bf16.msk.msra.mxu1 %vm12020_vm8, %v9843_v1 }
 0x236   :  { %9860 = vmatprep.subr.bf16.mxu1 %v9839_v50 }
 0x238   :  { %9164 = vmatmul.mubr.msk.f32.vlgmr.msra.gmra.mrb[18].mxu1 %vm935_vm6, %v8446_v44  ;;  %v12117_v44 = vpack.c.bf16 %v8472_v61, %v8470_v55  ;;  %v1656_v55 = vld [vmem:[%s14445_s9 + $0x20] sm:$0xff]  ;;  %v1657_v61 = vld [vmem:[%s14445_s9 + $0x28] sm:$0xff] }
 0x239   :  { %9862 = vmatpush3.bf16.msra.mxu1 %v9839_v50  ;;  %9174 = vmatprep.mubr.msk.f32.mxu1 %vm935_vm6, %v8450_v15  ;;  %v8458_v50 = vld [vmem:[%s14443_s7 + $0x98] sm:$0xff]  ;;  %v8469_v15 = vld [vmem:[%s14443_s7 + $0xf0] sm:$0xff] }
 0x23a   :  { %9865 = vmatprep.subr.msk.bf16.mxu1 %vm12020_vm8, %v9843_v1  ;;  %v12063_v0 = vpack.c.bf16 %v8460_v6, %v8458_v50  ;;  %14739 = vst [vmem:[#allocation45_spill] sm:$0xff] %v12117_v44  ;;  %v8474_v6 = vld [vmem:[%s14443_s7 + $0x118] sm:$0xff] }
 0x23c   :  { %14733 = vst [vmem:[#allocation39_spill] sm:$0xff] %v12063_v0  ;;  %9870 = vmatprep.subr.bf16.mxu0 %v12063_v0  ;;  %v1211_v0 = vld [vmem:[%s14443_s7] sm:$0xff] }
 0x23d   :  { %9868 = vmatpush3.bf16.msk.msra.mxu1 %vm12020_vm8, %v9843_v1  ;;  %9872 = vmatpush1.bf16.msra.mxu0 %v12071_v49  ;;  %v12107_v1 = vpack.c.bf16 %v8467_v13, %v8465_v12  ;;  %v1655_v12 = vld [vmem:[%s14445_s9 + $0x18] sm:$0xff] }
 0x23e   :  { %9933 = vmatprep.subr.bf16.mxu1 %v14732_v37  ;;  %9874 = vmatprep.subr.bf16.mxu0 %v12081_v2  ;;  %v12159_v13 = vpack.c.bf16 %v1655_v12, %v1654_v56  ;;  %v1663_v56 = vld [vmem:[%s14445_s9 + $0x58] sm:$0xff] }
 0x23f   :  { %14738 = vst [vmem:[#allocation44_spill] sm:$0xff] %v12107_v1  ;;  %v12199_v12 = vpack.c.bf16 %v1663_v56, %v1662_v38  ;;  %v1668_v38 = vld [vmem:[%s14445_s9 + $0x80] sm:$0xff]  ;;  %v1669_v56 = vld [vmem:[%s14445_s9 + $0x88] sm:$0xff] }
 0x240   :  { %9175 = vmatmul.mubr.msk.f32.vlgmr.msra.gmra.mrb[20].mxu1 %vm935_vm6, %v8451_v27  ;;  %v8471_v27 = vld [vmem:[%s14443_s7 + $0x100] sm:$0xff]  ;;  %14743 = vst [vmem:[#allocation49_spill] sm:$0xff] %v12159_v13 }
 0x241   :  { %9876 = vmatpush1.bf16.msra.mxu0 %v12089_v28  ;;  %v12125_v50 = vpack.c.bf16 %v8471_v27, %v8469_v15  ;;  %9935 = vmatpush1.bf16.msra.mxu1 %v12153_v41  ;;  %v12169_v15 = vpack.c.bf16 %v1657_v61, %v1656_v55  ;;  %v1658_v27 = vld [vmem:[%s14445_s9 + $0x30] sm:$0xff]  ;;  %14747 = vst [vmem:[#allocation53_spill] sm:$0xff] %v12199_v12  ;;  %v1664_v55 = vld [vmem:[%s14445_s9 + $0x60] sm:$0xff]  ;;  %v1665_v61 = vld [vmem:[%s14445_s9 + $0x68] sm:$0xff] }
 0x242   :  { %9878 = vmatprep.subr.bf16.mxu0 %v12099_v16  ;;  %9936 = vmatprep.subr.bf16.mxu1 %v14732_v37  ;;  %v8455_v16 = vld [vmem:[%s14441_s5] ss:$0 sm:$0xff] }
 0x243   :  { %14740 = vst [vmem:[#allocation46_spill] sm:$0xff] %v12125_v50  ;;  %14744 = vst [vmem:[#allocation50_spill] sm:$0xff] %v12169_v15 }
 0x245   :  { %9880 = vmatpush1.bf16.msra.mxu0 %v12107_v1  ;;  %9938 = vmatpush1.bf16.msra.mxu1 %v12159_v13 }
 0x246   :  { %9882 = vmatprep.subr.bf16.mxu0 %v12117_v44  ;;  %9939 = vmatprep.subr.bf16.mxu1 %v14732_v37 }
 0x249   :  { %9884 = vmatpush1.bf16.msra.mxu0 %v12125_v50  ;;  %9941 = vmatpush1.bf16.msra.mxu1 %v12169_v15 }
 0x24a   :  { %1275 = vmatprep.subr.mxu0 %v8474_v6  ;;  %v1659_v6 = vld [vmem:[%s14445_s9 + $0x38] sm:$0xff]  ;;  %9942 = vmatprep.subr.bf16.mxu1 %v14732_v37 }
 0x24b   :  { %v12179_v18 = vpack.c.bf16 %v1659_v6, %v1658_v27  ;;  %v12209_v27 = vpack.c.bf16 %v1665_v61, %v1664_v55  ;;  %v1666_v6 = vld [vmem:[%s14445_s9 + $0x70] sm:$0xff]  ;;  %v12229_v55 = vpack.c.bf16 %v1669_v56, %v1668_v38  ;;  %v8456_v56 = vld [vmem:[%s14442_s6] ss:$0 sm:$0xff] }
 0x24d   :  { %1276 = vmatpush1.msra.mxu0 %v8473_v54  ;;  %14745 = vst [vmem:[#allocation51_spill] sm:$0xff] %v12179_v18  ;;  %v1661_v54 = vld [vmem:[%s14445_s9 + $0x48] sm:$0xff]  ;;  %9944 = vmatpush1.bf16.msra.mxu1 %v12179_v18  ;;  %14748 = vst [vmem:[#allocation54_spill] sm:$0xff] %v12209_v27 }
 0x24e   :  { %9886 = vmatprep.subr.bf16.mxu0 %v12141_v33  ;;  %v12189_v11 = vpack.c.bf16 %v1661_v54, %v1660_v46  ;;  %9945 = vmatprep.subr.bf16.mxu1 %v14732_v37  ;;  %v1667_v46 = vld [vmem:[%s14445_s9 + $0x78] sm:$0xff]  ;;  %14750 = vst [vmem:[#allocation56_spill] sm:$0xff] %v12229_v55 }
 0x24f   :  { %v12219_v54 = vpack.c.bf16 %v1667_v46, %v1666_v6 }
 0x250   :  { %14746 = vst [vmem:[#allocation52_spill] sm:$0xff] %v12189_v11 }
 0x251   :  { %9947 = vmatpush1.bf16.msra.mxu1 %v12189_v11  ;;  %14749 = vst [vmem:[#allocation55_spill] sm:$0xff] %v12219_v54 }
 0x252   :  { %9948 = vmatprep.subr.bf16.mxu1 %v14732_v37 }
 0x255   :  { %9950 = vmatpush1.bf16.msra.mxu1 %v12199_v12 }
 0x256   :  { %9951 = vmatprep.subr.bf16.mxu1 %v14732_v37 }
 0x259   :  { %9953 = vmatpush1.bf16.msra.mxu1 %v12209_v27 }
 0x25a   :  { %9954 = vmatprep.subr.bf16.mxu1 %v14732_v37 }
 0x25d   :  { %9956 = vmatpush1.bf16.msra.mxu1 %v12219_v54 }
 0x25e   :  { %9957 = vmatprep.subr.bf16.mxu1 %v14732_v37 }
 0x261   :  { %9959 = vmatpush1.bf16.msra.mxu1 %v12229_v55 }
 0x262   :  { %9960 = vmatprep.subr.bf16.mxu1 %v14732_v37 }
 0x303   :  { %v9154_v61 = vpop.f32.mrb[16].mxu1 }
 0x304   :  { %v1012_v6 = vpop.f32.mrb[17].mxu1 }
 0x30b   :  { %v9165_v46 = vpop.f32.mrb[18].mxu1 }
 0x30c   :  { %v1106_v33 = vmax.f32 %v9154_v61, %v9165_v46  ;;  %v1096_v50 = vpop.f32.mrb[19].mxu1 }
 0x30d   :  { %v1105_v44 = vmax.f32 %v1012_v6, %v1096_v50  ;;  %v1213_v50 = vld [vmem:[%s14443_s7 + $0x10] sm:$0xff] }
 0x313   :  { %v9176_v1 = vpop.f32.mrb[20].mxu1 }
 0x314   :  { %v1192_v28 = vmax.f32 %v1106_v33, %v9176_v1  ;;  %v1182_v38 = vpop.f32.mrb[21].mxu1  ;;  %v12248_v1 = vpack.c.bf16 %v1213_v50, %v1211_v0  ;;  %v1215_v50 = vld [vmem:[%s14443_s7 + $0x20] sm:$0xff] }
 0x315   :  { %v1191_v2 = vmax.f32 %v1105_v44, %v1182_v38  ;;  %v1216_v44 = vld [vmem:[%s14443_s7 + $0x28] sm:$0xff]  ;;  %v1222_v38 = vld [vmem:[%s14443_s7 + $0x58] sm:$0xff] }
 0x316   :  { %v1201_v49 = vmul.f32 %v8455_v16, %v1192_v28  ;;  %v1218_v28 = vld [vmem:[%s14443_s7 + $0x38] sm:$0xff] }
 0x317   :  { %v1200_v61 = vmul.f32 %v8455_v16, %v1191_v2  ;;  %v12259_v0 = vpack.c.bf16 %v1218_v28, %v1216_v44  ;;  %v1220_v2 = vld [vmem:[%s14443_s7 + $0x48] sm:$0xff] }
 0x318   :  { %v12246_v6 = vadd.f32 %v8456_v56, %v1201_v49  ;;  %v12290_v11 = vpack.c.bf16 %v1222_v38, %v1220_v2 }
 0x319   :  { %v1209_v46 = vadd.f32 %v8456_v56, %v1200_v61  ;;  %14751 = vst [vmem:[#allocation57_spill] sm:$0xff] %v12259_v0  ;;  %v1217_v61 = vld [vmem:[%s14443_s7 + $0x30] sm:$0xff] }
 0x31a   :  { %v1252_v33 = vrot.slane %v12246_v6, 1  ;;  %v14752_v44 = vrot.slane %v12246_v6, 2  ;;  %v14753_v54 = vrot.slane %v12246_v6, 3  ;;  %v12287_v12 = vpack.c.bf16 %v1217_v61, %v1215_v50  ;;  %14756 = vst [vmem:[#allocation59_spill] sm:$0xff] %v12290_v11  ;;  %v1223_v50 = vld [vmem:[%s14443_s7 + $0x60] sm:$0xff]  ;;  %v1225_v61 = vld [vmem:[%s14443_s7 + $0x70] sm:$0xff] }
 0x31b   :  { %v1251_v49 = vrot.slane %v1209_v46, 1  ;;  %v1436_v16 = vrot.slane %v1209_v46, 2  ;;  %v1544_v56 = vrot.slane %v1209_v46, 3 }
 0x31c   :  { %14755 = vst [vmem:[#allocation58_spill] sm:$0xff] %v12287_v12 }
 0x31d   :  { %v1253_v55 = vsel %vm1250_vm9, %v1251_v49, %v1252_v33  ;;  %v12277_v28 = vsel %vm620_vm4, %v1436_v16, %v14752_v44  ;;  %v12282_v27 = vsel %vm1543_vm10, %v1544_v56, %v14753_v54  ;;  %v14754_v49 = vmov 0.0   ;;  %v1219_v16 = vld [vmem:[%s14443_s7 + $0x40] sm:$0xff]  ;;  %v1221_v54 = vld [vmem:[%s14443_s7 + $0x50] sm:$0xff]  ;;  %v1226_v56 = vld [vmem:[%s14443_s7 + $0x78] sm:$0xff] }
 0x31e   :  { %8475 = vmatmul.mubr.msk.f32.vlgmr.msra.gmra.mrb[16].mxu0 %vm1254_vm11, %v1253_v55  ;;  %v1224_v55 = vld [vmem:[%s14443_s7 + $0x68] sm:$0xff]  ;;  %v12306_v38 = vpack.c.bf16 %v1221_v54, %v1219_v16  ;;  %v8482_v54 = vld [vmem:[%s14443_s7 + $0x138] sm:$0xff] }
 0x31f   :  { %9888 = vmatpush1.bf16.msra.mxu0 %v12248_v1  ;;  %1329 = vmatprep.mubr.f32.mxu0 %v14754_v49  ;;  %v12310_v2 = vpack.c.bf16 %v1226_v56, %v1224_v55  ;;  %v1228_v44 = vld [vmem:[%s14443_s7 + $0x88] sm:$0xff]  ;;  %v8479_v55 = vld [vmem:[%s14443_s7 + $0x120] sm:$0xff]  ;;  %v8481_v56 = vld [vmem:[%s14443_s7 + $0x130] sm:$0xff] }
 0x320   :  { %9890 = vmatprep.subr.bf16.mxu0 %v12259_v0  ;;  %14757 = vst [vmem:[#allocation60_spill] sm:$0xff] %v12306_v38  ;;  %v8480_v16 = vld [vmem:[%s14443_s7 + $0x128] sm:$0xff]  ;;  %v8485_v0 = vld [vmem:[%s14443_s7 + $0x150] sm:$0xff] }
 0x321   :  { %14758 = vst [vmem:[#allocation61_spill] sm:$0xff] %v12310_v2 }
 0x322   :  { %8476 = vmatmul.mubr.msk.f32.gmra.mrb[18].mxu0 %vm1254_vm11, %v1252_v33  ;;  %v12319_v33 = vpack.c.bf16 %v1225_v61, %v1223_v50  ;;  %v8484_v50 = vld [vmem:[%s14443_s7 + $0x148] sm:$0xff]  ;;  %v8486_v61 = vld [vmem:[%s14443_s7 + $0x158] sm:$0xff] }
 0x323   :  { %9892 = vmatpush1.bf16.msra.mxu0 %v12287_v12  ;;  %1404 = vmatprep.mubr.f32.mxu0 %v14754_v49  ;;  %v12351_v12 = vpack.c.bf16 %v8486_v61, %v8484_v50  ;;  %v8491_v61 = vld [vmem:[%s14443_s7 + $0x180] sm:$0xff] }
 0x324   :  { %9894 = vmatprep.subr.bf16.mxu0 %v12290_v11  ;;  %14759 = vst [vmem:[#allocation62_spill] sm:$0xff] %v12319_v33  ;;  %v12349_v11 = vpack.c.bf16 %v8481_v56, %v8479_v55  ;;  %v8487_v55 = vld [vmem:[%s14443_s7 + $0x160] sm:$0xff]  ;;  %v8492_v56 = vld [vmem:[%s14443_s7 + $0x188] sm:$0xff] }
 0x325   :  { %14761 = vst [vmem:[#allocation64_spill] sm:$0xff] %v12351_v12 }
 0x326   :  { %14760 = vst [vmem:[#allocation63_spill] sm:$0xff] %v12349_v11 }
 0x327   :  { %9896 = vmatpush1.bf16.msra.mxu0 %v12306_v38  ;;  %v12347_v38 = vpack.c.bf16 %v8482_v54, %v8480_v16  ;;  %v8490_v16 = vld [vmem:[%s14443_s7 + $0x178] sm:$0xff] }
 0x328   :  { %9898 = vmatprep.subr.bf16.mxu0 %v12310_v2  ;;  %v1227_v2 = vld [vmem:[%s14443_s7 + $0x80] sm:$0xff] }
 0x32b   :  { %9900 = vmatpush1.bf16.msra.mxu0 %v12319_v33  ;;  %v8483_v33 = vld [vmem:[%s14443_s7 + $0x140] sm:$0xff] }
 0x32c   :  { %1356 = vmatprep.subr.mxu0 %v1228_v44  ;;  %v8488_v44 = vld [vmem:[%s14443_s7 + $0x168] sm:$0xff]  ;;  %v12369_v54 = vpack.c.bf16 %v8485_v0, %v8483_v33  ;;  %v8494_v0 = vld [vmem:[%s14443_s7 + $0x198] sm:$0xff] }
 0x32d   :  { %v12393_v50 = vpack.c.bf16 %v8494_v0, %v8492_v56  ;;  %v8502_v56 = vld [vmem:[%s14443_s7 + $0x1c8] sm:$0xff]  ;;  %v8499_v0 = vld [vmem:[%s14443_s7 + $0x1b0] sm:$0xff] }
 0x32e   :  { %14762 = vst [vmem:[#allocation65_spill] sm:$0xff] %v12369_v54 }
 0x32f   :  { %1357 = vmatpush1.msra.mxu0 %v1227_v2  ;;  %v12372_v2 = vpack.c.bf16 %v8490_v16, %v8488_v44  ;;  %14765 = vst [vmem:[#allocation68_spill] sm:$0xff] %v12393_v50  ;;  %v8493_v44 = vld [vmem:[%s14443_s7 + $0x190] sm:$0xff] }
 0x330   :  { %8477 = vmatmul.mubr.msk.f32.vlgmr.msra.gmra.mrb[16].mxu0 %vm1254_vm11, %v1209_v46  ;;  %9902 = vmatprep.subr.bf16.mxu0 %v12347_v38  ;;  %v8489_v46 = vld [vmem:[%s14443_s7 + $0x170] sm:$0xff]  ;;  %v12402_v16 = vpack.c.bf16 %v8493_v44, %v8491_v61  ;;  %v8501_v61 = vld [vmem:[%s14443_s7 + $0x1c0] sm:$0xff]  ;;  %v8504_v44 = vld [vmem:[%s14443_s7 + $0x1d8] sm:$0xff] }
 0x331   :  { %9904 = vmatpush1.bf16.msra.mxu0 %v12349_v11  ;;  %1410 = vmatprep.mubr.f32.mxu0 %v14754_v49  ;;  %14763 = vst [vmem:[#allocation66_spill] sm:$0xff] %v12372_v2  ;;  %v12389_v33 = vpack.c.bf16 %v8489_v46, %v8487_v55  ;;  %v8496_v55 = vld [vmem:[%s14443_s7 + $0x1a8] sm:$0xff]  ;;  %v8500_v46 = vld [vmem:[%s14443_s7 + $0x1b8] sm:$0xff]  ;;  %v8505_v11 = vld [vmem:[%s14443_s7 + $0x1e0] sm:$0xff] }
 0x332   :  { %9906 = vmatprep.subr.bf16.mxu0 %v12351_v12  ;;  %14766 = vst [vmem:[#allocation69_spill] sm:$0xff] %v12402_v16 }
 0x333   :  { %14764 = vst [vmem:[#allocation67_spill] sm:$0xff] %v12389_v33 }
 0x334   :  { %8478 = vmatmul.mubr.msk.f32.gmra.mrb[18].mxu0 %vm1254_vm11, %v12246_v6 }
 0x335   :  { %9908 = vmatpush1.bf16.msra.mxu0 %v12369_v54  ;;  %1507 = vmatprep.mubr.f32.mxu0 %v14754_v49  ;;  %v12432_v54 = vpack.c.bf16 %v8501_v61, %v8499_v0  ;;  %v8512_v0 = vld [vmem:[%s14443_s7 + $0x218] sm:$0xff] }
 0x336   :  { %9910 = vmatprep.subr.bf16.mxu0 %v12372_v2  ;;  %v12430_v2 = vpack.c.bf16 %v8502_v56, %v8500_v46  ;;  %v8510_v46 = vld [vmem:[%s14443_s7 + $0x208] sm:$0xff]  ;;  %v8507_v56 = vld [vmem:[%s14443_s7 + $0x1f0] sm:$0xff] }
 0x337   :  { %14768 = vst [vmem:[#allocation71_spill] sm:$0xff] %v12432_v54 }
 0x338   :  { %14767 = vst [vmem:[#allocation70_spill] sm:$0xff] %v12430_v2 }
 0x339   :  { %9912 = vmatpush1.bf16.msra.mxu0 %v12389_v33  ;;  %v8495_v33 = vld [vmem:[%s14443_s7 + $0x1a0] sm:$0xff] }
 0x33a   :  { %9914 = vmatprep.subr.bf16.mxu0 %v12393_v50  ;;  %v8506_v50 = vld [vmem:[%s14443_s7 + $0x1e8] sm:$0xff] }
 0x33b   :  { %v12434_v12 = vpack.c.bf16 %v8506_v50, %v8504_v44 }
 0x33d   :  { %9916 = vmatpush1.bf16.msra.mxu0 %v12402_v16  ;;  %14769 = vst [vmem:[#allocation72_spill] sm:$0xff] %v12434_v12  ;;  %v8503_v16 = vld [vmem:[%s14443_s7 + $0x1d0] sm:$0xff] }
 0x33e   :  { %1459 = vmatprep.subr.mxu0 %v8496_v55  ;;  %v8508_v55 = vld [vmem:[%s14443_s7 + $0x1f8] sm:$0xff]  ;;  %v12453_v50 = vpack.c.bf16 %v8505_v11, %v8503_v16  ;;  %v8514_v11 = vld [vmem:[%s14443_s7 + $0x228] sm:$0xff]  ;;  %v14772_v16 = vrot.slane %v12246_v6, 2 }
 0x33f   :  { %v12478_v44 = vpack.c.bf16 %v8514_v11, %v8512_v0  ;;  %v14776_v0 = vrot.slane %v12246_v6, 3  ;;  %v1670_v11 = vld [vmem:[%s14445_s9 + $0x90] sm:$0xff]  ;;  %v14778_v6 = vsub.s32 0, %v11869_v36 }
 0x340   :  { %14770 = vst [vmem:[#allocation73_spill] sm:$0xff] %v12453_v50 }
 0x341   :  { %1460 = vmatpush1.msra.mxu0 %v8495_v33  ;;  %v12456_v33 = vpack.c.bf16 %v8510_v46, %v8508_v55  ;;  %14774 = vst [vmem:[#allocation76_spill] sm:$0xff] %v12478_v44  ;;  %v8511_v55 = vld [vmem:[%s14443_s7 + $0x210] sm:$0xff]  ;;  %v8513_v46 = vld [vmem:[%s14443_s7 + $0x220] sm:$0xff] }
 0x342   :  { %8497 = vmatmul.mubr.msk.f32.vlgmr.msra.gmra.mrb[16].mxu0 %vm1254_vm11, %v12277_v28  ;;  %9918 = vmatprep.subr.bf16.mxu0 %v12430_v2  ;;  %v8509_v28 = vld [vmem:[%s14443_s7 + $0x200] sm:$0xff] }
 0x343   :  { %9920 = vmatpush1.bf16.msra.mxu0 %v12432_v54  ;;  %1513 = vmatprep.mubr.f32.mxu0 %v14754_v49  ;;  %14771 = vst [vmem:[#allocation74_spill] sm:$0xff] %v12456_v33  ;;  %v12474_v61 = vpack.c.bf16 %v8509_v28, %v8507_v56  ;;  %v8516_v56 = vld [vmem:[%s14443_s7 + $0x238] sm:$0xff]  ;;  %v8515_v28 = vld [vmem:[%s14443_s7 + $0x230] sm:$0xff] }
 0x344   :  { %9922 = vmatprep.subr.bf16.mxu0 %v12434_v12  ;;  %v8524_v12 = vld [vmem:[%s14445_s9 + $0xb0] sm:$0xff]  ;;  %v8525_v54 = vld [vmem:[%s14445_s9 + $0xb8] sm:$0xff] }
 0x345   :  { %14773 = vst [vmem:[#allocation75_spill] sm:$0xff] %v12474_v61 }
 0x346   :  { %8498 = vmatmul.mubr.msk.f32.gmra.mrb[18].mxu0 %vm1254_vm11, %v14772_v16  ;;  %v12487_v16 = vpack.c.bf16 %v8513_v46, %v8511_v55  ;;  %v1671_v55 = vld [vmem:[%s14445_s9 + $0x98] sm:$0x1] }
 0x347   :  { %9924 = vmatpush1.bf16.msra.mxu0 %v12453_v50  ;;  %1615 = vmatprep.mubr.f32.mxu0 %v14754_v49  ;;  %v12510_v46 = vpack.c.bf16 %v1671_v55, %v1670_v11 }
 0x348   :  { %9926 = vmatprep.subr.bf16.mxu0 %v12456_v33  ;;  %14775 = vst [vmem:[#allocation77_spill] sm:$0xff] %v12487_v16 }
 0x349   :  { %14777 = vst [vmem:[#allocation78_spill] sm:$0xff] %v12510_v46  ;;  %9963 = vmatpush1.bf16.msk.msra.mxu1 %vm12020_vm8, %v12510_v46 }
 0x34a   :  { %9964 = vmatprep.subr.bf16.mxu1 %v14732_v37 }
 0x34b   :  { %9928 = vmatpush1.bf16.msra.mxu0 %v12474_v61  ;;  %v8523_v61 = vld [vmem:[%s14445_s9 + $0xa8] sm:$0xff] }
 0x34c   :  { %9930 = vmatprep.subr.bf16.mxu0 %v12478_v44  ;;  %v8522_v44 = vld [vmem:[%s14445_s9 + $0xa0] sm:$0xff] }
 0x34f   :  { %9932 = vmatpush1.bf16.msra.mxu0 %v12487_v16 }
 0x350   :  { %1567 = vmatprep.subr.mxu0 %v8516_v56 }
 0x353   :  { %1568 = vmatpush1.msra.mxu0 %v8515_v28  ;;  %v14779_v28 = vsub.s32 1, %v11869_v36  ;;  %v12537_v36 = vpack.c.bf16 %v8523_v61, %v8522_v44  ;;  %v12550_v44 = vpack.c.bf16 %v8525_v54, %v8524_v12  ;;  %v8528_v54 = vld [vmem:[%s14445_s9 + $0xd0] sm:$0xff] }
 0x354   :  { %8517 = vmatmul.mubr.msk.f32.vlgmr.msra.gmra.mrb[16].mxu0 %vm1254_vm11, %v12282_v27  ;;  %9995 = vmatprep.subr.bf16.mxu0 %v14732_v37  ;;  %v1632_v27 = vld [vmem:[%s14444_s8] sm:$0x3] }
 0x355   :  { %1621 = vmatprep.mubr.f32.mxu0 %v14754_v49  ;;  %v12521_v56 = vrot.slane %v1632_v27, %v14778_v6 }
 0x358   :  { %8518 = vmatmul.mubr.msk.f32.gmra.mrb[18].mxu0 %vm1254_vm11, %v14776_v0  ;;  %v12525_v0 = vrot.slane %v1632_v27, %v14779_v28 }
 0x359   :  { %9181 = vmatprep.mubr.msk.f32.mxu0 %vm11330_vm12, %v14754_v49 }
 0x427   :  { %v1617_v11 = vpop.f32.mrb[16].mxu0 }
 0x428   :  { %v12528_v55 = vadd.f32 %v12521_v56, %v1617_v11  ;;  %v1619_v16 = vpop.f32.mrb[17].mxu0 }
 0x429   :  { %v1645_v6 = vadd.f32 %v12525_v0, %v1619_v16  ;;  %v8526_v16 = vld [vmem:[%s14445_s9 + $0xc0] sm:$0xff] }
 0x42a   :  { %v1648_v27 = vmax.f32 %v12528_v55, 0.0  ;;  %v8527_v55 = vld [vmem:[%s14445_s9 + $0xc8] sm:$0xff] }
 0x42b   :  { %v1649_v33 = vmax.f32 %v1645_v6, 0.0  ;;  %v1623_v50 = vpop.f32.mrb[18].mxu0  ;;  %v12562_v12 = vpack.c.bf16 %v8527_v55, %v8526_v16  ;;  %v8532_v16 = vld [vmem:[%s14445_s9 + $0xf0] sm:$0xff]  ;;  %v8533_v55 = vld [vmem:[%s14445_s9 + $0xf8] sm:$0xff] }
 0x42c   :  { %v1646_v28 = vadd.f32 %v12521_v56, %v1623_v50  ;;  %v1625_v11 = vpop.f32.mrb[19].mxu0 }
 0x42d   :  { %v1647_v2 = vadd.f32 %v12525_v0, %v1625_v11  ;;  %8520 = vmatprep.mubr.msk.f32.mxu1 %vm935_vm6, %v1649_v33 }
 0x42e   :  { %1746 = vmatmul.mubr.f32.vlgmr.msra.gmra.mrb[22].mxu1 %v1648_v27  ;;  %v1650_v50 = vmax.f32 %v1646_v28, 0.0  ;;  %v8531_v28 = vld [vmem:[%s14445_s9 + $0xe8] sm:$0xff] }
 0x42f   :  { %v1651_v61 = vmax.f32 %v1647_v2, 0.0  ;;  %9966 = vmatpush1.bf16.msra.mxu1 %v12537_v36  ;;  %v8529_v2 = vld [vmem:[%s14445_s9 + $0xd8] sm:$0xff] }
 0x430   :  { %9967 = vmatprep.subr.bf16.mxu1 %v14732_v37  ;;  %v12572_v6 = vpack.c.bf16 %v8529_v2, %v8528_v54  ;;  %v12592_v54 = vpack.c.bf16 %v8533_v55, %v8532_v16  ;;  %v8534_v2 = vld [vmem:[%s14445_s9 + $0x100] sm:$0xff]  ;;  %v8536_v16 = vld [vmem:[%s14445_s9 + $0x110] sm:$0xff]  ;;  %v8537_v55 = vld [vmem:[%s14445_s9 + $0x118] sm:$0xff] }
 0x431   :  { %8521 = vmatprep.mubr.msk.f32.mxu1 %vm935_vm6, %v1651_v61 }
 0x432   :  { %1751 = vmatmul.mubr.f32.gmra.mrb[24].mxu1 %v1650_v50  ;;  %14781 = vst [vmem:[#allocation80_spill] sm:$0xff] %v12592_v54 }
 0x433   :  { %9969 = vmatpush1.bf16.msra.mxu1 %v12550_v44  ;;  %8543 = vmatprep.mubr.msk.f32.mxu1 %vm935_vm6, %v1649_v33  ;;  %v8530_v33 = vld [vmem:[%s14445_s9 + $0xe0] sm:$0xff] }
 0x434   :  { %9970 = vmatprep.subr.bf16.mxu1 %v14732_v37  ;;  %v12582_v11 = vpack.c.bf16 %v8531_v28, %v8530_v33  ;;  %v8535_v33 = vld [vmem:[%s14445_s9 + $0x108] sm:$0xff] }
 0x435   :  { %v12602_v28 = vpack.c.bf16 %v8535_v33, %v8534_v2  ;;  %v8538_v2 = vld [vmem:[%s14445_s9 + $0x120] sm:$0xff]  ;;  %v8539_v33 = vld [vmem:[%s14445_s9 + $0x128] sm:$0xff] }
 0x436   :  { %14780 = vst [vmem:[#allocation79_spill] sm:$0xff] %v12582_v11 }
 0x437   :  { %9972 = vmatpush1.bf16.msra.mxu1 %v12562_v12  ;;  %14782 = vst [vmem:[#allocation81_spill] sm:$0xff] %v12602_v28 }
 0x438   :  { %9973 = vmatprep.subr.bf16.mxu1 %v14732_v37 }
 0x43b   :  { %9975 = vmatpush1.bf16.msra.mxu1 %v12572_v6 }
 0x43c   :  { %9976 = vmatprep.subr.bf16.mxu1 %v14732_v37 }
 0x43f   :  { %9978 = vmatpush1.bf16.msra.mxu1 %v12582_v11  ;;  %v12612_v11 = vpack.c.bf16 %v8537_v55, %v8536_v16  ;;  %v8540_v16 = vld [vmem:[%s14445_s9 + $0x130] sm:$0xff]  ;;  %v8541_v55 = vld [vmem:[%s14445_s9 + $0x138] sm:$0x1] }
 0x440   :  { %9979 = vmatprep.subr.bf16.mxu1 %v14732_v37 }
 0x443   :  { %9981 = vmatpush1.bf16.msra.mxu1 %v12592_v54  ;;  %v12622_v54 = vpack.c.bf16 %v8539_v33, %v8538_v2 }
 0x444   :  { %9982 = vmatprep.subr.bf16.mxu1 %v14732_v37 }
 0x447   :  { %9984 = vmatpush1.bf16.msra.mxu1 %v12602_v28  ;;  %v12632_v28 = vpack.c.bf16 %v8541_v55, %v8540_v16 }
 0x448   :  { %9985 = vmatprep.subr.bf16.mxu1 %v14732_v37 }
 0x449   :  { %14783 = vst [vmem:[#allocation82_spill] sm:$0xff] %v12632_v28 }
 0x44b   :  { %9987 = vmatpush1.bf16.msra.mxu1 %v12612_v11 }
 0x44c   :  { %9988 = vmatprep.subr.bf16.mxu1 %v14732_v37 }
 0x44f   :  { %9990 = vmatpush1.bf16.msra.mxu1 %v12622_v54 }
 0x450   :  { %9991 = vmatprep.subr.bf16.mxu1 %v14732_v37 }
 0x453   :  { %9994 = vmatpush1.bf16.msk.msra.mxu1 %vm12020_vm8, %v12632_v28 }
 0x454   :  { %10062 = vmatprep.subr.bf16.mxu1 %v11483_v17 }
 0x456   :  { %1845 = vmatmul.mubr.f32.vlgmr.msra.gmra.mrb[26].mxu1 %v1648_v27 }
 0x457   :  { %8544 = vmatprep.mubr.msk.f32.mxu1 %vm935_vm6, %v1651_v61  ;;  %10064 = vmatpush1.bf16.msra.mxu1 %v11503_v23 }
 0x458   :  { %10067 = vmatprep.subr.msk.bf16.mxu1 %vm11458_vm2, %v11506_v24 }
 0x45a   :  { %1850 = vmatmul.mubr.f32.gmra.mrb[28].mxu1 %v1650_v50 }
 0x45b   :  { %10070 = vmatpush1.bf16.msk.msra.mxu1 %vm11458_vm2, %v11526_v30  ;;  %2559 = vmatprep.mubr.f32.mxu1 %v14754_v49 }
 0x45c   :  { %10072 = vmatprep.subr.bf16.mxu1 %v11531_v31  ;;  %v1857_v31 = vld [vmem:[%s14446_s10] sm:$0xf] }
 0x501   :  { %v1747_v27 = vpop.f32.mrb[22].mxu1 }
 0x502   :  { %v1749_v61 = vpop.f32.mrb[23].mxu1 }
 0x503   :  { %v8552_v61 = vld [vmem:[%s14449_s13 + $0x48] sm:$0xff] }
 0x505   :  { %v1752_v2 = vpop.f32.mrb[24].mxu1 }
 0x506   :  { %v1754_v33 = vpop.f32.mrb[25].mxu1 }
 0x507   :  { %v8557_v33 = vld [vmem:[%s14449_s13 + $0x70] sm:$0xff] }
 0x529   :  { %v1846_v16 = vpop.f32.mrb[26].mxu1 }
 0x52a   :  { %v1855_v55 = vmax.f32 %v1747_v27, %v1846_v16  ;;  %v1848_v24 = vpop.f32.mrb[27].mxu1  ;;  %v8554_v27 = vld [vmem:[%s14449_s13 + $0x58] sm:$0xff] }
 0x52b   :  { %v8553_v24 = vld [vmem:[%s14449_s13 + $0x50] sm:$0xff] }
 0x52d   :  { %v1851_v50 = vpop.f32.mrb[28].mxu1 }
 0x52e   :  { %v1856_v23 = vmax.f32 %v1752_v2, %v1851_v50  ;;  %v1853_v17 = vpop.f32.mrb[29].mxu1  ;;  %v8556_v2 = vld [vmem:[%s14449_s13 + $0x68] sm:$0xff]  ;;  %v8559_v50 = vld [vmem:[%s14449_s13 + $0x80] sm:$0xff] }
 0x52f   :  { %v8547_v17 = vld [vmem:[%s14446_s10 + $0x4] sm:$0xf]  ;;  %v12695_v16 = vpack.c.bf16 %v8557_v33, %v8556_v2  ;;  %v8590_v2 = vld [vmem:[%s14694_s21 + $0x38] sm:$0x1] }
 0x530   :  { %v9996_v28 = vpack.c.bf16 %v1856_v23, %v1855_v55  ;;  %v12671_v23 = vpack.c.bf16 %v8553_v24, %v8552_v61  ;;  %v8558_v55 = vld [vmem:[%s14449_s13 + $0x78] sm:$0xff]  ;;  %v8587_v24 = vld [vmem:[%s14694_s21 + $0x20] sm:$0xff] }
 0x531   :  { %14786 = vst [vmem:[#allocation85_spill] sm:$0xff] %v12695_v16  ;;  %v12705_v61 = vpack.c.bf16 %v8559_v50, %v8558_v55  ;;  %8603 = vmatmul.mubr.msk.f32.vlgmr.msra.gmra.mrb[30].mxu1 %vm88_vm3, %v8587_v24  ;;  %v8607_v33 = vld [vmem:[%s14694_s21 + $0x22] sm:$0xff]  ;;  %v8608_v55 = vld [vmem:[%s14694_s21 + $0x2a] sm:$0xff]  ;;  %v8609_v50 = vld [vmem:[%s14694_s21 + $0x32] sm:$0xff] }
 0x532   :  { %9998 = vmatpush3.bf16.msk.msra.mxu0 %vm12020_vm8, %v9996_v28  ;;  %14784 = vst [vmem:[#allocation83_spill] sm:$0xff] %v12671_v23  ;;  %2565 = vmatprep.mubr.f32.mxu1 %v14754_v49  ;;  %v8610_v24 = vld [vmem:[%s14694_s21 + $0x3a] sm:$0x1] }
 0x533   :  { %9999 = vmatprep.subr.bf16.mxu0 %v14732_v37  ;;  %14787 = vst [vmem:[#allocation86_spill] sm:$0xff] %v12705_v61  ;;  %10074 = vmatpush1.bf16.msra.mxu1 %v11588_v47 }
 0x534   :  { %10077 = vmatprep.subr.msk.bf16.mxu1 %vm11458_vm2, %v11591_v48 }
 0x535   :  { %9182 = vmatmul.mubr.msk.f32.vlgmr.msra.gmra.mrb[20].mxu0 %vm1858_vm13, %v1857_v31  ;;  %v8555_v31 = vld [vmem:[%s14449_s13 + $0x60] sm:$0xff] }
 0x536   :  { %10002 = vmatpush3.bf16.msk.msra.mxu0 %vm12020_vm8, %v9996_v28  ;;  %9188 = vmatprep.mubr.msk.f32.mxu0 %vm11330_vm12, %v14754_v49  ;;  %v12682_v28 = vpack.c.bf16 %v8555_v31, %v8554_v27  ;;  %v8588_v27 = vld [vmem:[%s14694_s21 + $0x28] sm:$0xff]  ;;  %v8589_v31 = vld [vmem:[%s14694_s21 + $0x30] sm:$0xff] }
 0x537   :  { %10003 = vmatprep.subr.bf16.mxu0 %v14732_v37  ;;  %8604 = vmatmul.mubr.msk.f32.gmra.mrb[32].mxu1 %vm88_vm3, %v8588_v27  ;;  %v8617_v27 = vld [vmem:[%s14694_s21 + $0x23] sm:$0xff] }
 0x538   :  { %14785 = vst [vmem:[#allocation84_spill] sm:$0xff] %v12682_v28  ;;  %2571 = vmatprep.mubr.f32.mxu1 %v14754_v49  ;;  %10080 = vmatpush1.bf16.msk.msra.mxu1 %vm11458_vm2, %v11620_v57 }
 0x539   :  { %9189 = vmatmul.mubr.msk.f32.vlgmr.msra.gmra.mrb[22].mxu0 %vm1858_vm13, %v8547_v17  ;;  %v12716_v17 = vld [vmem:[%s14449_s13 + $0x88] sm:$0xf]  ;;  %10082 = vmatprep.subr.bf16.mxu1 %v11625_v58 }
 0x53a   :  { %10005 = vmatpush3.bf16.msra.mxu0 %v12671_v23  ;;  %9209 = vmatprep.mubr.msk.f32.mxu0 %vm11330_vm12, %v14754_v49  ;;  %v15031_v5 = vld [vmem:[#allocation86_spill] sm:$0xff] }
 0x53b   :  { %10006 = vmatprep.subr.bf16.mxu0 %v14732_v37  ;;  %8605 = vmatmul.mubr.msk.f32.gmra.mrb[34].mxu1 %vm88_vm3, %v8589_v31  ;;  %v8618_v31 = vld [vmem:[%s14694_s21 + $0x2b] sm:$0xff] }
 0x53c   :  { %2577 = vmatprep.mubr.f32.mxu1 %v14754_v49 }
 0x53e   :  { %10008 = vmatpush3.bf16.msra.mxu0 %v12682_v28 }
 0x53f   :  { %10009 = vmatprep.subr.bf16.mxu0 %v14732_v37  ;;  %8606 = vmatmul.mubr.msk.f32.gmra.mrb[36].mxu1 %vm88_vm3, %v8590_v2  ;;  %v8619_v2 = vld [vmem:[%s14694_s21 + $0x33] sm:$0xff] }
 0x540   :  { %2664 = vmatprep.mubr.f32.mxu1 %v14754_v49 }
 0x542   :  { %10011 = vmatpush3.bf16.msra.mxu0 %v12695_v16 }
 0x543   :  { %10012 = vmatprep.subr.bf16.mxu0 %v14732_v37  ;;  %8613 = vmatmul.mubr.msk.f32.vlgmr.msra.gmra.mrb[30].mxu1 %vm88_vm3, %v8607_v33  ;;  %v8620_v33 = vld [vmem:[%s14694_s21 + $0x3b] sm:$0x1] }
 0x544   :  { %2670 = vmatprep.mubr.f32.mxu1 %v14754_v49  ;;  %10084 = vmatpush1.bf16.msra.mxu1 %v11688_v19 }
 0x545   :  { %10087 = vmatprep.subr.msk.bf16.mxu1 %vm11458_vm2, %v11690_v20 }
 0x546   :  { %10014 = vmatpush3.bf16.msra.mxu0 %v12705_v61 }
 0x547   :  { %9207 = vmatprep.subr.mxu0 %v14754_v49  ;;  %8614 = vmatmul.mubr.msk.f32.gmra.mrb[32].mxu1 %vm88_vm3, %v8608_v55  ;;  %v11253_v55 = vld [vmem:[%s14698_s22 + $0x90] sm:$0x3f] }
 0x548   :  { %2676 = vmatprep.mubr.f32.mxu1 %v14754_v49  ;;  %10090 = vmatpush1.bf16.msk.msra.mxu1 %vm11458_vm2, %v11714_v29 }
 0x549   :  { %10091 = vmatprep.subr.bf16.mxu1 %v14732_v37 }
 0x54a   :  { %9208 = vmatpush3.msk.msra.mxu0 %vm101_vm0, %v12716_v17 }
 0x54b   :  { %10015 = vmatprep.subr.bf16.mxu0 %v14732_v37  ;;  %8615 = vmatmul.mubr.msk.f32.gmra.mrb[34].mxu1 %vm88_vm3, %v8609_v50 }
 0x54c   :  { %2682 = vmatprep.mubr.f32.mxu1 %v14754_v49 }
 0x54f   :  { %8616 = vmatmul.mubr.msk.f32.gmra.mrb[36].mxu1 %vm88_vm3, %v8610_v24 }
 0x550   :  { %2777 = vmatprep.mubr.f32.mxu1 %v14754_v49 }
 0x553   :  { %8623 = vmatmul.mubr.msk.f32.vlgmr.msra.gmra.mrb[30].mxu1 %vm88_vm3, %v8617_v27 }
 0x554   :  { %2783 = vmatprep.mubr.f32.mxu1 %v14754_v49  ;;  %10093 = vmatpush1.bf16.msra.mxu1 %v11548_v35 }
 0x555   :  { %10094 = vmatprep.subr.bf16.mxu1 %v14732_v37 }
 0x557   :  { %8624 = vmatmul.mubr.msk.f32.gmra.mrb[32].mxu1 %vm88_vm3, %v8618_v31  ;;  %v8550_v31 = vld [vmem:[%s14447_s11] ss:$0 sm:$0xff] }
 0x558   :  { %2789 = vmatprep.mubr.f32.mxu1 %v14754_v49  ;;  %10096 = vmatpush1.bf16.msra.mxu1 %v11562_v39 }
 0x559   :  { %10097 = vmatprep.subr.bf16.mxu1 %v14732_v37 }
 0x55b   :  { %8625 = vmatmul.mubr.msk.f32.gmra.mrb[34].mxu1 %vm88_vm3, %v8619_v2 }
 0x55c   :  { %2795 = vmatprep.mubr.f32.mxu1 %v14754_v49  ;;  %10099 = vmatpush1.bf16.msra.mxu1 %v11603_v52 }
 0x55d   :  { %10100 = vmatprep.subr.bf16.mxu1 %v14732_v37 }
 0x55f   :  { %8626 = vmatmul.mubr.msk.f32.gmra.mrb[36].mxu1 %vm88_vm3, %v8620_v33 }
 0x560   :  { %10102 = vmatpush1.bf16.msra.mxu1 %v11628_v59 }
 0x561   :  { %10103 = vmatprep.subr.bf16.mxu1 %v14732_v37 }
 0x564   :  { %10105 = vmatpush1.bf16.msra.mxu1 %v11647_v63 }
 0x565   :  { %10106 = vmatprep.subr.bf16.mxu1 %v14732_v37 }
 0x568   :  { %10108 = vmatpush1.bf16.msra.mxu1 %v11671_v10 }
 0x569   :  { %10109 = vmatprep.subr.bf16.mxu1 %v14732_v37 }
 0x56c   :  { %10111 = vmatpush1.bf16.msra.mxu1 %v11699_v25 }
 0x56d   :  { %10112 = vmatprep.subr.bf16.mxu1 %v14732_v37 }
 0x570   :  { %10114 = vmatpush1.bf16.msra.mxu1 %v11720_v32 }
 0x571   :  { %10115 = vmatprep.subr.bf16.mxu1 %v14732_v37 }
 0x574   :  { %10117 = vmatpush1.bf16.msra.mxu1 %v11846_v21  ;;  %v8551_v21 = vld [vmem:[%s14448_s12] ss:$0 sm:$0xff] }
 0x575   :  { %2874 = vmatprep.subr.mxu1 %v14754_v49 }
 0x578   :  { %8627 = vmatpush1.msk.msra.mxu1 %vm620_vm4, %v11253_v55  ;;  %v2027_v55 = vld [vmem:[%s14449_s13] sm:$0xff] }
 0x579   :  { %10145 = vmatprep.subr.bf16.mxu1 %v14732_v37 }
 0x608   :  { %v1931_v50 = vpop.f32.mrb[20].mxu0 }
 0x609   :  { %v9183_v24 = vpop.f32.mrb[21].mxu0 }
 0x60a   :  { %v2028_v24 = vld [vmem:[%s14449_s13 + $0x8] sm:$0xff] }
 0x60b   :  { %v12829_v10 = vpack.c.bf16 %v2028_v24, %v2027_v55  ;;  %v2033_v55 = vld [vmem:[%s14449_s13 + $0x30] sm:$0xff]  ;;  %v2034_v24 = vld [vmem:[%s14449_s13 + $0x38] sm:$0xff] }
 0x60c   :  { %v2006_v27 = vpop.f32.mrb[22].mxu0 }
 0x60d   :  { %v2010_v2 = vmax.f32 %v1931_v50, %v2006_v27  ;;  %v9190_v33 = vpop.f32.mrb[23].mxu0  ;;  %14788 = vst [vmem:[#allocation87_spill] sm:$0xff] %v12829_v10  ;;  %v2029_v27 = vld [vmem:[%s14449_s13 + $0x10] sm:$0xff] }
 0x60f   :  { %v2018_v32 = vmul.f32 %v8550_v31, %v2010_v2  ;;  %v2030_v31 = vld [vmem:[%s14449_s13 + $0x18] sm:$0xff] }
 0x610   :  { %v12840_v2 = vpack.c.bf16 %v2030_v31, %v2029_v27  ;;  %v8565_v27 = vld [vmem:[%s14449_s13 + $0x90] sm:$0xff]  ;;  %v8566_v31 = vld [vmem:[%s14449_s13 + $0x98] sm:$0xff] }
 0x611   :  { %v12827_v25 = vadd.f32 %v8551_v21, %v2018_v32  ;;  %v2031_v32 = vld [vmem:[%s14449_s13 + $0x20] sm:$0xff]  ;;  %v2032_v21 = vld [vmem:[%s14449_s13 + $0x28] sm:$0xff] }
 0x612   :  { %14789 = vst [vmem:[#allocation88_spill] sm:$0xff] %v12840_v2  ;;  %v12852_v33 = vpack.c.bf16 %v2032_v21, %v2031_v32  ;;  %v12876_v32 = vld [vmem:[%s14449_s13 + $0x40] sm:$0xf]  ;;  %v12878_v21 = vpack.c.bf16 %v8566_v31, %v8565_v27  ;;  %v8569_v31 = vld [vmem:[%s14449_s13 + $0xb0] sm:$0xff] }
 0x613   :  { %v2047_v50 = vrot.slane %v12827_v25, 1  ;;  %14792 = vst [vmem:[#allocation91_spill] sm:$0xff] %v12876_v32 }
 0x614   :  { %14790 = vst [vmem:[#allocation89_spill] sm:$0xff] %v12852_v33  ;;  %14793 = vst [vmem:[#allocation92_spill] sm:$0xff] %v12878_v21 }
 0x615   :  { %9210 = vmatmul.mubr.msk.f32.vlgmr.msra.gmra.mrb[24].mxu0 %vm2048_vm14, %v2047_v50  ;;  %v12862_v50 = vpack.c.bf16 %v2034_v24, %v2033_v55  ;;  %v8567_v55 = vld [vmem:[%s14449_s13 + $0xa0] sm:$0xff]  ;;  %v8568_v24 = vld [vmem:[%s14449_s13 + $0xa8] sm:$0xff] }
 0x616   :  { %10017 = vmatpush3.bf16.msra.mxu0 %v12829_v10  ;;  %9230 = vmatprep.mubr.msk.f32.mxu0 %vm11330_vm12, %v14754_v49  ;;  %v12892_v27 = vpack.c.bf16 %v8568_v24, %v8567_v55  ;;  %v8571_v55 = vld [vmem:[%s14449_s13 + $0xc0] sm:$0xff]  ;;  %v8572_v24 = vld [vmem:[%s14449_s13 + $0xc8] sm:$0xff] }
 0x617   :  { %10018 = vmatprep.subr.bf16.mxu0 %v14732_v37  ;;  %14791 = vst [vmem:[#allocation90_spill] sm:$0xff] %v12862_v50 }
 0x618   :  { %14794 = vst [vmem:[#allocation93_spill] sm:$0xff] %v12892_v27 }
 0x61a   :  { %10020 = vmatpush3.bf16.msra.mxu0 %v12840_v2 }
 0x61b   :  { %10021 = vmatprep.subr.bf16.mxu0 %v14732_v37 }
 0x61e   :  { %10023 = vmatpush3.bf16.msra.mxu0 %v12852_v33  ;;  %v8579_v33 = vld [vmem:[%s14449_s13 + $0xf0] sm:$0xff] }
 0x61f   :  { %10024 = vmatprep.subr.bf16.mxu0 %v14732_v37 }
 0x622   :  { %10026 = vmatpush3.bf16.msra.mxu0 %v12862_v50 }
 0x623   :  { %9228 = vmatprep.subr.mxu0 %v14754_v49 }
 0x626   :  { %9229 = vmatpush3.msk.msra.mxu0 %vm101_vm0, %v12876_v32  ;;  %v8570_v32 = vld [vmem:[%s14449_s13 + $0xb8] sm:$0xff] }
 0x627   :  { %9231 = vmatmul.mubr.msk.f32.vlgmr.msra.gmra.mrb[24].mxu0 %vm2048_vm14, %v12827_v25  ;;  %10027 = vmatprep.subr.bf16.mxu0 %v14732_v37  ;;  %v12904_v50 = vpack.c.bf16 %v8570_v32, %v8569_v31  ;;  %v8576_v32 = vld [vmem:[%s14449_s13 + $0xd8] sm:$0xff]  ;;  %v8577_v31 = vld [vmem:[%s14449_s13 + $0xe0] sm:$0xff] }
 0x628   :  { %10029 = vmatpush3.bf16.msra.mxu0 %v12878_v21  ;;  %9251 = vmatprep.mubr.msk.f32.mxu0 %vm11330_vm12, %v14754_v49  ;;  %v12914_v21 = vpack.c.bf16 %v8572_v24, %v8571_v55  ;;  %v12930_v55 = vpack.c.bf16 %v8577_v31, %v8576_v32  ;;  %v2209_v24 = vrot.slane %v12827_v25, 2  ;;  %v8580_v31 = vld [vmem:[%s14449_s13 + $0xf8] sm:$0xff] }
 0x629   :  { %10030 = vmatprep.subr.bf16.mxu0 %v14732_v37  ;;  %14795 = vst [vmem:[#allocation94_spill] sm:$0xff] %v12904_v50 }
 0x62a   :  { %14796 = vst [vmem:[#allocation95_spill] sm:$0xff] %v12914_v21  ;;  %14798 = vst [vmem:[#allocation97_spill] sm:$0xff] %v12930_v55 }
 0x62c   :  { %10032 = vmatpush3.bf16.msra.mxu0 %v12892_v27  ;;  %v8578_v27 = vld [vmem:[%s14449_s13 + $0xe8] sm:$0xff] }
 0x62d   :  { %10033 = vmatprep.subr.bf16.mxu0 %v14732_v37  ;;  %v12944_v32 = vpack.c.bf16 %v8579_v33, %v8578_v27  ;;  %v8582_v33 = vld [vmem:[%s14449_s13 + $0x108] sm:$0xff]  ;;  %v8583_v27 = vld [vmem:[%s14449_s13 + $0x110] sm:$0xff] }
 0x62f   :  { %14799 = vst [vmem:[#allocation98_spill] sm:$0xff] %v12944_v32 }
 0x630   :  { %10035 = vmatpush3.bf16.msra.mxu0 %v12904_v50  ;;  %v12928_v50 = vld [vmem:[%s14449_s13 + $0xd0] sm:$0xf] }
 0x631   :  { %10036 = vmatprep.subr.bf16.mxu0 %v14732_v37  ;;  %14797 = vst [vmem:[#allocation96_spill] sm:$0xff] %v12928_v50 }
 0x634   :  { %10038 = vmatpush3.bf16.msra.mxu0 %v12914_v21 }
 0x635   :  { %9249 = vmatprep.subr.mxu0 %v14754_v49 }
 0x638   :  { %9250 = vmatpush3.msk.msra.mxu0 %vm101_vm0, %v12928_v50  ;;  %v8581_v50 = vld [vmem:[%s14449_s13 + $0x100] sm:$0xff] }
 0x639   :  { %9252 = vmatmul.mubr.msk.f32.vlgmr.msra.gmra.mrb[24].mxu0 %vm2048_vm14, %v2209_v24  ;;  %10039 = vmatprep.subr.bf16.mxu0 %v14732_v37  ;;  %v12956_v24 = vpack.c.bf16 %v8581_v50, %v8580_v31  ;;  %v12974_v50 = vld [vmem:[%s14449_s13 + $0x118] sm:$0xf]  ;;  %v2296_v31 = vrot.slane %v12827_v25, 3  ;;  %v8591_v25 = vld [vmem:[%s14694_s21 + $0x21] sm:$0xff] }
 0x63a   :  { %10041 = vmatpush3.bf16.msra.mxu0 %v12930_v55  ;;  %9272 = vmatprep.mubr.msk.f32.mxu0 %vm11330_vm12, %v14754_v49  ;;  %v12966_v55 = vpack.c.bf16 %v8583_v27, %v8582_v33  ;;  %14802 = vst [vmem:[#allocation101_spill] sm:$0xff] %v12974_v50  ;;  %v8592_v33 = vld [vmem:[%s14694_s21 + $0x29] sm:$0xff]  ;;  %v8593_v27 = vld [vmem:[%s14694_s21 + $0x31] sm:$0xff] }
 0x63b   :  { %10042 = vmatprep.subr.bf16.mxu0 %v14732_v37  ;;  %14800 = vst [vmem:[#allocation99_spill] sm:$0xff] %v12956_v24 }
 0x63c   :  { %14801 = vst [vmem:[#allocation100_spill] sm:$0xff] %v12966_v55 }
 0x63e   :  { %10044 = vmatpush3.bf16.msra.mxu0 %v12944_v32 }
 0x63f   :  { %10045 = vmatprep.subr.bf16.mxu0 %v14732_v37 }
 0x642   :  { %10047 = vmatpush3.bf16.msra.mxu0 %v12956_v24 }
 0x643   :  { %10048 = vmatprep.subr.bf16.mxu0 %v14732_v37 }
 0x646   :  { %10050 = vmatpush3.bf16.msra.mxu0 %v12966_v55 }
 0x647   :  { %9270 = vmatprep.subr.mxu0 %v14754_v49 }
 0x64a   :  { %9271 = vmatpush3.msk.msra.mxu0 %vm101_vm0, %v12974_v50 }
 0x64b   :  { %9273 = vmatmul.mubr.msk.f32.vlgmr.msra.gmra.mrb[24].mxu0 %vm2048_vm14, %v2296_v31  ;;  %10052 = vmatprep.subr.bf16.mxu0 %v11441_v3  ;;  %v8594_v31 = vld [vmem:[%s14694_s21 + $0x39] sm:$0x1] }
 0x64c   :  { %10054 = vmatpush1.bf16.msra.mxu0 %v11452_v7  ;;  %2458 = vmatprep.mubr.f32.mxu0 %v14754_v49 }
 0x64d   :  { %10057 = vmatprep.subr.msk.bf16.mxu0 %vm11458_vm2, %v11454_v8 }
 0x650   :  { %10060 = vmatpush1.bf16.msk.msra.mxu0 %vm11458_vm2, %v11472_v14 }
 0x651   :  { %10118 = vmatprep.subr.bf16.mxu0 %v14732_v37 }
 0x653   :  { %8597 = vmatmul.mubr.msk.f32.vlgmr.msra.gmra.mrb[26].mxu0 %vm88_vm3, %v8591_v25  ;;  %v13030_v25 = vld [vmem:[%s14698_s22 + $0x128] sm:$0x3f] }
 0x654   :  { %2464 = vmatprep.mubr.f32.mxu0 %v14754_v49  ;;  %10120 = vmatpush1.bf16.msra.mxu0 %v11892_v62  ;;  %14803 = vst [vmem:[#allocation102_spill] sm:$0xff] %v13030_v25 }
 0x655   :  { %10121 = vmatprep.subr.bf16.mxu0 %v14732_v37 }
 0x657   :  { %8598 = vmatmul.mubr.msk.f32.gmra.mrb[28].mxu0 %vm88_vm3, %v8592_v33  ;;  %v2779_v33 = vpop.f32.mrb[30].mxu1 }
 0x658   :  { %2470 = vmatprep.mubr.f32.mxu0 %v14754_v49  ;;  %10123 = vmatpush1.bf16.msra.mxu0 %v11911_v26 }
 0x659   :  { %10124 = vmatprep.subr.bf16.mxu0 %v14732_v37 }
 0x65b   :  { %8599 = vmatmul.mubr.msk.f32.gmra.mrb[30].mxu0 %vm88_vm3, %v8593_v27  ;;  %v2781_v27 = vpop.f32.mrb[31].mxu1 }
 0x65c   :  { %2476 = vmatprep.mubr.f32.mxu0 %v14754_v49  ;;  %10126 = vmatpush1.bf16.msra.mxu0 %v11931_v53 }
 0x65d   :  { %10127 = vmatprep.subr.bf16.mxu0 %v14732_v37 }
 0x65f   :  { %8600 = vmatmul.mubr.msk.f32.gmra.mrb[32].mxu0 %vm88_vm3, %v8594_v31  ;;  %v2785_v31 = vpop.f32.mrb[32].mxu1 }
 0x660   :  { %10129 = vmatpush1.bf16.msra.mxu0 %v11945_v22 }
 0x661   :  { %10130 = vmatprep.subr.bf16.mxu0 %v14732_v37 }
 0x664   :  { %10132 = vmatpush1.bf16.msra.mxu0 %v11958_v45 }
 0x665   :  { %10133 = vmatprep.subr.bf16.mxu0 %v14732_v37 }
 0x668   :  { %10135 = vmatpush1.bf16.msra.mxu0 %v11969_v60 }
 0x669   :  { %10136 = vmatprep.subr.bf16.mxu0 %v14732_v37 }
 0x66c   :  { %10138 = vmatpush1.bf16.msra.mxu0 %v11979_v4  ;;  %v2787_v4 = vpop.f32.mrb[33].mxu1 }
 0x66d   :  { %10139 = vmatprep.subr.bf16.mxu0 %v14732_v37  ;;  %v2791_v60 = vpop.f32.mrb[34].mxu1 }
 0x670   :  { %10141 = vmatpush1.bf16.msra.mxu0 %v11989_v34  ;;  %v2793_v34 = vpop.f32.mrb[35].mxu1 }
 0x671   :  { %10142 = vmatprep.subr.bf16.mxu0 %v14732_v37  ;;  %v2797_v45 = vpop.f32.mrb[36].mxu1 }
 0x672   :  { %v2799_v22 = vpop.f32.mrb[37].mxu1 }
 0x674   :  { %10144 = vmatpush1.bf16.msra.mxu0 %v11999_v51 }
 0x675   :  { %2959 = vmatprep.subr.mxu0 %v14754_v49 }
 0x678   :  { %8632 = vmatpush1.msk.msra.mxu0 %vm620_vm4, %v13030_v25 }
 0x71e   :  { %v13034_v53 = vpop.f32.mrb[24].mxu0 }
 0x71f   :  { %14804 = vst [vmem:[#allocation103_spill] sm:$0xff] %v13034_v53  ;;  %v9274_v51 = vpop.f32.mrb[25].mxu0 }
 0x726   :  { %v2460_v26 = vpop.f32.mrb[26].mxu0 }
 0x727   :  { %v11080_v62 = vadd.f32 %v2779_v33, %v2460_v26  ;;  %v2462_v50 = vpop.f32.mrb[27].mxu0 }
 0x728   :  { %v11081_v55 = vadd.f32 %v2781_v27, %v2462_v50  ;;  %v13064_v27 = vld [vmem:[%s14440_s4] sm:$0xff] }
 0x729   :  { %v2810_v24 = vadd.f32 %v11080_v62, %v11878_v42 }
 0x72a   :  { %v2811_v32 = vadd.f32 %v11081_v55, %v11882_v43  ;;  %v2466_v25 = vpop.f32.mrb[28].mxu0 }
 0x72b   :  { %v11082_v21 = vadd.f32 %v2785_v31, %v2466_v25  ;;  %v2468_v2 = vpop.f32.mrb[29].mxu0  ;;  %v2818_v59 = vmax.f32 %v2810_v24, 0.0  ;;  %v14806_v25 = vld [vmem:[#allocation22_spill] sm:$0xff]  ;;  %v14809_v31 = vld [vmem:[#allocation24_spill] sm:$0xff] }
 0x72c   :  { %v2819_v10 = vmax.f32 %v2811_v32, 0.0  ;;  %v11083_v63 = vadd.f32 %v2787_v4, %v2468_v2 }
 0x72d   :  { %v2812_v52 = vadd.f32 %v11082_v21, %v11878_v42  ;;  %v14805_v21 = vld [vmem:[#allocation21_spill] sm:$0xff] }
 0x72e   :  { %v2813_v39 = vadd.f32 %v11083_v63, %v11882_v43  ;;  %v2472_v53 = vpop.f32.mrb[30].mxu0  ;;  %8628 = vmatprep.mubr.msk.f32.mxu1 %vm607_vm5, %v2819_v10  ;;  %8633 = vmatprep.mubr.msk.f32.mxu0 %vm607_vm5, %v2819_v10  ;;  %14808 = vst [vmem:[#allocation21_spill] sm:$0xff] %v13064_v27 }
 0x72f   :  { %v11084_v26 = vadd.f32 %v2791_v60, %v2472_v53  ;;  %v2474_v51 = vpop.f32.mrb[31].mxu0  ;;  %2903 = vmatmul.mubr.f32.vlgmr.msra.gmra.mrb[38].mxu1 %v2818_v59  ;;  %2988 = vmatmul.mubr.f32.vlgmr.msra.gmra.mrb[34].mxu0 %v2818_v59  ;;  %v2820_v32 = vmax.f32 %v2812_v52, 0.0 }
 0x730   :  { %v2821_v62 = vmax.f32 %v2813_v39, 0.0  ;;  %v11085_v55 = vadd.f32 %v2793_v34, %v2474_v51  ;;  %10147 = vmatpush1.bf16.msra.mxu1 %v11750_v40  ;;  %v14811_v51 = vld [vmem:[#allocation26_spill] sm:$0xff] }
 0x731   :  { %v2814_v4 = vadd.f32 %v11084_v26, %v11878_v42  ;;  %10148 = vmatprep.subr.bf16.mxu1 %v14732_v37  ;;  %v14810_v26 = vld [vmem:[#allocation25_spill] sm:$0xff] }
 0x732   :  { %v2815_v63 = vadd.f32 %v11085_v55, %v11882_v43  ;;  %v2478_v2 = vpop.f32.mrb[32].mxu0  ;;  %8629 = vmatprep.mubr.msk.f32.mxu1 %vm607_vm5, %v2821_v62  ;;  %8634 = vmatprep.mubr.msk.f32.mxu0 %vm607_vm5, %v2821_v62  ;;  %v14813_v55 = vld [vmem:[#allocation29_spill] sm:$0xff] }
 0x733   :  { %v11086_v53 = vadd.f32 %v2797_v45, %v2478_v2  ;;  %v2480_v60 = vpop.f32.mrb[33].mxu0  ;;  %2908 = vmatmul.mubr.f32.gmra.mrb[40].mxu1 %v2820_v32  ;;  %2993 = vmatmul.mubr.f32.gmra.mrb[36].mxu0 %v2820_v32  ;;  %v2822_v52 = vmax.f32 %v2814_v4, 0.0  ;;  %v13081_v4 = vld [vmem:[%s14698_s22 + $0x1c0] sm:$0x3f] }
 0x734   :  { %v2823_v39 = vmax.f32 %v2815_v63, 0.0  ;;  %v11087_v34 = vadd.f32 %v2799_v22, %v2480_v60  ;;  %10150 = vmatpush1.bf16.msra.mxu1 %v14805_v21  ;;  %v14807_v22 = vld [vmem:[#allocation23_spill] sm:$0xff]  ;;  %14814 = vst [vmem:[#allocation22_spill] sm:$0xff] %v13081_v4  ;;  %v14819_v2 = vld [vmem:[#allocation56_spill] sm:$0xff] }
 0x735   :  { %v2816_v24 = vadd.f32 %v11086_v53, %v11878_v42  ;;  %10151 = vmatprep.subr.bf16.mxu1 %v14732_v37  ;;  %v14818_v63 = vld [vmem:[#allocation55_spill] sm:$0xff] }
 0x736   :  { %v2817_v50 = vadd.f32 %v11087_v34, %v11882_v43  ;;  %8630 = vmatprep.mubr.msk.f32.mxu1 %vm607_vm5, %v2823_v39  ;;  %8635 = vmatprep.mubr.msk.f32.mxu0 %vm607_vm5, %v2823_v39 }
 0x737   :  { %2913 = vmatmul.mubr.f32.gmra.mrb[42].mxu1 %v2822_v52  ;;  %2998 = vmatmul.mubr.f32.gmra.mrb[38].mxu0 %v2822_v52  ;;  %v2824_v33 = vmax.f32 %v2816_v24, 0.0 }
 0x738   :  { %v2825_v45 = vmax.f32 %v2817_v50, 0.0  ;;  %10153 = vmatpush1.bf16.msra.mxu1 %v14806_v25 }
 0x739   :  { %10154 = vmatprep.subr.bf16.mxu1 %v14732_v37 }
 0x73a   :  { %8631 = vmatprep.mubr.msk.f32.mxu1 %vm607_vm5, %v2825_v45  ;;  %8636 = vmatprep.mubr.msk.f32.mxu0 %vm607_vm5, %v2825_v45 }
 0x73b   :  { %2918 = vmatmul.mubr.f32.gmra.mrb[44].mxu1 %v2824_v33  ;;  %3003 = vmatmul.mubr.f32.gmra.mrb[40].mxu0 %v2824_v33 }
 0x73c   :  { %10156 = vmatpush1.bf16.msra.mxu1 %v14807_v22  ;;  %8638 = vmatprep.mubr.msk.f32.mxu1 %vm607_vm5, %v2819_v10  ;;  %v14812_v10 = vld [vmem:[#allocation27_spill] sm:$0xff] }
 0x73d   :  { %10157 = vmatprep.subr.bf16.mxu1 %v14732_v37  ;;  %9283 = vmatprep.mubr.msk.f32.mxu0 %vm935_vm6, %v13064_v27 }
 0x740   :  { %10159 = vmatpush1.bf16.msra.mxu1 %v14809_v31 }
 0x741   :  { %10160 = vmatprep.subr.bf16.mxu1 %v14732_v37 }
 0x744   :  { %10162 = vmatpush1.bf16.msra.mxu1 %v14810_v26 }
 0x745   :  { %10163 = vmatprep.subr.bf16.mxu1 %v14732_v37 }
 0x748   :  { %10165 = vmatpush1.bf16.msra.mxu1 %v14811_v51 }
 0x749   :  { %10166 = vmatprep.subr.bf16.mxu1 %v14732_v37 }
 0x74c   :  { %10168 = vmatpush1.bf16.msra.mxu1 %v14812_v10 }
 0x74d   :  { %10169 = vmatprep.subr.bf16.mxu1 %v14732_v37 }
 0x750   :  { %10171 = vmatpush1.bf16.msra.mxu1 %v14813_v55 }
 0x751   :  { %3048 = vmatprep.subr.mxu1 %v14754_v49 }
 0x754   :  { %8637 = vmatpush1.msk.msra.mxu1 %vm620_vm4, %v13081_v4 }
 0x755   :  { %3077 = vmatmul.mubr.f32.vlgmr.msra.gmra.mrb[46].mxu1 %v2818_v59  ;;  %10266 = vmatprep.subr.bf16.mxu1 %v14732_v37  ;;  %v14815_v59 = vld [vmem:[#allocation52_spill] sm:$0xff] }
 0x756   :  { %8639 = vmatprep.mubr.msk.f32.mxu1 %vm607_vm5, %v2821_v62  ;;  %10268 = vmatpush1.bf16.msra.mxu1 %v12153_v41  ;;  %v14816_v62 = vld [vmem:[#allocation53_spill] sm:$0xff] }
 0x757   :  { %10269 = vmatprep.subr.bf16.mxu1 %v14732_v37 }
 0x759   :  { %3082 = vmatmul.mubr.f32.gmra.mrb[48].mxu1 %v2820_v32  ;;  %v14817_v32 = vld [vmem:[#allocation54_spill] sm:$0xff] }
 0x75a   :  { %8640 = vmatprep.mubr.msk.f32.mxu1 %vm607_vm5, %v2823_v39  ;;  %10271 = vmatpush1.bf16.msra.mxu1 %v12159_v13 }
 0x75b   :  { %10272 = vmatprep.subr.bf16.mxu1 %v14732_v37 }
 0x75d   :  { %3087 = vmatmul.mubr.f32.gmra.mrb[50].mxu1 %v2822_v52 }
 0x75e   :  { %8641 = vmatprep.mubr.msk.f32.mxu1 %vm607_vm5, %v2825_v45  ;;  %10274 = vmatpush1.bf16.msra.mxu1 %v12169_v15 }
 0x75f   :  { %10275 = vmatprep.subr.bf16.mxu1 %v14732_v37 }
 0x761   :  { %3092 = vmatmul.mubr.f32.gmra.mrb[52].mxu1 %v2824_v33 }
 0x762   :  { %10277 = vmatpush1.bf16.msra.mxu1 %v12179_v18 }
 0x763   :  { %10278 = vmatprep.subr.bf16.mxu1 %v14732_v37 }
 0x766   :  { %10280 = vmatpush1.bf16.msra.mxu1 %v14815_v59 }
 0x767   :  { %10281 = vmatprep.subr.bf16.mxu1 %v14732_v37 }
 0x76a   :  { %10283 = vmatpush1.bf16.msra.mxu1 %v14816_v62 }
 0x76b   :  { %10284 = vmatprep.subr.bf16.mxu1 %v14732_v37 }
 0x76e   :  { %10286 = vmatpush1.bf16.msra.mxu1 %v14817_v32 }
 0x76f   :  { %10287 = vmatprep.subr.bf16.mxu1 %v14732_v37 }
 0x772   :  { %10289 = vmatpush1.bf16.msra.mxu1 %v14818_v63 }
 0x773   :  { %10290 = vmatprep.subr.bf16.mxu1 %v14732_v37 }
 0x776   :  { %10292 = vmatpush1.bf16.msra.mxu1 %v14819_v2 }
 0x777   :  { %10293 = vmatprep.subr.bf16.mxu1 %v14732_v37 }
 0x77a   :  { %10296 = vmatpush1.bf16.msk.msra.mxu1 %vm12020_vm8, %v12510_v46 }
 0x77b   :  { %10297 = vmatprep.subr.bf16.mxu1 %v14732_v37 }
 0x802   :  { %v2904_v53 = vpop.f32.mrb[38].mxu1  ;;  %v2989_v60 = vpop.f32.mrb[34].mxu0 }
 0x803   :  { %v3008_v39 = vmax.f32 %v2904_v53, %v2989_v60  ;;  %v2906_v34 = vpop.f32.mrb[39].mxu1  ;;  %v2991_v52 = vpop.f32.mrb[35].mxu0 }
 0x806   :  { %v2909_v24 = vpop.f32.mrb[40].mxu1  ;;  %v2994_v50 = vpop.f32.mrb[36].mxu0 }
 0x807   :  { %v3009_v45 = vmax.f32 %v2909_v24, %v2994_v50  ;;  %v2911_v33 = vpop.f32.mrb[41].mxu1  ;;  %v2996_v63 = vpop.f32.mrb[37].mxu0 }
 0x808   :  { %v14831_v33 = vld [vmem:[#allocation45_spill] sm:$0xff] }
 0x80a   :  { %v2914_v32 = vpop.f32.mrb[42].mxu1  ;;  %v2999_v2 = vpop.f32.mrb[38].mxu0 }
 0x80b   :  { %v3010_v62 = vmax.f32 %v2914_v32, %v2999_v2  ;;  %v2916_v59 = vpop.f32.mrb[43].mxu1  ;;  %v3001_v18 = vpop.f32.mrb[39].mxu0 }
 0x80e   :  { %v2919_v15 = vpop.f32.mrb[44].mxu1  ;;  %v3004_v13 = vpop.f32.mrb[40].mxu0 }
 0x80f   :  { %v3011_v46 = vmax.f32 %v2919_v15, %v3004_v13  ;;  %v2921_v41 = vpop.f32.mrb[45].mxu1  ;;  %v3006_v27 = vpop.f32.mrb[41].mxu0  ;;  %v13125_v13 = vld [vmem:[%s14440_s4 + $0x10] sm:$0xff]  ;;  %v13136_v15 = vld [vmem:[%s14440_s4 + $0x18] sm:$0xf] }
 0x810   :  { %v13118_v41 = vld [vmem:[%s14440_s4 + $0x8] sm:$0xf]  ;;  %14821 = vst [vmem:[#allocation24_spill] sm:$0xff] %v13125_v13  ;;  %14822 = vst [vmem:[#allocation104_spill] sm:$0xff] %v13136_v15  ;;  %v14824_v27 = vld [vmem:[#allocation39_spill] sm:$0xff] }
 0x811   :  { %14820 = vst [vmem:[#allocation23_spill] sm:$0xff] %v13118_v41 }
 0x828   :  { %v3078_v4 = vpop.f32.mrb[46].mxu1 }
 0x829   :  { %v3097_v55 = vmax.f32 %v3008_v39, %v3078_v4  ;;  %v3080_v53 = vpop.f32.mrb[47].mxu1  ;;  %v14827_v4 = vld [vmem:[#allocation41_spill] sm:$0xff]  ;;  %v14829_v39 = vld [vmem:[#allocation43_spill] sm:$0xff] }
 0x82a   :  { %v14832_v53 = vld [vmem:[#allocation46_spill] sm:$0xff] }
 0x82c   :  { %v3083_v60 = vpop.f32.mrb[48].mxu1 }
 0x82d   :  { %v3098_v34 = vmax.f32 %v3009_v45, %v3083_v60  ;;  %v3085_v52 = vpop.f32.mrb[49].mxu1  ;;  %v14830_v45 = vld [vmem:[#allocation44_spill] sm:$0xff] }
 0x82e   :  { %v13170_v60 = vld [vmem:[%s14443_s7 + $0x118] sm:$0xff] }
 0x82f   :  { %v10172_v10 = vpack.c.bf16 %v3098_v34, %v3097_v55  ;;  %v14826_v55 = vld [vmem:[#allocation40_spill] sm:$0xff]  ;;  %14833 = vst [vmem:[#allocation107_spill] sm:$0xff] %v13170_v60  ;;  %v13176_v34 = vld [vmem:[%s14443_s7 + $0x110] sm:$0xff] }
 0x830   :  { %v3088_v24 = vpop.f32.mrb[50].mxu1  ;;  %14834 = vst [vmem:[#allocation108_spill] sm:$0xff] %v13176_v34  ;;  %v14835_v52 = vld [vmem:[#allocation47_spill] sm:$0xff] }
 0x831   :  { %v3099_v50 = vmax.f32 %v3010_v62, %v3088_v24  ;;  %v3090_v63 = vpop.f32.mrb[51].mxu1  ;;  %10173 = vmatprep.subr.bf16.mxu0 %v10172_v10  ;;  %v14828_v62 = vld [vmem:[#allocation42_spill] sm:$0xff] }
 0x832   :  { %10175 = vmatpush3.bf16.msra.mxu0 %v10172_v10 }
 0x834   :  { %v3093_v32 = vpop.f32.mrb[52].mxu1 }
 0x835   :  { %v3100_v59 = vmax.f32 %v3011_v46, %v3093_v32  ;;  %v3095_v18 = vpop.f32.mrb[53].mxu1  ;;  %v13143_v46 = vld [vmem:[%s14440_s4 + $0x20] sm:$0xff] }
 0x836   :  { %14823 = vst [vmem:[#allocation105_spill] sm:$0xff] %v13143_v46 }
 0x837   :  { %v10176_v2 = vpack.c.bf16 %v3100_v59, %v3099_v50 }
 0x839   :  { %10178 = vmatprep.subr.msk.bf16.mxu0 %vm12020_vm8, %v10176_v2 }
 0x83a   :  { %10181 = vmatpush3.bf16.msk.msra.mxu0 %vm12020_vm8, %v10176_v2 }
 0x83b   :  { %10183 = vmatprep.subr.bf16.mxu0 %v10172_v10 }
 0x83d   :  { %9284 = vmatmul.mubr.msk.f32.vlgmr.msra.gmra.mrb[42].mxu0 %vm935_vm6, %v13118_v41 }
 0x83e   :  { %10185 = vmatpush3.bf16.msra.mxu0 %v10172_v10  ;;  %9294 = vmatprep.mubr.msk.f32.mxu0 %vm935_vm6, %v13125_v13  ;;  %v13183_v13 = vld [vmem:[%s14441_s5] ss:$0 sm:$0xff] }
 0x83f   :  { %10188 = vmatprep.subr.msk.bf16.mxu0 %vm12020_vm8, %v10176_v2 }
 0x842   :  { %10191 = vmatpush3.bf16.msk.msra.mxu0 %vm12020_vm8, %v10176_v2 }
 0x843   :  { %10193 = vmatprep.subr.bf16.mxu0 %v10172_v10 }
 0x845   :  { %9295 = vmatmul.mubr.msk.f32.vlgmr.msra.gmra.mrb[44].mxu0 %vm935_vm6, %v13136_v15 }
 0x846   :  { %10195 = vmatpush3.bf16.msra.mxu0 %v10172_v10  ;;  %9305 = vmatprep.mubr.msk.f32.mxu0 %vm935_vm6, %v13143_v46  ;;  %v13155_v10 = vld [vmem:[%s14440_s4 + $0x28] sm:$0xf] }
 0x847   :  { %10198 = vmatprep.subr.msk.bf16.mxu0 %vm12020_vm8, %v10176_v2  ;;  %14825 = vst [vmem:[#allocation106_spill] sm:$0xff] %v13155_v10 }
 0x84a   :  { %10201 = vmatpush3.bf16.msk.msra.mxu0 %vm12020_vm8, %v10176_v2 }
 0x84b   :  { %10203 = vmatprep.subr.bf16.mxu0 %v14824_v27 }
 0x84d   :  { %9306 = vmatmul.mubr.msk.f32.vlgmr.msra.gmra.mrb[46].mxu0 %vm935_vm6, %v13155_v10 }
 0x84e   :  { %10205 = vmatpush1.bf16.msra.mxu0 %v14826_v55  ;;  %3410 = vmatprep.mubr.f32.mxu0 %v14754_v49 }
 0x84f   :  { %10207 = vmatprep.subr.bf16.mxu0 %v14827_v4 }
 0x852   :  { %10209 = vmatpush1.bf16.msra.mxu0 %v14828_v62 }
 0x853   :  { %10211 = vmatprep.subr.bf16.mxu0 %v14829_v39 }
 0x856   :  { %10213 = vmatpush1.bf16.msra.mxu0 %v14830_v45 }
 0x857   :  { %10215 = vmatprep.subr.bf16.mxu0 %v14831_v33 }
 0x85a   :  { %10217 = vmatpush1.bf16.msra.mxu0 %v14832_v53 }
 0x85b   :  { %3362 = vmatprep.subr.mxu0 %v13170_v60 }
 0x85e   :  { %3363 = vmatpush1.msra.mxu0 %v13176_v34 }
 0x85f   :  { %10219 = vmatprep.subr.bf16.mxu0 %v14835_v52  ;;  %v13190_v52 = vld [vmem:[%s14442_s6] ss:$0 sm:$0xff] }
 0x860   :  { %14836 = vst [vmem:[#allocation109_spill] sm:$0xff] %v13190_v52 }
 0x910   :  { %v9285_v24 = vpop.f32.mrb[42].mxu0 }
 0x911   :  { %v3170_v50 = vpop.f32.mrb[43].mxu0 }
 0x918   :  { %v9296_v63 = vpop.f32.mrb[44].mxu0 }
 0x919   :  { %v3255_v32 = vmax.f32 %v9285_v24, %v9296_v63  ;;  %v3245_v59 = vpop.f32.mrb[45].mxu0 }
 0x91a   :  { %v3254_v18 = vmax.f32 %v3170_v50, %v3245_v59 }
 0x920   :  { %v9307_v2 = vpop.f32.mrb[46].mxu0 }
 0x921   :  { %v3332_v10 = vmax.f32 %v3255_v32, %v9307_v2  ;;  %v3322_v46 = vpop.f32.mrb[47].mxu0 }
 0x922   :  { %v3331_v15 = vmax.f32 %v3254_v18, %v3322_v46 }
 0x923   :  { %v3334_v41 = vmul.f32 %v13183_v13, %v3332_v10 }
 0x924   :  { %v3333_v34 = vmul.f32 %v13183_v13, %v3331_v15 }
 0x925   :  { %v3336_v24 = vadd.f32 %v13190_v52, %v3334_v41  ;;  %v14837_v41 = vld [vmem:[#allocation57_spill] sm:$0xff] }
 0x926   :  { %v3335_v50 = vadd.f32 %v13190_v52, %v3333_v34  ;;  %v14838_v34 = vld [vmem:[#allocation58_spill] sm:$0xff]  ;;  %v14839_v52 = vld [vmem:[#allocation59_spill] sm:$0xff] }
 0x927   :  { %v3505_v63 = vrot.slane %v3336_v24, 2  ;;  %v3593_v46 = vrot.slane %v3336_v24, 3  ;;  %v3340_v32 = vrot.slane %v3336_v24, 1 }
 0x928   :  { %v3504_v59 = vrot.slane %v3335_v50, 2  ;;  %v3592_v18 = vrot.slane %v3335_v50, 3  ;;  %v3339_v2 = vrot.slane %v3335_v50, 1 }
 0x92a   :  { %v3341_v60 = vsel %vm1250_vm9, %v3339_v2, %v3340_v32  ;;  %v3506_v10 = vsel %vm620_vm4, %v3504_v59, %v3505_v63  ;;  %v3594_v15 = vsel %vm1543_vm10, %v3592_v18, %v3593_v46  ;;  %v14840_v2 = vld [vmem:[#allocation60_spill] sm:$0xff]  ;;  %v14841_v59 = vld [vmem:[#allocation61_spill] sm:$0xff]  ;;  %v14842_v18 = vld [vmem:[#allocation62_spill] sm:$0xff] }
 0x92b   :  { %8651 = vmatmul.mubr.msk.f32.vlgmr.msra.gmra.mrb[48].mxu0 %vm1254_vm11, %v3341_v60  ;;  %v13211_v60 = vld [vmem:[%s14443_s7 + $0x88] sm:$0xff] }
 0x92c   :  { %10221 = vmatpush1.bf16.msra.mxu0 %v12248_v1  ;;  %3416 = vmatprep.mubr.f32.mxu0 %v14754_v49  ;;  %14843 = vst [vmem:[#allocation57_spill] sm:$0xff] %v13211_v60 }
 0x92d   :  { %10223 = vmatprep.subr.bf16.mxu0 %v14837_v41 }
 0x92f   :  { %8652 = vmatmul.mubr.msk.f32.gmra.mrb[50].mxu0 %vm1254_vm11, %v3340_v32  ;;  %v13217_v32 = vld [vmem:[%s14443_s7 + $0x80] sm:$0xff] }
 0x930   :  { %10225 = vmatpush1.bf16.msra.mxu0 %v14838_v34  ;;  %3491 = vmatprep.mubr.f32.mxu0 %v14754_v49  ;;  %14844 = vst [vmem:[#allocation58_spill] sm:$0xff] %v13217_v32 }
 0x931   :  { %10227 = vmatprep.subr.bf16.mxu0 %v14839_v52  ;;  %v14849_v52 = vld [vmem:[#allocation67_spill] sm:$0xff] }
 0x934   :  { %10229 = vmatpush1.bf16.msra.mxu0 %v14840_v2  ;;  %v14848_v2 = vld [vmem:[#allocation66_spill] sm:$0xff] }
 0x935   :  { %10231 = vmatprep.subr.bf16.mxu0 %v14841_v59  ;;  %v14845_v59 = vld [vmem:[#allocation63_spill] sm:$0xff] }
 0x938   :  { %10233 = vmatpush1.bf16.msra.mxu0 %v14842_v18  ;;  %v14846_v18 = vld [vmem:[#allocation64_spill] sm:$0xff] }
 0x939   :  { %3443 = vmatprep.subr.mxu0 %v13211_v60  ;;  %v14847_v60 = vld [vmem:[#allocation65_spill] sm:$0xff] }
 0x93c   :  { %3444 = vmatpush1.msra.mxu0 %v13217_v32  ;;  %v14850_v32 = vld [vmem:[#allocation68_spill] sm:$0xff] }
 0x93d   :  { %8653 = vmatmul.mubr.msk.f32.vlgmr.msra.gmra.mrb[48].mxu0 %vm1254_vm11, %v3335_v50  ;;  %10235 = vmatprep.subr.bf16.mxu0 %v12347_v38  ;;  %v14851_v50 = vld [vmem:[#allocation69_spill] sm:$0xff] }
 0x93e   :  { %10237 = vmatpush1.bf16.msra.mxu0 %v14845_v59  ;;  %3497 = vmatprep.mubr.f32.mxu0 %v14754_v49  ;;  %v13235_v59 = vld [vmem:[%s14443_s7 + $0x1a8] sm:$0xff] }
 0x93f   :  { %10239 = vmatprep.subr.bf16.mxu0 %v14846_v18  ;;  %14852 = vst [vmem:[#allocation110_spill] sm:$0xff] %v13235_v59 }
 0x941   :  { %8654 = vmatmul.mubr.msk.f32.gmra.mrb[50].mxu0 %vm1254_vm11, %v3336_v24  ;;  %v13241_v24 = vld [vmem:[%s14443_s7 + $0x1a0] sm:$0xff] }
 0x942   :  { %10241 = vmatpush1.bf16.msra.mxu0 %v14847_v60  ;;  %3575 = vmatprep.mubr.f32.mxu0 %v14754_v49  ;;  %14853 = vst [vmem:[#allocation111_spill] sm:$0xff] %v13241_v24  ;;  %v14859_v60 = vld [vmem:[#allocation75_spill] sm:$0xff] }
 0x943   :  { %10243 = vmatprep.subr.bf16.mxu0 %v14848_v2  ;;  %v14858_v2 = vld [vmem:[#allocation74_spill] sm:$0xff] }
 0x946   :  { %10245 = vmatpush1.bf16.msra.mxu0 %v14849_v52  ;;  %v14854_v52 = vld [vmem:[#allocation70_spill] sm:$0xff] }
 0x947   :  { %10247 = vmatprep.subr.bf16.mxu0 %v14850_v32  ;;  %v14855_v32 = vld [vmem:[#allocation71_spill] sm:$0xff] }
 0x94a   :  { %10249 = vmatpush1.bf16.msra.mxu0 %v14851_v50  ;;  %v14856_v50 = vld [vmem:[#allocation72_spill] sm:$0xff] }
 0x94b   :  { %3527 = vmatprep.subr.mxu0 %v13235_v59  ;;  %v14857_v59 = vld [vmem:[#allocation73_spill] sm:$0xff] }
 0x94e   :  { %3528 = vmatpush1.msra.mxu0 %v13241_v24  ;;  %v14860_v24 = vld [vmem:[#allocation76_spill] sm:$0xff] }
 0x94f   :  { %8655 = vmatmul.mubr.msk.f32.vlgmr.msra.gmra.mrb[48].mxu0 %vm1254_vm11, %v3506_v10  ;;  %10251 = vmatprep.subr.bf16.mxu0 %v14854_v52  ;;  %v14861_v10 = vld [vmem:[#allocation77_spill] sm:$0xff] }
 0x950   :  { %10253 = vmatpush1.bf16.msra.mxu0 %v14855_v32  ;;  %3581 = vmatprep.mubr.f32.mxu0 %v14754_v49  ;;  %v13259_v32 = vld [vmem:[%s14443_s7 + $0x238] sm:$0xff] }
 0x951   :  { %10255 = vmatprep.subr.bf16.mxu0 %v14856_v50  ;;  %14862 = vst [vmem:[#allocation112_spill] sm:$0xff] %v13259_v32 }
 0x953   :  { %8656 = vmatmul.mubr.msk.f32.gmra.mrb[50].mxu0 %vm1254_vm11, %v3505_v63  ;;  %v13265_v63 = vld [vmem:[%s14443_s7 + $0x230] sm:$0xff] }
 0x954   :  { %10257 = vmatpush1.bf16.msra.mxu0 %v14857_v59  ;;  %3663 = vmatprep.mubr.f32.mxu0 %v14754_v49  ;;  %14863 = vst [vmem:[#allocation113_spill] sm:$0xff] %v13265_v63 }
 0x955   :  { %10259 = vmatprep.subr.bf16.mxu0 %v14858_v2 }
 0x958   :  { %10261 = vmatpush1.bf16.msra.mxu0 %v14859_v60 }
 0x959   :  { %10263 = vmatprep.subr.bf16.mxu0 %v14860_v24 }
 0x95c   :  { %10265 = vmatpush1.bf16.msra.mxu0 %v14861_v10 }
 0x95d   :  { %3615 = vmatprep.subr.mxu0 %v13259_v32 }
 0x960   :  { %3616 = vmatpush1.msra.mxu0 %v13265_v63 }
 0x961   :  { %8657 = vmatmul.mubr.msk.f32.vlgmr.msra.gmra.mrb[48].mxu0 %vm1254_vm11, %v3594_v15  ;;  %10328 = vmatprep.subr.bf16.mxu0 %v14732_v37 }
 0x962   :  { %3669 = vmatprep.mubr.f32.mxu0 %v14754_v49 }
 0x965   :  { %8658 = vmatmul.mubr.msk.f32.gmra.mrb[50].mxu0 %vm1254_vm11, %v3593_v46 }
 0x966   :  { %9312 = vmatprep.mubr.msk.f32.mxu0 %vm11330_vm12, %v14754_v49 }
 0xa34   :  { %v3665_v10 = vpop.f32.mrb[48].mxu0 }
 0xa35   :  { %v3680_v32 = vadd.f32 %v3665_v10, %v12521_v56  ;;  %v3667_v24 = vpop.f32.mrb[49].mxu0 }
 0xa36   :  { %v3681_v60 = vadd.f32 %v3667_v24, %v12525_v0 }
 0xa37   :  { %v3684_v63 = vmax.f32 %v3680_v32, 0.0 }
 0xa38   :  { %v3685_v2 = vmax.f32 %v3681_v60, 0.0  ;;  %v3671_v59 = vpop.f32.mrb[50].mxu0  ;;  %v14866_v60 = vld [vmem:[#allocation81_spill] sm:$0xff] }
 0xa39   :  { %v3682_v15 = vadd.f32 %v3671_v59, %v12521_v56  ;;  %v3673_v50 = vpop.f32.mrb[51].mxu0  ;;  %v14865_v59 = vld [vmem:[#allocation80_spill] sm:$0xff] }
 0xa3a   :  { %v3683_v52 = vadd.f32 %v3673_v50, %v12525_v0  ;;  %8660 = vmatprep.mubr.msk.f32.mxu1 %vm935_vm6, %v3685_v2 }
 0xa3b   :  { %3759 = vmatmul.mubr.f32.vlgmr.msra.gmra.mrb[54].mxu1 %v3684_v63  ;;  %v3686_v18 = vmax.f32 %v3682_v15, 0.0 }
 0xa3c   :  { %v3687_v46 = vmax.f32 %v3683_v52, 0.0  ;;  %10299 = vmatpush1.bf16.msra.mxu1 %v12537_v36  ;;  %v14864_v52 = vld [vmem:[#allocation79_spill] sm:$0xff] }
 0xa3d   :  { %10300 = vmatprep.subr.bf16.mxu1 %v14732_v37 }
 0xa3e   :  { %8661 = vmatprep.mubr.msk.f32.mxu1 %vm935_vm6, %v3687_v46 }
 0xa3f   :  { %3764 = vmatmul.mubr.f32.gmra.mrb[56].mxu1 %v3686_v18 }
 0xa40   :  { %10302 = vmatpush1.bf16.msra.mxu1 %v12550_v44  ;;  %8663 = vmatprep.mubr.msk.f32.mxu1 %vm935_vm6, %v3685_v2  ;;  %v14867_v2 = vld [vmem:[#allocation82_spill] sm:$0xff] }
 0xa41   :  { %10303 = vmatprep.subr.bf16.mxu1 %v14732_v37 }
 0xa44   :  { %10305 = vmatpush1.bf16.msra.mxu1 %v12562_v12 }
 0xa45   :  { %10306 = vmatprep.subr.bf16.mxu1 %v14732_v37 }
 0xa48   :  { %10308 = vmatpush1.bf16.msra.mxu1 %v12572_v6 }
 0xa49   :  { %10309 = vmatprep.subr.bf16.mxu1 %v14732_v37 }
 0xa4c   :  { %10311 = vmatpush1.bf16.msra.mxu1 %v14864_v52 }
 0xa4d   :  { %10312 = vmatprep.subr.bf16.mxu1 %v14732_v37 }
 0xa50   :  { %10314 = vmatpush1.bf16.msra.mxu1 %v14865_v59 }
 0xa51   :  { %10315 = vmatprep.subr.bf16.mxu1 %v14732_v37 }
 0xa54   :  { %10317 = vmatpush1.bf16.msra.mxu1 %v14866_v60 }
 0xa55   :  { %10318 = vmatprep.subr.bf16.mxu1 %v14732_v37 }
 0xa58   :  { %10320 = vmatpush1.bf16.msra.mxu1 %v12612_v11 }
 0xa59   :  { %10321 = vmatprep.subr.bf16.mxu1 %v14732_v37 }
 0xa5c   :  { %10323 = vmatpush1.bf16.msra.mxu1 %v12622_v54 }
 0xa5d   :  { %10324 = vmatprep.subr.bf16.mxu1 %v14732_v37 }
 0xa60   :  { %10327 = vmatpush1.bf16.msk.msra.mxu1 %vm12020_vm8, %v14867_v2 }
 0xa61   :  { %10336 = vmatprep.subr.bf16.mxu1 %v14732_v37 }
 0xa63   :  { %3834 = vmatmul.mubr.f32.vlgmr.msra.gmra.mrb[58].mxu1 %v3684_v63 }
 0xa64   :  { %8664 = vmatprep.mubr.msk.f32.mxu1 %vm935_vm6, %v3687_v46  ;;  %10338 = vmatpush3.bf16.msra.mxu1 %v12671_v23 }
 0xa65   :  { %10339 = vmatprep.subr.bf16.mxu1 %v14732_v37 }
 0xa67   :  { %3839 = vmatmul.mubr.f32.gmra.mrb[60].mxu1 %v3686_v18 }
 0xa68   :  { %10341 = vmatpush3.bf16.msra.mxu1 %v12682_v28  ;;  %9340 = vmatprep.mubr.msk.f32.mxu1 %vm11330_vm12, %v14754_v49 }
 0xa69   :  { %10342 = vmatprep.subr.bf16.mxu1 %v14732_v37 }
 0xa6c   :  { %10344 = vmatpush3.bf16.msra.mxu1 %v12695_v16 }
 0xa6d   :  { %10345 = vmatprep.subr.bf16.mxu1 %v14732_v37 }
 0xa70   :  { %10347 = vmatpush3.bf16.msra.mxu1 %v12705_v61  ;;  %v13466_v61 = vld [vmem:[%s14698_s22 + $0x90] sm:$0x3f] }
 0xa71   :  { %9338 = vmatprep.subr.mxu1 %v14754_v49  ;;  %14880 = vst [vmem:[#allocation79_spill] sm:$0xff] %v13466_v61 }
 0xa74   :  { %9339 = vmatpush3.msk.msra.mxu1 %vm101_vm0, %v12716_v17  ;;  %v11272_v17 = vld [vmem:[%s14446_s10] sm:$0xf] }
 0xa75   :  { %10348 = vmatprep.subr.bf16.mxu1 %v14732_v37 }
 0xb0e   :  { %v3760_v18 = vpop.f32.mrb[54].mxu1 }
 0xb0f   :  { %v3762_v32 = vpop.f32.mrb[55].mxu1 }
 0xb10   :  { %v14869_v32 = vld [vmem:[#allocation6_spill] sm:$0xff] }
 0xb12   :  { %v3765_v50 = vpop.f32.mrb[56].mxu1 }
 0xb13   :  { %v3767_v24 = vpop.f32.mrb[57].mxu1 }
 0xb14   :  { %v8683_v24 = vld [vmem:[%s14694_s21 + $0x51] sm:$0xff] }
 0xb36   :  { %v3835_v10 = vpop.f32.mrb[58].mxu1 }
 0xb37   :  { %v3844_v63 = vmax.f32 %v3760_v18, %v3835_v10  ;;  %v3837_v15 = vpop.f32.mrb[59].mxu1  ;;  %v8682_v18 = vld [vmem:[%s14694_s21 + $0x49] sm:$0xff]  ;;  %v14871_v10 = vld [vmem:[#allocation8_spill] sm:$0xff] }
 0xb38   :  { %v8677_v15 = vld [vmem:[%s14694_s21 + $0x40] sm:$0xff] }
 0xb3a   :  { %v3840_v46 = vpop.f32.mrb[60].mxu1 }
 0xb3b   :  { %v3845_v16 = vmax.f32 %v3765_v50, %v3840_v46  ;;  %v3842_v28 = vpop.f32.mrb[61].mxu1  ;;  %v14870_v50 = vld [vmem:[#allocation7_spill] sm:$0xff]  ;;  %v8678_v46 = vld [vmem:[%s14694_s21 + $0x48] sm:$0xff] }
 0xb3c   :  { %v11273_v28 = vld [vmem:[%s14446_s10 + $0x4] sm:$0xf] }
 0xb3d   :  { %v10329_v23 = vpack.c.bf16 %v3845_v16, %v3844_v63  ;;  %v14868_v16 = vld [vmem:[#allocation5_spill] sm:$0xff]  ;;  %v8684_v63 = vld [vmem:[%s14694_s21 + $0x59] sm:$0x1] }
 0xb3f   :  { %10331 = vmatpush3.bf16.msk.msra.mxu0 %vm12020_vm8, %v10329_v23 }
 0xb40   :  { %10332 = vmatprep.subr.bf16.mxu0 %v14732_v37 }
 0xb42   :  { %9313 = vmatmul.mubr.msk.f32.vlgmr.msra.gmra.mrb[52].mxu0 %vm1858_vm13, %v11272_v17  ;;  %v8679_v17 = vld [vmem:[%s14694_s21 + $0x50] sm:$0xff] }
 0xb43   :  { %10335 = vmatpush3.bf16.msk.msra.mxu0 %vm12020_vm8, %v10329_v23  ;;  %9319 = vmatprep.mubr.msk.f32.mxu0 %vm11330_vm12, %v14754_v49  ;;  %v8681_v23 = vld [vmem:[%s14694_s21 + $0x41] sm:$0xff] }
 0xb44   :  { %10385 = vmatprep.subr.bf16.mxu0 %v11441_v3 }
 0xb46   :  { %9320 = vmatmul.mubr.msk.f32.vlgmr.msra.gmra.mrb[54].mxu0 %vm1858_vm13, %v11273_v28  ;;  %v8680_v28 = vld [vmem:[%s14694_s21 + $0x58] sm:$0x1] }
 0xb47   :  { %10387 = vmatpush1.bf16.msra.mxu0 %v11452_v7  ;;  %4371 = vmatprep.mubr.f32.mxu0 %v14754_v49 }
 0xb48   :  { %10390 = vmatprep.subr.msk.bf16.mxu0 %vm11458_vm2, %v11454_v8 }
 0xb4b   :  { %10393 = vmatpush1.bf16.msk.msra.mxu0 %vm11458_vm2, %v11472_v14 }
 0xb4c   :  { %10395 = vmatprep.subr.bf16.mxu0 %v14868_v16 }
 0xb4e   :  { %8687 = vmatmul.mubr.msk.f32.vlgmr.msra.gmra.mrb[56].mxu0 %vm88_vm3, %v8681_v23  ;;  %v8697_v23 = vld [vmem:[%s14694_s21 + $0x42] sm:$0xff] }
 0xb4f   :  { %4377 = vmatprep.mubr.f32.mxu0 %v14754_v49  ;;  %10397 = vmatpush1.bf16.msra.mxu0 %v14869_v32 }
 0xb50   :  { %10400 = vmatprep.subr.msk.bf16.mxu0 %vm11458_vm2, %v14870_v50 }
 0xb52   :  { %8688 = vmatmul.mubr.msk.f32.gmra.mrb[58].mxu0 %vm88_vm3, %v8682_v18  ;;  %v8698_v18 = vld [vmem:[%s14694_s21 + $0x4a] sm:$0xff] }
 0xb53   :  { %4383 = vmatprep.mubr.f32.mxu0 %v14754_v49  ;;  %10403 = vmatpush1.bf16.msk.msra.mxu0 %vm11458_vm2, %v11526_v30 }
 0xb54   :  { %10405 = vmatprep.subr.bf16.mxu0 %v14871_v10 }
 0xb56   :  { %8689 = vmatmul.mubr.msk.f32.gmra.mrb[60].mxu0 %vm88_vm3, %v8683_v24  ;;  %v8699_v24 = vld [vmem:[%s14694_s21 + $0x52] sm:$0xff] }
 0xb57   :  { %4389 = vmatprep.mubr.f32.mxu0 %v14754_v49 }
 0xb5a   :  { %8690 = vmatmul.mubr.msk.f32.gmra.mrb[62].mxu0 %vm88_vm3, %v8684_v63  ;;  %v8700_v63 = vld [vmem:[%s14694_s21 + $0x5a] sm:$0x1] }
 0xb5b   :  { %4472 = vmatprep.mubr.f32.mxu0 %v14754_v49 }
 0xb5e   :  { %8693 = vmatmul.mubr.msk.f32.vlgmr.msra.gmra.mrb[56].mxu0 %vm88_vm3, %v8677_v15  ;;  %v8707_v15 = vld [vmem:[%s14694_s21 + $0x43] sm:$0xff] }
 0xb5f   :  { %4478 = vmatprep.mubr.f32.mxu0 %v14754_v49  ;;  %10407 = vmatpush1.bf16.msra.mxu0 %v11588_v47 }
 0xb60   :  { %10410 = vmatprep.subr.msk.bf16.mxu0 %vm11458_vm2, %v11591_v48 }
 0xb62   :  { %8694 = vmatmul.mubr.msk.f32.gmra.mrb[58].mxu0 %vm88_vm3, %v8678_v46  ;;  %v8708_v46 = vld [vmem:[%s14694_s21 + $0x4b] sm:$0xff] }
 0xb63   :  { %4484 = vmatprep.mubr.f32.mxu0 %v14754_v49  ;;  %10413 = vmatpush1.bf16.msk.msra.mxu0 %vm11458_vm2, %v11620_v57 }
 0xb64   :  { %10415 = vmatprep.subr.bf16.mxu0 %v11625_v58 }
 0xb66   :  { %8695 = vmatmul.mubr.msk.f32.gmra.mrb[60].mxu0 %vm88_vm3, %v8679_v17  ;;  %v8709_v17 = vld [vmem:[%s14694_s21 + $0x53] sm:$0xff] }
 0xb67   :  { %4490 = vmatprep.mubr.f32.mxu0 %v14754_v49 }
 0xb6a   :  { %8696 = vmatmul.mubr.msk.f32.gmra.mrb[62].mxu0 %vm88_vm3, %v8680_v28  ;;  %v14872_v28 = vld [vmem:[#allocation10_spill] sm:$0xff] }
 0xb6b   :  { %4577 = vmatprep.mubr.f32.mxu0 %v14754_v49 }
 0xb6e   :  { %8703 = vmatmul.mubr.msk.f32.vlgmr.msra.gmra.mrb[56].mxu0 %vm88_vm3, %v8697_v23  ;;  %v8710_v23 = vld [vmem:[%s14694_s21 + $0x5b] sm:$0x1] }
 0xb6f   :  { %4583 = vmatprep.mubr.f32.mxu0 %v14754_v49  ;;  %10417 = vmatpush1.bf16.msra.mxu0 %v11688_v19  ;;  %v14895_v19 = vld [vmem:[#allocation101_spill] sm:$0xff] }
 0xb70   :  { %10420 = vmatprep.subr.msk.bf16.mxu0 %vm11458_vm2, %v11690_v20 }
 0xb72   :  { %8704 = vmatmul.mubr.msk.f32.gmra.mrb[58].mxu0 %vm88_vm3, %v8698_v18  ;;  %v14873_v18 = vld [vmem:[#allocation11_spill] sm:$0xff] }
 0xb73   :  { %4589 = vmatprep.mubr.f32.mxu0 %v14754_v49  ;;  %10423 = vmatpush1.bf16.msk.msra.mxu0 %vm11458_vm2, %v11714_v29 }
 0xb74   :  { %10424 = vmatprep.subr.bf16.mxu0 %v14732_v37 }
 0xb76   :  { %8705 = vmatmul.mubr.msk.f32.gmra.mrb[60].mxu0 %vm88_vm3, %v8699_v24  ;;  %v14874_v24 = vld [vmem:[#allocation13_spill] sm:$0xff] }
 0xb77   :  { %4595 = vmatprep.mubr.f32.mxu0 %v14754_v49 }
 0xb7a   :  { %8706 = vmatmul.mubr.msk.f32.gmra.mrb[62].mxu0 %vm88_vm3, %v8700_v63  ;;  %v14875_v63 = vld [vmem:[#allocation14_spill] sm:$0xff] }
 0xb7b   :  { %4690 = vmatprep.mubr.f32.mxu0 %v14754_v49 }
 0xb7e   :  { %8713 = vmatmul.mubr.msk.f32.vlgmr.msra.gmra.mrb[56].mxu0 %vm88_vm3, %v8707_v15  ;;  %v14876_v15 = vld [vmem:[#allocation15_spill] sm:$0xff] }
 0xb7f   :  { %4696 = vmatprep.mubr.f32.mxu0 %v14754_v49  ;;  %10426 = vmatpush1.bf16.msra.mxu0 %v11548_v35 }
 0xb80   :  { %10427 = vmatprep.subr.bf16.mxu0 %v14732_v37 }
 0xb82   :  { %8714 = vmatmul.mubr.msk.f32.gmra.mrb[58].mxu0 %vm88_vm3, %v8708_v46  ;;  %v14877_v46 = vld [vmem:[#allocation18_spill] sm:$0xff] }
 0xb83   :  { %4702 = vmatprep.mubr.f32.mxu0 %v14754_v49  ;;  %10429 = vmatpush1.bf16.msra.mxu0 %v14872_v28  ;;  %v11276_v28 = vld [vmem:[%s14448_s12] ss:$0 sm:$0xff] }
 0xb84   :  { %10430 = vmatprep.subr.bf16.mxu0 %v14732_v37 }
 0xb86   :  { %8715 = vmatmul.mubr.msk.f32.gmra.mrb[60].mxu0 %vm88_vm3, %v8709_v17  ;;  %v14878_v17 = vld [vmem:[#allocation20_spill] sm:$0xff] }
 0xb87   :  { %4708 = vmatprep.mubr.f32.mxu0 %v14754_v49  ;;  %10432 = vmatpush1.bf16.msra.mxu0 %v14873_v18 }
 0xb88   :  { %10433 = vmatprep.subr.bf16.mxu0 %v14732_v37 }
 0xb8a   :  { %8716 = vmatmul.mubr.msk.f32.gmra.mrb[62].mxu0 %vm88_vm3, %v8710_v23  ;;  %v14879_v23 = vld [vmem:[#allocation28_spill] sm:$0xff] }
 0xb8b   :  { %10435 = vmatpush1.bf16.msra.mxu0 %v14874_v24 }
 0xb8c   :  { %10436 = vmatprep.subr.bf16.mxu0 %v14732_v37 }
 0xb8f   :  { %10438 = vmatpush1.bf16.msra.mxu0 %v14875_v63 }
 0xb90   :  { %10439 = vmatprep.subr.bf16.mxu0 %v14732_v37 }
 0xb93   :  { %10441 = vmatpush1.bf16.msra.mxu0 %v14876_v15 }
 0xb94   :  { %10442 = vmatprep.subr.bf16.mxu0 %v14732_v37 }
 0xb97   :  { %10444 = vmatpush1.bf16.msra.mxu0 %v14877_v46 }
 0xb98   :  { %10445 = vmatprep.subr.bf16.mxu0 %v14732_v37 }
 0xb9b   :  { %10447 = vmatpush1.bf16.msra.mxu0 %v14878_v17 }
 0xb9c   :  { %10448 = vmatprep.subr.bf16.mxu0 %v14732_v37 }
 0xb9f   :  { %10450 = vmatpush1.bf16.msra.mxu0 %v14879_v23  ;;  %v11275_v23 = vld [vmem:[%s14447_s11] ss:$0 sm:$0xff] }
 0xba0   :  { %4787 = vmatprep.subr.mxu0 %v14754_v49 }
 0xba3   :  { %8717 = vmatpush1.msk.msra.mxu0 %vm620_vm4, %v13466_v61  ;;  %v14881_v61 = vld [vmem:[#allocation87_spill] sm:$0xff] }
 0xba4   :  { %10478 = vmatprep.subr.bf16.mxu0 %v14732_v37 }
 0xc15   :  { %v3915_v46 = vpop.f32.mrb[52].mxu0 }
 0xc16   :  { %v9314_v15 = vpop.f32.mrb[53].mxu0 }
 0xc17   :  { %v14884_v15 = vld [vmem:[#allocation90_spill] sm:$0xff] }
 0xc19   :  { %v3985_v63 = vpop.f32.mrb[54].mxu0 }
 0xc1a   :  { %v3989_v17 = vmax.f32 %v3915_v46, %v3985_v63  ;;  %v9321_v24 = vpop.f32.mrb[55].mxu0  ;;  %v14883_v63 = vld [vmem:[#allocation89_spill] sm:$0xff]  ;;  %v14888_v46 = vld [vmem:[#allocation94_spill] sm:$0xff] }
 0xc1b   :  { %v14882_v24 = vld [vmem:[#allocation88_spill] sm:$0xff] }
 0xc1c   :  { %v3990_v18 = vmul.f32 %v11275_v23, %v3989_v17  ;;  %v14889_v17 = vld [vmem:[#allocation95_spill] sm:$0xff] }
 0xc1e   :  { %v3991_v35 = vadd.f32 %v11276_v28, %v3990_v18  ;;  %v14886_v28 = vld [vmem:[#allocation92_spill] sm:$0xff]  ;;  %v14887_v18 = vld [vmem:[#allocation93_spill] sm:$0xff] }
 0xc20   :  { %v3993_v29 = vrot.slane %v3991_v35, 1  ;;  %v4138_v23 = vrot.slane %v3991_v35, 2 }
 0xc22   :  { %9341 = vmatmul.mubr.msk.f32.vlgmr.msra.gmra.mrb[62].mxu1 %vm2048_vm14, %v3993_v29  ;;  %v14885_v29 = vld [vmem:[#allocation91_spill] sm:$0xff] }
 0xc23   :  { %10350 = vmatpush3.bf16.msra.mxu1 %v14881_v61  ;;  %9361 = vmatprep.mubr.msk.f32.mxu1 %vm11330_vm12, %v14754_v49 }
 0xc24   :  { %10351 = vmatprep.subr.bf16.mxu1 %v14732_v37 }
 0xc27   :  { %10353 = vmatpush3.bf16.msra.mxu1 %v14882_v24 }
 0xc28   :  { %10354 = vmatprep.subr.bf16.mxu1 %v14732_v37 }
 0xc2b   :  { %10356 = vmatpush3.bf16.msra.mxu1 %v14883_v63 }
 0xc2c   :  { %10357 = vmatprep.subr.bf16.mxu1 %v14732_v37 }
 0xc2f   :  { %10359 = vmatpush3.bf16.msra.mxu1 %v14884_v15  ;;  %v14894_v15 = vld [vmem:[#allocation100_spill] sm:$0xff] }
 0xc30   :  { %9359 = vmatprep.subr.mxu1 %v14754_v49 }
 0xc33   :  { %9360 = vmatpush3.msk.msra.mxu1 %vm101_vm0, %v14885_v29  ;;  %v14890_v29 = vld [vmem:[#allocation96_spill] sm:$0xff] }
 0xc34   :  { %9362 = vmatmul.mubr.msk.f32.vlgmr.msra.gmra.mrb[62].mxu1 %vm2048_vm14, %v3991_v35  ;;  %10360 = vmatprep.subr.bf16.mxu1 %v14732_v37 }
 0xc35   :  { %10362 = vmatpush3.bf16.msra.mxu1 %v14886_v28  ;;  %9382 = vmatprep.mubr.msk.f32.mxu1 %vm11330_vm12, %v14754_v49  ;;  %v14891_v28 = vld [vmem:[#allocation97_spill] sm:$0xff] }
 0xc36   :  { %10363 = vmatprep.subr.bf16.mxu1 %v14732_v37 }
 0xc39   :  { %10365 = vmatpush3.bf16.msra.mxu1 %v14887_v18 }
 0xc3a   :  { %10366 = vmatprep.subr.bf16.mxu1 %v14732_v37 }
 0xc3d   :  { %10368 = vmatpush3.bf16.msra.mxu1 %v14888_v46  ;;  %v14892_v46 = vld [vmem:[#allocation98_spill] sm:$0xff] }
 0xc3e   :  { %10369 = vmatprep.subr.bf16.mxu1 %v14732_v37 }
 0xc41   :  { %10371 = vmatpush3.bf16.msra.mxu1 %v14889_v17  ;;  %v14893_v17 = vld [vmem:[#allocation99_spill] sm:$0xff] }
 0xc42   :  { %9380 = vmatprep.subr.mxu1 %v14754_v49 }
 0xc45   :  { %9381 = vmatpush3.msk.msra.mxu1 %vm101_vm0, %v14890_v29 }
 0xc46   :  { %9383 = vmatmul.mubr.msk.f32.vlgmr.msra.gmra.mrb[62].mxu1 %vm2048_vm14, %v4138_v23  ;;  %10372 = vmatprep.subr.bf16.mxu1 %v14732_v37 }
 0xc47   :  { %10374 = vmatpush3.bf16.msra.mxu1 %v14891_v28  ;;  %9403 = vmatprep.mubr.msk.f32.mxu1 %vm11330_vm12, %v14754_v49 }
 0xc48   :  { %10375 = vmatprep.subr.bf16.mxu1 %v14732_v37 }
 0xc4b   :  { %10377 = vmatpush3.bf16.msra.mxu1 %v14892_v46  ;;  %v4212_v46 = vrot.slane %v3991_v35, 3  ;;  %v14896_v35 = vld [vmem:[#allocation30_spill] sm:$0xff] }
 0xc4c   :  { %10378 = vmatprep.subr.bf16.mxu1 %v14732_v37 }
 0xc4f   :  { %10380 = vmatpush3.bf16.msra.mxu1 %v14893_v17 }
 0xc50   :  { %10381 = vmatprep.subr.bf16.mxu1 %v14732_v37 }
 0xc51   :  { %v4692_v29 = vpop.f32.mrb[56].mxu0 }
 0xc52   :  { %v4694_v18 = vpop.f32.mrb[57].mxu0  ;;  %v4723_v23 = vadd.f32 %v4692_v29, %v11878_v42 }
 0xc53   :  { %10383 = vmatpush3.bf16.msra.mxu1 %v14894_v15  ;;  %v4724_v28 = vadd.f32 %v4694_v18, %v11882_v43 }
 0xc54   :  { %9401 = vmatprep.subr.mxu1 %v14754_v49  ;;  %v13518_v20 = vmax.f32 %v4723_v23, 0.0 }
 0xc55   :  { %v4732_v63 = vmax.f32 %v4724_v28, 0.0  ;;  %v4698_v24 = vpop.f32.mrb[58].mxu0 }
 0xc56   :  { %v4700_v61 = vpop.f32.mrb[59].mxu0  ;;  %v4725_v17 = vadd.f32 %v4698_v24, %v11878_v42 }
 0xc57   :  { %9402 = vmatpush3.msk.msra.mxu1 %vm101_vm0, %v14895_v19  ;;  %v4726_v58 = vadd.f32 %v4700_v61, %v11882_v43  ;;  %8718 = vmatprep.mubr.msk.f32.mxu0 %vm607_vm5, %v4732_v63 }
 0xc58   :  { %9404 = vmatmul.mubr.msk.f32.vlgmr.msra.gmra.mrb[62].mxu1 %vm2048_vm14, %v4212_v46  ;;  %10451 = vmatprep.subr.bf16.mxu1 %v14732_v37  ;;  %v4733_v24 = vmax.f32 %v4725_v17, 0.0  ;;  %v14897_v46 = vld [vmem:[#allocation31_spill] sm:$0xff] }
 0xc59   :  { %v13527_v18 = vmax.f32 %v4726_v58, 0.0  ;;  %4816 = vmatmul.mubr.f32.vlgmr.msra.gmra.mrb[64].mxu0 %v13518_v20  ;;  %10453 = vmatpush1.bf16.msra.mxu1 %v14896_v35  ;;  %v4704_v28 = vpop.f32.mrb[60].mxu0 }
 0xc5a   :  { %8723 = vmatprep.mubr.msk.f32.mxu1 %vm607_vm5, %v4732_v63  ;;  %10480 = vmatpush1.bf16.msra.mxu0 %v11750_v40  ;;  %v4706_v19 = vpop.f32.mrb[61].mxu0  ;;  %v4727_v61 = vadd.f32 %v4704_v28, %v11878_v42 }
 0xc5b   :  { %v4728_v29 = vadd.f32 %v4706_v19, %v11882_v43  ;;  %8719 = vmatprep.mubr.msk.f32.mxu0 %vm607_vm5, %v13527_v18  ;;  %10454 = vmatprep.subr.bf16.mxu1 %v14732_v37 }
 0xc5c   :  { %10481 = vmatprep.subr.bf16.mxu0 %v14732_v37  ;;  %v4735_v17 = vmax.f32 %v4727_v61, 0.0  ;;  %v14899_v61 = vld [vmem:[#allocation33_spill] sm:$0xff] }
 0xc5d   :  { %v4736_v58 = vmax.f32 %v4728_v29, 0.0  ;;  %4821 = vmatmul.mubr.f32.gmra.mrb[66].mxu0 %v4733_v24  ;;  %10456 = vmatpush1.bf16.msra.mxu1 %v14897_v46  ;;  %v4710_v23 = vpop.f32.mrb[62].mxu0  ;;  %v14898_v29 = vld [vmem:[#allocation32_spill] sm:$0xff] }
 0xc5e   :  { %10483 = vmatpush1.bf16.msra.mxu0 %v14805_v21  ;;  %v4712_v35 = vpop.f32.mrb[63].mxu0  ;;  %10457 = vmatprep.subr.bf16.mxu1 %v14732_v37  ;;  %v4729_v28 = vadd.f32 %v4710_v23, %v11878_v42  ;;  %v14901_v23 = vld [vmem:[#allocation35_spill] sm:$0xff] }
 0xc5f   :  { %v4730_v19 = vadd.f32 %v4712_v35, %v11882_v43  ;;  %8720 = vmatprep.mubr.msk.f32.mxu0 %vm607_vm5, %v4736_v58  ;;  %10484 = vmatprep.subr.bf16.mxu0 %v14732_v37  ;;  %v14900_v35 = vld [vmem:[#allocation34_spill] sm:$0xff] }
 0xc60   :  { %v4737_v46 = vmax.f32 %v4729_v28, 0.0  ;;  %v14903_v28 = vld [vmem:[#allocation37_spill] sm:$0xff] }
 0xc61   :  { %v4738_v15 = vmax.f32 %v4730_v19, 0.0  ;;  %4826 = vmatmul.mubr.f32.gmra.mrb[68].mxu0 %v4735_v17  ;;  %10459 = vmatpush1.bf16.msra.mxu1 %v14898_v29  ;;  %v14904_v19 = vld [vmem:[#allocation27_spill] sm:$0xff] }
 0xc62   :  { %10486 = vmatpush1.bf16.msra.mxu0 %v14806_v25  ;;  %10460 = vmatprep.subr.bf16.mxu1 %v14732_v37 }
 0xc63   :  { %8721 = vmatprep.mubr.msk.f32.mxu0 %vm607_vm5, %v4738_v15  ;;  %10487 = vmatprep.subr.bf16.mxu0 %v14732_v37 }
 0xc65   :  { %4831 = vmatmul.mubr.f32.gmra.mrb[70].mxu0 %v4737_v46  ;;  %10462 = vmatpush1.bf16.msra.mxu1 %v14899_v61  ;;  %v14908_v61 = vld [vmem:[#allocation22_spill] sm:$0xff] }
 0xc66   :  { %10489 = vmatpush1.bf16.msra.mxu0 %v14807_v22  ;;  %8728 = vmatprep.mubr.msk.f32.mxu0 %vm607_vm5, %v4732_v63  ;;  %v14902_v63 = vld [vmem:[#allocation36_spill] sm:$0xff] }
 0xc67   :  { %10463 = vmatprep.subr.bf16.mxu1 %v14732_v37  ;;  %10490 = vmatprep.subr.bf16.mxu0 %v14732_v37 }
 0xc69   :  { %10465 = vmatpush1.bf16.msra.mxu1 %v14900_v35  ;;  %v14906_v35 = vld [vmem:[#allocation29_spill] sm:$0xff] }
 0xc6a   :  { %10492 = vmatpush1.bf16.msra.mxu0 %v14809_v31  ;;  %10466 = vmatprep.subr.bf16.mxu1 %v14732_v37 }
 0xc6b   :  { %10493 = vmatprep.subr.bf16.mxu0 %v14732_v37 }
 0xc6d   :  { %10468 = vmatpush1.bf16.msra.mxu1 %v14901_v23  ;;  %v14905_v23 = vld [vmem:[#allocation38_spill] sm:$0xff] }
 0xc6e   :  { %10495 = vmatpush1.bf16.msra.mxu0 %v14810_v26  ;;  %10469 = vmatprep.subr.bf16.mxu1 %v14732_v37 }
 0xc6f   :  { %10496 = vmatprep.subr.bf16.mxu0 %v14732_v37 }
 0xc71   :  { %10471 = vmatpush1.bf16.msra.mxu1 %v14902_v63  ;;  %v14907_v63 = vld [vmem:[#allocation102_spill] sm:$0xff] }
 0xc72   :  { %10498 = vmatpush1.bf16.msra.mxu0 %v14811_v51  ;;  %10472 = vmatprep.subr.bf16.mxu1 %v14732_v37 }
 0xc73   :  { %10499 = vmatprep.subr.bf16.mxu0 %v14732_v37 }
 0xc75   :  { %10474 = vmatpush1.bf16.msra.mxu1 %v14903_v28  ;;  %v14913_v28 = vld [vmem:[#allocation103_spill] sm:$0xff] }
 0xc76   :  { %10501 = vmatpush1.bf16.msra.mxu0 %v14904_v19  ;;  %10475 = vmatprep.subr.bf16.mxu1 %v14732_v37 }
 0xc77   :  { %10502 = vmatprep.subr.bf16.mxu0 %v14732_v37 }
 0xc79   :  { %10477 = vmatpush1.bf16.msra.mxu1 %v14905_v23 }
 0xc7a   :  { %10504 = vmatpush1.bf16.msra.mxu0 %v14906_v35  ;;  %4872 = vmatprep.subr.mxu1 %v14754_v49 }
 0xc7b   :  { %4961 = vmatprep.subr.mxu0 %v14754_v49 }
 0xc7d   :  { %8722 = vmatpush1.msk.msra.mxu1 %vm620_vm4, %v14907_v63 }
 0xc7e   :  { %8727 = vmatpush1.msk.msra.mxu0 %vm620_vm4, %v14908_v61  ;;  %4901 = vmatmul.mubr.f32.vlgmr.msra.gmra.mrb[64].mxu1 %v13518_v20 }
 0xc7f   :  { %4990 = vmatmul.mubr.f32.vlgmr.msra.gmra.mrb[72].mxu0 %v13518_v20  ;;  %8724 = vmatprep.mubr.msk.f32.mxu1 %vm607_vm5, %v13527_v18  ;;  %v14909_v20 = vld [vmem:[#allocation21_spill] sm:$0xff] }
 0xc80   :  { %8729 = vmatprep.mubr.msk.f32.mxu0 %vm607_vm5, %v13527_v18  ;;  %10536 = vmatprep.subr.bf16.mxu0 %v14824_v27  ;;  %v14910_v18 = vld [vmem:[#allocation107_spill] sm:$0xff] }
 0xc81   :  { %10538 = vmatpush1.bf16.msra.mxu0 %v14826_v55 }
 0xc82   :  { %4906 = vmatmul.mubr.f32.gmra.mrb[66].mxu1 %v4733_v24  ;;  %10540 = vmatprep.subr.bf16.mxu0 %v14827_v4 }
 0xc83   :  { %4995 = vmatmul.mubr.f32.gmra.mrb[74].mxu0 %v4733_v24  ;;  %8725 = vmatprep.mubr.msk.f32.mxu1 %vm607_vm5, %v4736_v58  ;;  %v14911_v24 = vld [vmem:[#allocation108_spill] sm:$0xff] }
 0xc84   :  { %8730 = vmatprep.mubr.msk.f32.mxu0 %vm607_vm5, %v4736_v58  ;;  %v14912_v58 = vld [vmem:[#allocation47_spill] sm:$0xff] }
 0xc85   :  { %10542 = vmatpush1.bf16.msra.mxu0 %v14828_v62 }
 0xc86   :  { %4911 = vmatmul.mubr.f32.gmra.mrb[68].mxu1 %v4735_v17  ;;  %10544 = vmatprep.subr.bf16.mxu0 %v14829_v39 }
 0xc87   :  { %5000 = vmatmul.mubr.f32.gmra.mrb[76].mxu0 %v4735_v17  ;;  %8726 = vmatprep.mubr.msk.f32.mxu1 %vm607_vm5, %v4738_v15 }
 0xc88   :  { %8731 = vmatprep.mubr.msk.f32.mxu0 %vm607_vm5, %v4738_v15 }
 0xc89   :  { %10546 = vmatpush1.bf16.msra.mxu0 %v14830_v45 }
 0xc8a   :  { %4916 = vmatmul.mubr.f32.gmra.mrb[70].mxu1 %v4737_v46  ;;  %10548 = vmatprep.subr.bf16.mxu0 %v14831_v33 }
 0xc8b   :  { %5005 = vmatmul.mubr.f32.gmra.mrb[78].mxu0 %v4737_v46  ;;  %9414 = vmatprep.mubr.msk.f32.mxu1 %vm935_vm6, %v14909_v20 }
 0xc8c   :  { %5323 = vmatprep.mubr.f32.mxu0 %v14754_v49 }
 0xc8d   :  { %10550 = vmatpush1.bf16.msra.mxu0 %v14832_v53 }
 0xc8e   :  { %5275 = vmatprep.subr.mxu0 %v14910_v18 }
 0xc91   :  { %5276 = vmatpush1.msra.mxu0 %v14911_v24 }
 0xc92   :  { %10552 = vmatprep.subr.bf16.mxu0 %v14912_v58 }
 0xd2b   :  { %v4281_v15 = vpop.f32.mrb[62].mxu1 }
 0xd2c   :  { %v8113_v17 = vrot.slane %v4281_v15, 7  ;;  %v9405_v61 = vpop.f32.mrb[63].mxu1  ;;  %v4817_v63 = vpop.f32.mrb[64].mxu0 }
 0xd2d   :  { %v4819_v23 = vpop.f32.mrb[65].mxu0 }
 0xd2e   :  { %v13606_v46 = vsel %vm942_vm7, %v14913_v28, %v8113_v17 }
 0xd2f   :  { %14914 = vst [vmem:[#allocation80_spill] sm:$0xff] %v13606_v46 }
 0xd30   :  { %v4822_v20 = vpop.f32.mrb[66].mxu0 }
 0xd31   :  { %v4824_v29 = vpop.f32.mrb[67].mxu0 }
 0xd34   :  { %v4827_v33 = vpop.f32.mrb[68].mxu0 }
 0xd35   :  { %v4829_v45 = vpop.f32.mrb[69].mxu0 }
 0xd38   :  { %v4832_v53 = vpop.f32.mrb[70].mxu0 }
 0xd39   :  { %v4834_v39 = vpop.f32.mrb[71].mxu0 }
 0xd51   :  { %v4902_v18 = vpop.f32.mrb[64].mxu1 }
 0xd52   :  { %v4921_v62 = vmax.f32 %v4817_v63, %v4902_v18  ;;  %v4991_v24 = vpop.f32.mrb[72].mxu0  ;;  %v4904_v4 = vpop.f32.mrb[65].mxu1 }
 0xd53   :  { %v4993_v58 = vpop.f32.mrb[73].mxu0 }
 0xd54   :  { %v5010_v55 = vmax.f32 %v4921_v62, %v4991_v24  ;;  %v14924_v24 = vld [vmem:[#allocation52_spill] sm:$0xff] }
 0xd55   :  { %v4907_v15 = vpop.f32.mrb[66].mxu1 }
 0xd56   :  { %v4922_v61 = vmax.f32 %v4822_v20, %v4907_v15  ;;  %v4996_v27 = vpop.f32.mrb[74].mxu0  ;;  %v4909_v23 = vpop.f32.mrb[67].mxu1  ;;  %v14925_v15 = vld [vmem:[#allocation53_spill] sm:$0xff] }
 0xd57   :  { %v4998_v35 = vpop.f32.mrb[75].mxu0  ;;  %v14927_v23 = vld [vmem:[#allocation55_spill] sm:$0xff] }
 0xd58   :  { %v5011_v19 = vmax.f32 %v4922_v61, %v4996_v27  ;;  %v14915_v27 = vld [vmem:[#allocation23_spill] sm:$0xff]  ;;  %v14921_v35 = vld [vmem:[#allocation49_spill] sm:$0xff]  ;;  %v14926_v61 = vld [vmem:[#allocation54_spill] sm:$0xff] }
 0xd59   :  { %v4912_v28 = vpop.f32.mrb[68].mxu1 }
 0xd5a   :  { %v10505_v17 = vpack.c.bf16 %v5011_v19, %v5010_v55  ;;  %v4923_v46 = vmax.f32 %v4827_v33, %v4912_v28  ;;  %v5001_v29 = vpop.f32.mrb[76].mxu0  ;;  %v4914_v51 = vpop.f32.mrb[69].mxu1  ;;  %v14918_v55 = vld [vmem:[#allocation105_spill] sm:$0xff]  ;;  %v14919_v33 = vld [vmem:[#allocation106_spill] sm:$0xff]  ;;  %v14928_v28 = vld [vmem:[#allocation56_spill] sm:$0xff] }
 0xd5b   :  { %v5003_v45 = vpop.f32.mrb[77].mxu0  ;;  %v14916_v51 = vld [vmem:[#allocation24_spill] sm:$0xff]  ;;  %v14922_v19 = vld [vmem:[#allocation50_spill] sm:$0xff] }
 0xd5c   :  { %v5012_v26 = vmax.f32 %v4923_v46, %v5001_v29  ;;  %10506 = vmatprep.subr.bf16.mxu1 %v10505_v17  ;;  %v14923_v46 = vld [vmem:[#allocation51_spill] sm:$0xff] }
 0xd5d   :  { %v4917_v39 = vpop.f32.mrb[70].mxu1  ;;  %10508 = vmatpush3.bf16.msra.mxu1 %v10505_v17 }
 0xd5e   :  { %v4924_v63 = vmax.f32 %v4832_v53, %v4917_v39  ;;  %v5006_v4 = vpop.f32.mrb[78].mxu0  ;;  %v4919_v58 = vpop.f32.mrb[71].mxu1  ;;  %v14920_v53 = vld [vmem:[#allocation48_spill] sm:$0xff] }
 0xd5f   :  { %v5008_v62 = vpop.f32.mrb[79].mxu0 }
 0xd60   :  { %v5013_v18 = vmax.f32 %v4924_v63, %v5006_v4 }
 0xd62   :  { %v10509_v20 = vpack.c.bf16 %v5013_v18, %v5012_v26  ;;  %v14917_v26 = vld [vmem:[#allocation104_spill] sm:$0xff] }
 0xd64   :  { %10511 = vmatprep.subr.msk.bf16.mxu1 %vm12020_vm8, %v10509_v20 }
 0xd65   :  { %10514 = vmatpush3.bf16.msk.msra.mxu1 %vm12020_vm8, %v10509_v20 }
 0xd66   :  { %10516 = vmatprep.subr.bf16.mxu1 %v10505_v17 }
 0xd68   :  { %9415 = vmatmul.mubr.msk.f32.vlgmr.msra.gmra.mrb[72].mxu1 %vm935_vm6, %v14915_v27 }
 0xd69   :  { %10518 = vmatpush3.bf16.msra.mxu1 %v10505_v17  ;;  %9425 = vmatprep.mubr.msk.f32.mxu1 %vm935_vm6, %v14916_v51 }
 0xd6a   :  { %10521 = vmatprep.subr.msk.bf16.mxu1 %vm12020_vm8, %v10509_v20 }
 0xd6d   :  { %10524 = vmatpush3.bf16.msk.msra.mxu1 %vm12020_vm8, %v10509_v20 }
 0xd6e   :  { %10526 = vmatprep.subr.bf16.mxu1 %v10505_v17 }
 0xd70   :  { %9426 = vmatmul.mubr.msk.f32.vlgmr.msra.gmra.mrb[74].mxu1 %vm935_vm6, %v14917_v26 }
 0xd71   :  { %10528 = vmatpush3.bf16.msra.mxu1 %v10505_v17  ;;  %9436 = vmatprep.mubr.msk.f32.mxu1 %vm935_vm6, %v14918_v55  ;;  %v14929_v17 = vld [vmem:[#allocation78_spill] sm:$0xff]  ;;  %v14930_v55 = vld [vmem:[#allocation109_spill] sm:$0xff] }
 0xd72   :  { %10531 = vmatprep.subr.msk.bf16.mxu1 %vm12020_vm8, %v10509_v20 }
 0xd75   :  { %10534 = vmatpush3.bf16.msk.msra.mxu1 %vm12020_vm8, %v10509_v20 }
 0xd76   :  { %10599 = vmatprep.subr.bf16.mxu1 %v14732_v37 }
 0xd78   :  { %9437 = vmatmul.mubr.msk.f32.vlgmr.msra.gmra.mrb[76].mxu1 %vm935_vm6, %v14919_v33 }
 0xd79   :  { %10601 = vmatpush1.bf16.msra.mxu1 %v14920_v53 }
 0xd7a   :  { %10602 = vmatprep.subr.bf16.mxu1 %v14732_v37 }
 0xd7d   :  { %10604 = vmatpush1.bf16.msra.mxu1 %v14921_v35 }
 0xd7e   :  { %10605 = vmatprep.subr.bf16.mxu1 %v14732_v37 }
 0xd81   :  { %10607 = vmatpush1.bf16.msra.mxu1 %v14922_v19 }
 0xd82   :  { %10608 = vmatprep.subr.bf16.mxu1 %v14732_v37 }
 0xd85   :  { %10610 = vmatpush1.bf16.msra.mxu1 %v14923_v46 }
 0xd86   :  { %10611 = vmatprep.subr.bf16.mxu1 %v14732_v37 }
 0xd89   :  { %10613 = vmatpush1.bf16.msra.mxu1 %v14924_v24 }
 0xd8a   :  { %10614 = vmatprep.subr.bf16.mxu1 %v14732_v37 }
 0xd8d   :  { %10616 = vmatpush1.bf16.msra.mxu1 %v14925_v15 }
 0xd8e   :  { %10617 = vmatprep.subr.bf16.mxu1 %v14732_v37 }
 0xd91   :  { %10619 = vmatpush1.bf16.msra.mxu1 %v14926_v61 }
 0xd92   :  { %10620 = vmatprep.subr.bf16.mxu1 %v14732_v37 }
 0xd95   :  { %10622 = vmatpush1.bf16.msra.mxu1 %v14927_v23 }
 0xd96   :  { %10623 = vmatprep.subr.bf16.mxu1 %v14732_v37 }
 0xd99   :  { %10625 = vmatpush1.bf16.msra.mxu1 %v14928_v28 }
 0xd9a   :  { %10626 = vmatprep.subr.bf16.mxu1 %v14732_v37 }
 0xd9d   :  { %10629 = vmatpush1.bf16.msk.msra.mxu1 %vm12020_vm8, %v14929_v17 }
 0xd9e   :  { %10630 = vmatprep.subr.bf16.mxu1 %v14732_v37 }
 0xe3b   :  { %v9416_v29 = vpop.f32.mrb[72].mxu1 }
 0xe3c   :  { %v5083_v45 = vpop.f32.mrb[73].mxu1 }
 0xe43   :  { %v9427_v39 = vpop.f32.mrb[74].mxu1 }
 0xe44   :  { %v5168_v63 = vmax.f32 %v9416_v29, %v9427_v39  ;;  %v5158_v4 = vpop.f32.mrb[75].mxu1 }
 0xe45   :  { %v5167_v58 = vmax.f32 %v5083_v45, %v5158_v4  ;;  %v14934_v4 = vld [vmem:[#allocation62_spill] sm:$0xff] }
 0xe4b   :  { %v9438_v62 = vpop.f32.mrb[76].mxu1 }
 0xe4c   :  { %v5245_v18 = vmax.f32 %v5168_v63, %v9438_v62  ;;  %v5235_v20 = vpop.f32.mrb[77].mxu1  ;;  %v14936_v62 = vld [vmem:[#allocation58_spill] sm:$0xff] }
 0xe4d   :  { %v5244_v27 = vmax.f32 %v5167_v58, %v5235_v20  ;;  %v14935_v58 = vld [vmem:[#allocation57_spill] sm:$0xff] }
 0xe4e   :  { %v5247_v51 = vmul.f32 %v13183_v13, %v5245_v18  ;;  %v14938_v18 = vld [vmem:[#allocation64_spill] sm:$0xff]  ;;  %v14939_v20 = vld [vmem:[#allocation65_spill] sm:$0xff] }
 0xe4f   :  { %v5246_v26 = vmul.f32 %v13183_v13, %v5244_v27  ;;  %v14931_v13 = vld [vmem:[#allocation59_spill] sm:$0xff]  ;;  %v14940_v27 = vld [vmem:[#allocation66_spill] sm:$0xff] }
 0xe50   :  { %v5249_v33 = vadd.f32 %v14930_v55, %v5247_v51  ;;  %v14941_v51 = vld [vmem:[#allocation67_spill] sm:$0xff] }
 0xe51   :  { %v5248_v17 = vadd.f32 %v14930_v55, %v5246_v26  ;;  %v14942_v26 = vld [vmem:[#allocation68_spill] sm:$0xff]  ;;  %v14944_v55 = vld [vmem:[#allocation110_spill] sm:$0xff] }
 0xe52   :  { %v5253_v28 = vrot.slane %v5249_v33, 1  ;;  %v5418_v23 = vrot.slane %v5249_v33, 2  ;;  %v5506_v61 = vrot.slane %v5249_v33, 3 }
 0xe53   :  { %v5252_v15 = vrot.slane %v5248_v17, 1  ;;  %v5417_v24 = vrot.slane %v5248_v17, 2  ;;  %v5505_v29 = vrot.slane %v5248_v17, 3 }
 0xe55   :  { %v5254_v45 = vsel %vm1250_vm9, %v5252_v15, %v5253_v28  ;;  %v5419_v39 = vsel %vm620_vm4, %v5417_v24, %v5418_v23  ;;  %v5507_v63 = vsel %vm1543_vm10, %v5505_v29, %v5506_v61  ;;  %v14932_v15 = vld [vmem:[#allocation60_spill] sm:$0xff]  ;;  %v14933_v24 = vld [vmem:[#allocation61_spill] sm:$0xff]  ;;  %v14945_v29 = vld [vmem:[#allocation111_spill] sm:$0xff] }
 0xe56   :  { %8741 = vmatmul.mubr.msk.f32.vlgmr.msra.gmra.mrb[80].mxu0 %vm1254_vm11, %v5254_v45  ;;  %v14946_v45 = vld [vmem:[#allocation70_spill] sm:$0xff] }
 0xe57   :  { %10554 = vmatpush1.bf16.msra.mxu0 %v12248_v1  ;;  %5329 = vmatprep.mubr.f32.mxu0 %v14754_v49 }
 0xe58   :  { %10556 = vmatprep.subr.bf16.mxu0 %v14837_v41 }
 0xe5a   :  { %8742 = vmatmul.mubr.msk.f32.gmra.mrb[82].mxu0 %vm1254_vm11, %v5253_v28  ;;  %v14937_v28 = vld [vmem:[#allocation63_spill] sm:$0xff] }
 0xe5b   :  { %10558 = vmatpush1.bf16.msra.mxu0 %v14838_v34  ;;  %5404 = vmatprep.mubr.f32.mxu0 %v14754_v49 }
 0xe5c   :  { %10560 = vmatprep.subr.bf16.mxu0 %v14931_v13 }
 0xe5f   :  { %10562 = vmatpush1.bf16.msra.mxu0 %v14932_v15 }
 0xe60   :  { %10564 = vmatprep.subr.bf16.mxu0 %v14933_v24 }
 0xe63   :  { %10566 = vmatpush1.bf16.msra.mxu0 %v14934_v4 }
 0xe64   :  { %5356 = vmatprep.subr.mxu0 %v14935_v58  ;;  %v14948_v58 = vld [vmem:[#allocation72_spill] sm:$0xff] }
 0xe67   :  { %5357 = vmatpush1.msra.mxu0 %v14936_v62  ;;  %v14949_v62 = vld [vmem:[#allocation73_spill] sm:$0xff] }
 0xe68   :  { %8743 = vmatmul.mubr.msk.f32.vlgmr.msra.gmra.mrb[80].mxu0 %vm1254_vm11, %v5248_v17  ;;  %10568 = vmatprep.subr.bf16.mxu0 %v12347_v38  ;;  %v14943_v17 = vld [vmem:[#allocation69_spill] sm:$0xff] }
 0xe69   :  { %10570 = vmatpush1.bf16.msra.mxu0 %v14937_v28  ;;  %5410 = vmatprep.mubr.f32.mxu0 %v14754_v49 }
 0xe6a   :  { %10572 = vmatprep.subr.bf16.mxu0 %v14938_v18 }
 0xe6c   :  { %8744 = vmatmul.mubr.msk.f32.gmra.mrb[82].mxu0 %vm1254_vm11, %v5249_v33  ;;  %v14947_v33 = vld [vmem:[#allocation71_spill] sm:$0xff] }
 0xe6d   :  { %10574 = vmatpush1.bf16.msra.mxu0 %v14939_v20  ;;  %5488 = vmatprep.mubr.f32.mxu0 %v14754_v49 }
 0xe6e   :  { %10576 = vmatprep.subr.bf16.mxu0 %v14940_v27 }
 0xe71   :  { %10578 = vmatpush1.bf16.msra.mxu0 %v14941_v51 }
 0xe72   :  { %10580 = vmatprep.subr.bf16.mxu0 %v14942_v26 }
 0xe75   :  { %10582 = vmatpush1.bf16.msra.mxu0 %v14943_v17  ;;  %v14950_v17 = vld [vmem:[#allocation74_spill] sm:$0xff] }
 0xe76   :  { %5440 = vmatprep.subr.mxu0 %v14944_v55  ;;  %v14951_v55 = vld [vmem:[#allocation75_spill] sm:$0xff] }
 0xe79   :  { %5441 = vmatpush1.msra.mxu0 %v14945_v29  ;;  %v14952_v29 = vld [vmem:[#allocation76_spill] sm:$0xff] }
 0xe7a   :  { %8745 = vmatmul.mubr.msk.f32.vlgmr.msra.gmra.mrb[80].mxu0 %vm1254_vm11, %v5419_v39  ;;  %10584 = vmatprep.subr.bf16.mxu0 %v14946_v45  ;;  %v14953_v39 = vld [vmem:[#allocation77_spill] sm:$0xff]  ;;  %v14954_v45 = vld [vmem:[#allocation112_spill] sm:$0xff] }
 0xe7b   :  { %10586 = vmatpush1.bf16.msra.mxu0 %v14947_v33  ;;  %5494 = vmatprep.mubr.f32.mxu0 %v14754_v49  ;;  %v14955_v33 = vld [vmem:[#allocation113_spill] sm:$0xff] }
 0xe7c   :  { %10588 = vmatprep.subr.bf16.mxu0 %v14948_v58 }
 0xe7e   :  { %8746 = vmatmul.mubr.msk.f32.gmra.mrb[82].mxu0 %vm1254_vm11, %v5418_v23 }
 0xe7f   :  { %10590 = vmatpush1.bf16.msra.mxu0 %v14949_v62  ;;  %5576 = vmatprep.mubr.f32.mxu0 %v14754_v49 }
 0xe80   :  { %10592 = vmatprep.subr.bf16.mxu0 %v14950_v17 }
 0xe83   :  { %10594 = vmatpush1.bf16.msra.mxu0 %v14951_v55 }
 0xe84   :  { %10596 = vmatprep.subr.bf16.mxu0 %v14952_v29 }
 0xe87   :  { %10598 = vmatpush1.bf16.msra.mxu0 %v14953_v39 }
 0xe88   :  { %5528 = vmatprep.subr.mxu0 %v14954_v45 }
 0xe8b   :  { %5529 = vmatpush1.msra.mxu0 %v14955_v33 }
 0xe8c   :  { %8747 = vmatmul.mubr.msk.f32.vlgmr.msra.gmra.mrb[80].mxu0 %vm1254_vm11, %v5507_v63  ;;  %10661 = vmatprep.subr.bf16.mxu0 %v14732_v37 }
 0xe8d   :  { %5582 = vmatprep.mubr.f32.mxu0 %v14754_v49 }
 0xe90   :  { %8748 = vmatmul.mubr.msk.f32.gmra.mrb[82].mxu0 %vm1254_vm11, %v5506_v61 }
 0xe91   :  { %9443 = vmatprep.mubr.msk.f32.mxu0 %vm11330_vm12, %v14754_v49 }
 0xf5f   :  { %v5578_v23 = vpop.f32.mrb[80].mxu0 }
 0xf60   :  { %v5593_v29 = vadd.f32 %v5578_v23, %v12521_v56  ;;  %v5580_v55 = vpop.f32.mrb[81].mxu0  ;;  %v14963_v23 = vld [vmem:[#allocation13_spill] sm:$0xff] }
 0xf61   :  { %v5594_v39 = vadd.f32 %v5580_v55, %v12525_v0  ;;  %v8797_v55 = vld [vmem:[%s14694_s21 + $0x63] sm:$0xff] }
 0xf62   :  { %v5597_v33 = vmax.f32 %v5593_v29, 0.0  ;;  %v14961_v29 = vld [vmem:[#allocation10_spill] sm:$0xff] }
 0xf63   :  { %v5598_v45 = vmax.f32 %v5594_v39, 0.0  ;;  %v5584_v17 = vpop.f32.mrb[82].mxu0  ;;  %v14962_v39 = vld [vmem:[#allocation11_spill] sm:$0xff] }
 0xf64   :  { %v5595_v63 = vadd.f32 %v5584_v17, %v12521_v56  ;;  %v5586_v62 = vpop.f32.mrb[83].mxu0  ;;  %v8789_v17 = vld [vmem:[%s14694_s21 + $0x72] sm:$0xff] }
 0xf65   :  { %v5596_v58 = vadd.f32 %v5586_v62, %v12525_v0  ;;  %8750 = vmatprep.mubr.msk.f32.mxu1 %vm935_vm6, %v5598_v45  ;;  %v8790_v62 = vld [vmem:[%s14694_s21 + $0x7a] sm:$0x1] }
 0xf66   :  { %5672 = vmatmul.mubr.f32.vlgmr.msra.gmra.mrb[78].mxu1 %v5597_v33  ;;  %v5599_v26 = vmax.f32 %v5595_v63, 0.0  ;;  %v8798_v63 = vld [vmem:[%s14694_s21 + $0x6b] sm:$0xff] }
 0xf67   :  { %v5600_v61 = vmax.f32 %v5596_v58, 0.0  ;;  %10632 = vmatpush1.bf16.msra.mxu1 %v12537_v36  ;;  %v14959_v58 = vld [vmem:[#allocation19_spill] sm:$0xff] }
 0xf68   :  { %10633 = vmatprep.subr.bf16.mxu1 %v14732_v37 }
 0xf69   :  { %8751 = vmatprep.mubr.msk.f32.mxu1 %vm935_vm6, %v5600_v61 }
 0xf6a   :  { %5677 = vmatmul.mubr.f32.gmra.mrb[80].mxu1 %v5599_v26 }
 0xf6b   :  { %10635 = vmatpush1.bf16.msra.mxu1 %v12550_v44  ;;  %8753 = vmatprep.mubr.msk.f32.mxu1 %vm935_vm6, %v5598_v45  ;;  %v14964_v45 = vld [vmem:[#allocation14_spill] sm:$0xff] }
 0xf6c   :  { %10636 = vmatprep.subr.bf16.mxu1 %v14732_v37 }
 0xf6f   :  { %10638 = vmatpush1.bf16.msra.mxu1 %v12562_v12 }
 0xf70   :  { %10639 = vmatprep.subr.bf16.mxu1 %v14732_v37 }
 0xf73   :  { %10641 = vmatpush1.bf16.msra.mxu1 %v12572_v6 }
 0xf74   :  { %10642 = vmatprep.subr.bf16.mxu1 %v14732_v37 }
 0xf77   :  { %10644 = vmatpush1.bf16.msra.mxu1 %v14864_v52 }
 0xf78   :  { %10645 = vmatprep.subr.bf16.mxu1 %v14732_v37 }
 0xf7b   :  { %10647 = vmatpush1.bf16.msra.mxu1 %v14865_v59 }
 0xf7c   :  { %10648 = vmatprep.subr.bf16.mxu1 %v14732_v37 }
 0xf7f   :  { %10650 = vmatpush1.bf16.msra.mxu1 %v14866_v60 }
 0xf80   :  { %10651 = vmatprep.subr.bf16.mxu1 %v14732_v37 }
 0xf83   :  { %10653 = vmatpush1.bf16.msra.mxu1 %v12612_v11 }
 0xf84   :  { %10654 = vmatprep.subr.bf16.mxu1 %v14732_v37 }
 0xf87   :  { %10656 = vmatpush1.bf16.msra.mxu1 %v12622_v54 }
 0xf88   :  { %10657 = vmatprep.subr.bf16.mxu1 %v14732_v37 }
 0xf8b   :  { %10660 = vmatpush1.bf16.msk.msra.mxu1 %vm12020_vm8, %v14867_v2 }
 0xf8c   :  { %10718 = vmatprep.subr.bf16.mxu1 %v11441_v3  ;;  %v8771_v3 = vld [vmem:[%s14694_s21 + $0x61] sm:$0xff] }
 0xf8e   :  { %5747 = vmatmul.mubr.f32.vlgmr.msra.gmra.mrb[82].mxu1 %v5597_v33  ;;  %v14965_v33 = vld [vmem:[#allocation15_spill] sm:$0xff] }
 0xf8f   :  { %8754 = vmatprep.mubr.msk.f32.mxu1 %vm935_vm6, %v5600_v61  ;;  %10720 = vmatpush1.bf16.msra.mxu1 %v11452_v7  ;;  %v8772_v7 = vld [vmem:[%s14694_s21 + $0x69] sm:$0xff] }
 0xf90   :  { %10723 = vmatprep.subr.msk.bf16.mxu1 %vm11458_vm2, %v11454_v8  ;;  %v8773_v8 = vld [vmem:[%s14694_s21 + $0x71] sm:$0xff] }
 0xf91   :  { %v14966_v61 = vld [vmem:[#allocation18_spill] sm:$0xff] }
 0xf92   :  { %5752 = vmatmul.mubr.f32.gmra.mrb[84].mxu1 %v5599_v26  ;;  %v14958_v26 = vld [vmem:[#allocation17_spill] sm:$0xff] }
 0xf93   :  { %10726 = vmatpush1.bf16.msk.msra.mxu1 %vm11458_vm2, %v11472_v14  ;;  %6284 = vmatprep.mubr.f32.mxu1 %v14754_v49  ;;  %v8774_v14 = vld [vmem:[%s14694_s21 + $0x79] sm:$0x1] }
 0xf94   :  { %10728 = vmatprep.subr.bf16.mxu1 %v14868_v16  ;;  %v8767_v16 = vld [vmem:[%s14694_s21 + $0x60] sm:$0xff] }
 0xf96   :  { %8777 = vmatmul.mubr.msk.f32.vlgmr.msra.gmra.mrb[86].mxu1 %vm88_vm3, %v8771_v3  ;;  %v8799_v3 = vld [vmem:[%s14694_s21 + $0x73] sm:$0xff] }
 0xf97   :  { %6290 = vmatprep.mubr.f32.mxu1 %v14754_v49  ;;  %10730 = vmatpush1.bf16.msra.mxu1 %v14869_v32  ;;  %v14956_v32 = vld [vmem:[#allocation12_spill] sm:$0xff] }
 0xf98   :  { %10733 = vmatprep.subr.msk.bf16.mxu1 %vm11458_vm2, %v14870_v50  ;;  %v8769_v50 = vld [vmem:[%s14694_s21 + $0x70] sm:$0xff] }
 0xf9a   :  { %8778 = vmatmul.mubr.msk.f32.gmra.mrb[88].mxu1 %vm88_vm3, %v8772_v7  ;;  %v14967_v7 = vld [vmem:[#allocation20_spill] sm:$0xff] }
 0xf9b   :  { %6296 = vmatprep.mubr.f32.mxu1 %v14754_v49  ;;  %10736 = vmatpush1.bf16.msk.msra.mxu1 %vm11458_vm2, %v11526_v30  ;;  %v8768_v30 = vld [vmem:[%s14694_s21 + $0x68] sm:$0xff] }
 0xf9c   :  { %10738 = vmatprep.subr.bf16.mxu1 %v14871_v10  ;;  %v14957_v10 = vld [vmem:[#allocation16_spill] sm:$0xff] }
 0xf9e   :  { %8779 = vmatmul.mubr.msk.f32.gmra.mrb[90].mxu1 %vm88_vm3, %v8773_v8  ;;  %v8800_v8 = vld [vmem:[%s14694_s21 + $0x7b] sm:$0x1] }
 0xf9f   :  { %6302 = vmatprep.mubr.f32.mxu1 %v14754_v49 }
 0xfa2   :  { %8780 = vmatmul.mubr.msk.f32.gmra.mrb[92].mxu1 %vm88_vm3, %v8774_v14  ;;  %v14968_v14 = vld [vmem:[#allocation28_spill] sm:$0xff] }
 0xfa3   :  { %6385 = vmatprep.mubr.f32.mxu1 %v14754_v49 }
 0xfa6   :  { %8783 = vmatmul.mubr.msk.f32.vlgmr.msra.gmra.mrb[86].mxu1 %vm88_vm3, %v8767_v16  ;;  %v14969_v16 = vld [vmem:[#allocation79_spill] sm:$0xff] }
 0xfa7   :  { %6391 = vmatprep.mubr.f32.mxu1 %v14754_v49  ;;  %10740 = vmatpush1.bf16.msra.mxu1 %v11588_v47  ;;  %v8770_v47 = vld [vmem:[%s14694_s21 + $0x78] sm:$0x1] }
 0xfa8   :  { %10743 = vmatprep.subr.msk.bf16.mxu1 %vm11458_vm2, %v11591_v48  ;;  %v8787_v48 = vld [vmem:[%s14694_s21 + $0x62] sm:$0xff] }
 0xfaa   :  { %8784 = vmatmul.mubr.msk.f32.gmra.mrb[88].mxu1 %vm88_vm3, %v8768_v30 }
 0xfab   :  { %6397 = vmatprep.mubr.f32.mxu1 %v14754_v49  ;;  %10746 = vmatpush1.bf16.msk.msra.mxu1 %vm11458_vm2, %v11620_v57  ;;  %v8788_v57 = vld [vmem:[%s14694_s21 + $0x6a] sm:$0xff] }
 0xfac   :  { %10748 = vmatprep.subr.bf16.mxu1 %v14956_v32 }
 0xfae   :  { %8785 = vmatmul.mubr.msk.f32.gmra.mrb[90].mxu1 %vm88_vm3, %v8769_v50 }
 0xfaf   :  { %6403 = vmatprep.mubr.f32.mxu1 %v14754_v49 }
 0xfb2   :  { %8786 = vmatmul.mubr.msk.f32.gmra.mrb[92].mxu1 %vm88_vm3, %v8770_v47 }
 0xfb3   :  { %6490 = vmatprep.mubr.f32.mxu1 %v14754_v49 }
 0xfb6   :  { %8793 = vmatmul.mubr.msk.f32.vlgmr.msra.gmra.mrb[86].mxu1 %vm88_vm3, %v8787_v48 }
 0xfb7   :  { %6496 = vmatprep.mubr.f32.mxu1 %v14754_v49  ;;  %10750 = vmatpush1.bf16.msra.mxu1 %v14957_v10 }
 0xfb8   :  { %10753 = vmatprep.subr.msk.bf16.mxu1 %vm11458_vm2, %v14958_v26 }
 0xfba   :  { %8794 = vmatmul.mubr.msk.f32.gmra.mrb[88].mxu1 %vm88_vm3, %v8788_v57 }
 0xfbb   :  { %6502 = vmatprep.mubr.f32.mxu1 %v14754_v49  ;;  %10756 = vmatpush1.bf16.msk.msra.mxu1 %vm11458_vm2, %v14959_v58  ;;  %vm8153_vm2 = vcmask 687104  }
 0xfbc   :  { %10757 = vmatprep.subr.bf16.mxu1 %v14732_v37 }
 0xfbe   :  { %8795 = vmatmul.mubr.msk.f32.gmra.mrb[90].mxu1 %vm88_vm3, %v8789_v17 }
 0xfbf   :  { %6508 = vmatprep.mubr.f32.mxu1 %v14754_v49 }
 0xfc2   :  { %8796 = vmatmul.mubr.msk.f32.gmra.mrb[92].mxu1 %vm88_vm3, %v8790_v62 }
 0xfc3   :  { %6603 = vmatprep.mubr.f32.mxu1 %v14754_v49 }
 0xfc6   :  { %8803 = vmatmul.mubr.msk.f32.vlgmr.msra.gmra.mrb[86].mxu1 %vm88_vm3, %v8797_v55  ;;  %v13876_v55 = vld [vmem:[%s14446_s10] sm:$0xf] }
 0xfc7   :  { %6609 = vmatprep.mubr.f32.mxu1 %v14754_v49  ;;  %10759 = vmatpush1.bf16.msra.mxu1 %v14960_v9  ;;  %v13888_v9 = vld [vmem:[%s14446_s10 + $0x4] sm:$0xf] }
 0xfc8   :  { %10760 = vmatprep.subr.bf16.mxu1 %v14732_v37 }
 0xfca   :  { %8804 = vmatmul.mubr.msk.f32.gmra.mrb[88].mxu1 %vm88_vm3, %v8798_v63 }
 0xfcb   :  { %10762 = vmatpush1.bf16.msra.mxu1 %v14961_v29  ;;  %6615 = vmatprep.mubr.f32.mxu1 %v14754_v49  ;;  %v14970_v29 = vld [vmem:[#allocation83_spill] sm:$0xff] }
 0xfcc   :  { %10763 = vmatprep.subr.bf16.mxu1 %v14732_v37 }
 0xfce   :  { %8805 = vmatmul.mubr.msk.f32.gmra.mrb[90].mxu1 %vm88_vm3, %v8799_v3 }
 0xfcf   :  { %10765 = vmatpush1.bf16.msra.mxu1 %v14962_v39  ;;  %6621 = vmatprep.mubr.f32.mxu1 %v14754_v49  ;;  %v14971_v39 = vld [vmem:[#allocation84_spill] sm:$0xff] }
 0xfd0   :  { %10766 = vmatprep.subr.bf16.mxu1 %v14732_v37 }
 0xfd2   :  { %8806 = vmatmul.mubr.msk.f32.gmra.mrb[92].mxu1 %vm88_vm3, %v8800_v8  ;;  %vm8325_vm3 = vcmask 76800  }
 0xfd3   :  { %10768 = vmatpush1.bf16.msra.mxu1 %v14963_v23  ;;  %v14972_v23 = vld [vmem:[#allocation85_spill] sm:$0xff] }
 0xfd4   :  { %10769 = vmatprep.subr.bf16.mxu1 %v14732_v37 }
 0xfd7   :  { %10771 = vmatpush1.bf16.msra.mxu1 %v14964_v45  ;;  %v14973_v45 = vld [vmem:[#allocation86_spill] sm:$0xff] }
 0xfd8   :  { %10772 = vmatprep.subr.bf16.mxu1 %v14732_v37 }
 0xfdb   :  { %10774 = vmatpush1.bf16.msra.mxu1 %v14965_v33  ;;  %v13905_v33 = vld [vmem:[%s14449_s13 + $0x88] sm:$0xf] }
 0xfdc   :  { %10775 = vmatprep.subr.bf16.mxu1 %v14732_v37  ;;  %14974 = vst [vmem:[#allocation81_spill] sm:$0xff] %v13905_v33 }
 0xfdf   :  { %10777 = vmatpush1.bf16.msra.mxu1 %v14966_v61 }
 0xfe0   :  { %10778 = vmatprep.subr.bf16.mxu1 %v14732_v37 }
 0xfe3   :  { %10780 = vmatpush1.bf16.msra.mxu1 %v14967_v7 }
 0xfe4   :  { %10781 = vmatprep.subr.bf16.mxu1 %v14732_v37 }
 0xfe7   :  { %10783 = vmatpush1.bf16.msra.mxu1 %v14968_v14 }
 0xfe8   :  { %6700 = vmatprep.subr.mxu1 %v14754_v49 }
 0xfeb   :  { %8807 = vmatpush1.msk.msra.mxu1 %vm620_vm4, %v14969_v16 }
 0xfec   :  { %10811 = vmatprep.subr.bf16.mxu1 %v14732_v37 }
0x1039   :  { %v5673_v30 = vpop.f32.mrb[78].mxu1 }
0x103a   :  { %v5675_v32 = vpop.f32.mrb[79].mxu1 }
0x103b   :  { %v14975_v32 = vld [vmem:[#allocation25_spill] sm:$0xff] }
0x103d   :  { %v5678_v50 = vpop.f32.mrb[80].mxu1 }
0x103e   :  { %v5680_v47 = vpop.f32.mrb[81].mxu1 }
0x1061   :  { %v5748_v48 = vpop.f32.mrb[82].mxu1 }
0x1062   :  { %v5757_v57 = vmax.f32 %v5673_v30, %v5748_v48  ;;  %v5750_v10 = vpop.f32.mrb[83].mxu1 }
0x1065   :  { %v5753_v26 = vpop.f32.mrb[84].mxu1 }
0x1066   :  { %v5758_v17 = vmax.f32 %v5678_v50, %v5753_v26  ;;  %v5755_v58 = vpop.f32.mrb[85].mxu1 }
0x1068   :  { %v10662_v62 = vpack.c.bf16 %v5758_v17, %v5757_v57  ;;  %v14976_v57 = vld [vmem:[#allocation26_spill] sm:$0xff] }
0x106a   :  { %10664 = vmatpush3.bf16.msk.msra.mxu0 %vm12020_vm8, %v10662_v62 }
0x106b   :  { %10665 = vmatprep.subr.bf16.mxu0 %v14732_v37 }
0x106d   :  { %9444 = vmatmul.mubr.msk.f32.vlgmr.msra.gmra.mrb[84].mxu0 %vm1858_vm13, %v13876_v55 }
0x106e   :  { %10668 = vmatpush3.bf16.msk.msra.mxu0 %vm12020_vm8, %v10662_v62  ;;  %9450 = vmatprep.mubr.msk.f32.mxu0 %vm11330_vm12, %v14754_v49 }
0x106f   :  { %10669 = vmatprep.subr.bf16.mxu0 %v14732_v37 }
0x1071   :  { %9451 = vmatmul.mubr.msk.f32.vlgmr.msra.gmra.mrb[86].mxu0 %vm1858_vm13, %v13888_v9 }
0x1072   :  { %10671 = vmatpush3.bf16.msra.mxu0 %v14970_v29  ;;  %9471 = vmatprep.mubr.msk.f32.mxu0 %vm11330_vm12, %v14754_v49 }
0x1073   :  { %10672 = vmatprep.subr.bf16.mxu0 %v14732_v37 }
0x1076   :  { %10674 = vmatpush3.bf16.msra.mxu0 %v14971_v39 }
0x1077   :  { %10675 = vmatprep.subr.bf16.mxu0 %v14732_v37 }
0x107a   :  { %10677 = vmatpush3.bf16.msra.mxu0 %v14972_v23 }
0x107b   :  { %10678 = vmatprep.subr.bf16.mxu0 %v14732_v37 }
0x107e   :  { %10680 = vmatpush3.bf16.msra.mxu0 %v14973_v45 }
0x107f   :  { %9469 = vmatprep.subr.mxu0 %v14754_v49 }
0x1082   :  { %9470 = vmatpush3.msk.msra.mxu0 %vm101_vm0, %v13905_v33 }
0x1083   :  { %10681 = vmatprep.subr.bf16.mxu0 %v14732_v37 }
0x1099   :  { %v6605_v63 = vpop.f32.mrb[86].mxu1 }
0x109a   :  { %v6636_v61 = vadd.f32 %v6605_v63, %v11878_v42  ;;  %v6607_v3 = vpop.f32.mrb[87].mxu1 }
0x109b   :  { %v6637_v7 = vadd.f32 %v6607_v3, %v11882_v43 }
0x109c   :  { %v13912_v8 = vmax.f32 %v6636_v61, 0.0  ;;  %v14977_v61 = vld [vmem:[#allocation27_spill] sm:$0xff] }
0x109d   :  { %v13914_v14 = vmax.f32 %v6637_v7, 0.0  ;;  %v6611_v16 = vpop.f32.mrb[88].mxu1 }
0x109e   :  { %v6638_v30 = vadd.f32 %v6611_v16, %v11878_v42  ;;  %v14978_v16 = vld [vmem:[#allocation29_spill] sm:$0xff] }
0x109f   :  { %8808 = vmatprep.mubr.msk.f32.mxu1 %vm607_vm5, %v13914_v14 }
0x10a0   :  { %6729 = vmatmul.mubr.f32.vlgmr.msra.gmra.mrb[94].mxu1 %v13912_v8 }
0x10a1   :  { %10813 = vmatpush1.bf16.msra.mxu1 %v11750_v40  ;;  %v6613_v40 = vpop.f32.mrb[89].mxu1 }
0x10a2   :  { %10814 = vmatprep.subr.bf16.mxu1 %v14732_v37  ;;  %v6617_v50 = vpop.f32.mrb[90].mxu1 }
0x10a5   :  { %10816 = vmatpush1.bf16.msra.mxu1 %v14805_v21  ;;  %v6639_v21 = vadd.f32 %v6613_v40, %v11882_v43  ;;  %v14981_v40 = vld [vmem:[#allocation41_spill] sm:$0xff] }
0x10a6   :  { %10817 = vmatprep.subr.bf16.mxu1 %v14732_v37 }
0x10a7   :  { %v13934_v47 = vmax.f32 %v6639_v21, 0.0  ;;  %v14982_v21 = vld [vmem:[#allocation42_spill] sm:$0xff] }
0x10a9   :  { %10819 = vmatpush1.bf16.msra.mxu1 %v14806_v25  ;;  %v13932_v25 = vmax.f32 %v6638_v30, 0.0  ;;  %8809 = vmatprep.mubr.msk.f32.mxu1 %vm607_vm5, %v13934_v47  ;;  %v14980_v30 = vld [vmem:[#allocation40_spill] sm:$0xff] }
0x10aa   :  { %10820 = vmatprep.subr.bf16.mxu1 %v14732_v37 }
0x10ab   :  { %6734 = vmatmul.mubr.f32.gmra.mrb[96].mxu1 %v13932_v25 }
0x10ad   :  { %10822 = vmatpush1.bf16.msra.mxu1 %v14807_v22  ;;  %v6640_v22 = vadd.f32 %v6617_v50, %v11878_v42  ;;  %v14984_v50 = vld [vmem:[#allocation44_spill] sm:$0xff] }
0x10ae   :  { %10823 = vmatprep.subr.bf16.mxu1 %v14732_v37 }
0x10af   :  { %v13942_v10 = vmax.f32 %v6640_v22, 0.0  ;;  %v14985_v22 = vld [vmem:[#allocation45_spill] sm:$0xff] }
0x10b1   :  { %10825 = vmatpush1.bf16.msra.mxu1 %v14809_v31  ;;  %v6619_v31 = vpop.f32.mrb[91].mxu1 }
0x10b2   :  { %10826 = vmatprep.subr.bf16.mxu1 %v14732_v37  ;;  %v6641_v48 = vadd.f32 %v6619_v31, %v11882_v43  ;;  %v6623_v17 = vpop.f32.mrb[92].mxu1  ;;  %v14986_v31 = vld [vmem:[#allocation46_spill] sm:$0xff] }
0x10b3   :  { %v6625_v58 = vpop.f32.mrb[93].mxu1  ;;  %v6642_v62 = vadd.f32 %v6623_v17, %v11878_v42  ;;  %v11280_v42 = vld [vmem:[%s14698_s22 + $0x1c0] sm:$0x3f]  ;;  %v14987_v17 = vld [vmem:[#allocation47_spill] sm:$0xff] }
0x10b4   :  { %v13944_v26 = vmax.f32 %v6641_v48, 0.0  ;;  %v6643_v63 = vadd.f32 %v6625_v58, %v11882_v43  ;;  %v14979_v43 = vld [vmem:[#allocation39_spill] sm:$0xff] }
0x10b5   :  { %10828 = vmatpush1.bf16.msra.mxu1 %v14975_v32  ;;  %v13953_v3 = vmax.f32 %v6642_v62, 0.0  ;;  %v14983_v32 = vld [vmem:[#allocation43_spill] sm:$0xff] }
0x10b6   :  { %10829 = vmatprep.subr.bf16.mxu1 %v14732_v37  ;;  %8810 = vmatprep.mubr.msk.f32.mxu1 %vm607_vm5, %v13944_v26  ;;  %v13955_v7 = vmax.f32 %v6643_v63, 0.0  ;;  %v11281_v48 = vld [vmem:[%s14443_s7 + $0x118] sm:$0xff] }
0x10b7   :  { %6739 = vmatmul.mubr.f32.gmra.mrb[98].mxu1 %v13942_v10 }
0x10b8   :  { %8811 = vmatprep.mubr.msk.f32.mxu1 %vm607_vm5, %v13955_v7 }
0x10b9   :  { %10831 = vmatpush1.bf16.msra.mxu1 %v14976_v57  ;;  %v11282_v57 = vld [vmem:[%s14443_s7 + $0x110] sm:$0xff] }
0x10ba   :  { %10832 = vmatprep.subr.bf16.mxu1 %v14732_v37 }
0x10bb   :  { %6744 = vmatmul.mubr.f32.gmra.mrb[100].mxu1 %v13953_v3 }
0x10bc   :  { %8818 = vmatprep.mubr.msk.f32.mxu1 %vm607_vm5, %v13914_v14 }
0x10bd   :  { %10834 = vmatpush1.bf16.msra.mxu1 %v14977_v61 }
0x10be   :  { %10835 = vmatprep.subr.bf16.mxu1 %v14732_v37 }
0x10c1   :  { %10837 = vmatpush1.bf16.msra.mxu1 %v14978_v16 }
0x10c2   :  { %6874 = vmatprep.subr.mxu1 %v14754_v49 }
0x10c5   :  { %8817 = vmatpush1.msk.msra.mxu1 %vm620_vm4, %v11280_v42  ;;  %v13999_v42 = vld [vmem:[%s14447_s11] ss:$0 sm:$0xff] }
0x10c6   :  { %6903 = vmatmul.mubr.f32.vlgmr.msra.gmra.mrb[102].mxu1 %v13912_v8  ;;  %10869 = vmatprep.subr.bf16.mxu1 %v14979_v43  ;;  %14988 = vst [vmem:[#allocation82_spill] sm:$0xff] %v13999_v42 }
0x10c7   :  { %8819 = vmatprep.mubr.msk.f32.mxu1 %vm607_vm5, %v13934_v47  ;;  %10871 = vmatpush1.bf16.msra.mxu1 %v14980_v30  ;;  %v14005_v30 = vld [vmem:[%s14448_s12] ss:$0 sm:$0xff] }
0x10c8   :  { %10873 = vmatprep.subr.bf16.mxu1 %v14981_v40  ;;  %14989 = vst [vmem:[#allocation5_spill] sm:$0xff] %v14005_v30 }
0x10ca   :  { %6908 = vmatmul.mubr.f32.gmra.mrb[104].mxu1 %v13932_v25 }
0x10cb   :  { %8820 = vmatprep.mubr.msk.f32.mxu1 %vm607_vm5, %v13944_v26  ;;  %10875 = vmatpush1.bf16.msra.mxu1 %v14982_v21 }
0x10cc   :  { %10877 = vmatprep.subr.bf16.mxu1 %v14983_v32  ;;  %v14990_v32 = vld [vmem:[#allocation87_spill] sm:$0xff] }
0x10ce   :  { %6913 = vmatmul.mubr.f32.gmra.mrb[106].mxu1 %v13942_v10 }
0x10cf   :  { %8821 = vmatprep.mubr.msk.f32.mxu1 %vm607_vm5, %v13955_v7  ;;  %10879 = vmatpush1.bf16.msra.mxu1 %v14984_v50  ;;  %v14991_v50 = vld [vmem:[#allocation88_spill] sm:$0xff] }
0x10d0   :  { %10881 = vmatprep.subr.bf16.mxu1 %v14985_v22  ;;  %v14992_v22 = vld [vmem:[#allocation89_spill] sm:$0xff] }
0x10d2   :  { %6918 = vmatmul.mubr.f32.gmra.mrb[108].mxu1 %v13953_v3 }
0x10d3   :  { %10883 = vmatpush1.bf16.msra.mxu1 %v14986_v31  ;;  %7236 = vmatprep.mubr.f32.mxu1 %v14754_v49  ;;  %v14993_v31 = vld [vmem:[#allocation90_spill] sm:$0xff] }
0x10d4   :  { %7188 = vmatprep.subr.mxu1 %v11281_v48  ;;  %v14022_v48 = vld [vmem:[%s14449_s13 + $0x40] sm:$0xf] }
0x10d5   :  { %14994 = vst [vmem:[#allocation6_spill] sm:$0xff] %v14022_v48 }
0x10d7   :  { %7189 = vmatpush1.msra.mxu1 %v11282_v57  ;;  %v14995_v57 = vld [vmem:[#allocation92_spill] sm:$0xff] }
0x10d8   :  { %10885 = vmatprep.subr.bf16.mxu1 %v14987_v17  ;;  %v14996_v17 = vld [vmem:[#allocation93_spill] sm:$0xff] }
0x1140   :  { %v5828_v58 = vpop.f32.mrb[84].mxu0 }
0x1141   :  { %v9445_v62 = vpop.f32.mrb[85].mxu0 }
0x1142   :  { %v14998_v62 = vld [vmem:[#allocation95_spill] sm:$0xff] }
0x1144   :  { %v5898_v63 = vpop.f32.mrb[86].mxu0 }
0x1145   :  { %v5902_v61 = vmax.f32 %v5828_v58, %v5898_v63  ;;  %v9452_v16 = vpop.f32.mrb[87].mxu0  ;;  %v14997_v58 = vld [vmem:[#allocation94_spill] sm:$0xff] }
0x1146   :  { %v15000_v16 = vld [vmem:[#allocation97_spill] sm:$0xff] }
0x1147   :  { %v5903_v43 = vmul.f32 %v13999_v42, %v5902_v61  ;;  %v14041_v61 = vld [vmem:[%s14449_s13 + $0xd0] sm:$0xf] }
0x1148   :  { %14999 = vst [vmem:[#allocation7_spill] sm:$0xff] %v14041_v61 }
0x1149   :  { %v5904_v40 = vadd.f32 %v14005_v30, %v5903_v43  ;;  %v15001_v43 = vld [vmem:[#allocation98_spill] sm:$0xff] }
0x114b   :  { %v5906_v21 = vrot.slane %v5904_v40, 1  ;;  %v6051_v63 = vrot.slane %v5904_v40, 2 }
0x114d   :  { %9472 = vmatmul.mubr.msk.f32.vlgmr.msra.gmra.mrb[88].mxu0 %vm2048_vm14, %v5906_v21  ;;  %v15002_v21 = vld [vmem:[#allocation99_spill] sm:$0xff] }
0x114e   :  { %10683 = vmatpush3.bf16.msra.mxu0 %v14990_v32  ;;  %9492 = vmatprep.mubr.msk.f32.mxu0 %vm11330_vm12, %v14754_v49 }
0x114f   :  { %10684 = vmatprep.subr.bf16.mxu0 %v14732_v37 }
0x1152   :  { %10686 = vmatpush3.bf16.msra.mxu0 %v14991_v50 }
0x1153   :  { %10687 = vmatprep.subr.bf16.mxu0 %v14732_v37 }
0x1156   :  { %10689 = vmatpush3.bf16.msra.mxu0 %v14992_v22 }
0x1157   :  { %10690 = vmatprep.subr.bf16.mxu0 %v14732_v37 }
0x115a   :  { %10692 = vmatpush3.bf16.msra.mxu0 %v14993_v31 }
0x115b   :  { %9490 = vmatprep.subr.mxu0 %v14754_v49 }
0x115e   :  { %9491 = vmatpush3.msk.msra.mxu0 %vm101_vm0, %v14022_v48 }
0x115f   :  { %9493 = vmatmul.mubr.msk.f32.vlgmr.msra.gmra.mrb[88].mxu0 %vm2048_vm14, %v5904_v40  ;;  %10693 = vmatprep.subr.bf16.mxu0 %v14732_v37 }
0x1160   :  { %10695 = vmatpush3.bf16.msra.mxu0 %v14995_v57  ;;  %9513 = vmatprep.mubr.msk.f32.mxu0 %vm11330_vm12, %v14754_v49  ;;  %v15013_v57 = vld [vmem:[#allocation38_spill] sm:$0xff] }
0x1161   :  { %10696 = vmatprep.subr.bf16.mxu0 %v14732_v37 }
0x1164   :  { %10698 = vmatpush3.bf16.msra.mxu0 %v14996_v17  ;;  %v15012_v17 = vld [vmem:[#allocation37_spill] sm:$0xff] }
0x1165   :  { %10699 = vmatprep.subr.bf16.mxu0 %v14732_v37 }
0x1168   :  { %10701 = vmatpush3.bf16.msra.mxu0 %v14997_v58  ;;  %v14060_v58 = vld [vmem:[%s14449_s13 + $0x118] sm:$0xf] }
0x1169   :  { %10702 = vmatprep.subr.bf16.mxu0 %v14732_v37  ;;  %15004 = vst [vmem:[#allocation8_spill] sm:$0xff] %v14060_v58 }
0x116c   :  { %10704 = vmatpush3.bf16.msra.mxu0 %v14998_v62  ;;  %v6125_v62 = vrot.slane %v5904_v40, 3  ;;  %v15006_v40 = vld [vmem:[#allocation31_spill] sm:$0xff] }
0x116d   :  { %9511 = vmatprep.subr.mxu0 %v14754_v49 }
0x1170   :  { %9512 = vmatpush3.msk.msra.mxu0 %vm101_vm0, %v14041_v61  ;;  %v15003_v61 = vld [vmem:[#allocation100_spill] sm:$0xff] }
0x1171   :  { %9514 = vmatmul.mubr.msk.f32.vlgmr.msra.gmra.mrb[88].mxu0 %vm2048_vm14, %v6051_v63  ;;  %10705 = vmatprep.subr.bf16.mxu0 %v14732_v37 }
0x1172   :  { %10707 = vmatpush3.bf16.msra.mxu0 %v15000_v16  ;;  %9534 = vmatprep.mubr.msk.f32.mxu0 %vm11330_vm12, %v14754_v49 }
0x1173   :  { %10708 = vmatprep.subr.bf16.mxu0 %v14732_v37  ;;  %v6730_v63 = vpop.f32.mrb[94].mxu1 }
0x1174   :  { %v6732_v16 = vpop.f32.mrb[95].mxu1 }
0x1175   :  { %v15007_v16 = vld [vmem:[#allocation32_spill] sm:$0xff] }
0x1176   :  { %10710 = vmatpush3.bf16.msra.mxu0 %v15001_v43 }
0x1177   :  { %10711 = vmatprep.subr.bf16.mxu0 %v14732_v37 }
0x117a   :  { %10713 = vmatpush3.bf16.msra.mxu0 %v15002_v21  ;;  %v15005_v21 = vld [vmem:[#allocation30_spill] sm:$0xff] }
0x117b   :  { %10714 = vmatprep.subr.bf16.mxu0 %v14732_v37 }
0x117e   :  { %10716 = vmatpush3.bf16.msra.mxu0 %v15003_v61  ;;  %v15011_v61 = vld [vmem:[#allocation36_spill] sm:$0xff] }
0x117f   :  { %9532 = vmatprep.subr.mxu0 %v14754_v49 }
0x1182   :  { %9533 = vmatpush3.msk.msra.mxu0 %vm101_vm0, %v14060_v58  ;;  %v15008_v58 = vld [vmem:[#allocation33_spill] sm:$0xff] }
0x1183   :  { %9535 = vmatmul.mubr.msk.f32.vlgmr.msra.gmra.mrb[88].mxu0 %vm2048_vm14, %v6125_v62  ;;  %10784 = vmatprep.subr.bf16.mxu0 %v14732_v37  ;;  %v15009_v62 = vld [vmem:[#allocation34_spill] sm:$0xff] }
0x1184   :  { %10786 = vmatpush1.bf16.msra.mxu0 %v15005_v21  ;;  %8813 = vmatprep.mubr.msk.f32.mxu0 %vm607_vm5, %v13914_v14  ;;  %v15010_v21 = vld [vmem:[#allocation35_spill] sm:$0xff]  ;;  %v6735_v14 = vpop.f32.mrb[96].mxu1 }
0x1185   :  { %10787 = vmatprep.subr.bf16.mxu0 %v14732_v37 }
0x1188   :  { %10789 = vmatpush1.bf16.msra.mxu0 %v15006_v40  ;;  %v6737_v40 = vpop.f32.mrb[97].mxu1 }
0x1189   :  { %10790 = vmatprep.subr.bf16.mxu0 %v14732_v37 }
0x118c   :  { %10792 = vmatpush1.bf16.msra.mxu0 %v15007_v16  ;;  %v6740_v16 = vpop.f32.mrb[98].mxu1 }
0x118d   :  { %10793 = vmatprep.subr.bf16.mxu0 %v14732_v37  ;;  %v6742_v43 = vpop.f32.mrb[99].mxu1 }
0x1190   :  { %10795 = vmatpush1.bf16.msra.mxu0 %v15008_v58  ;;  %v6745_v58 = vpop.f32.mrb[100].mxu1 }
0x1191   :  { %10796 = vmatprep.subr.bf16.mxu0 %v14732_v37 }
0x1194   :  { %10798 = vmatpush1.bf16.msra.mxu0 %v15009_v62  ;;  %v6747_v62 = vpop.f32.mrb[101].mxu1 }
0x1195   :  { %10799 = vmatprep.subr.bf16.mxu0 %v14732_v37 }
0x1198   :  { %10801 = vmatpush1.bf16.msra.mxu0 %v15010_v21 }
0x1199   :  { %10802 = vmatprep.subr.bf16.mxu0 %v14732_v37  ;;  %v6904_v21 = vpop.f32.mrb[102].mxu1 }
0x119a   :  { %v6906_v48 = vpop.f32.mrb[103].mxu1 }
0x119c   :  { %10804 = vmatpush1.bf16.msra.mxu0 %v15011_v61  ;;  %v11288_v61 = vld [vmem:[%s14698_s22 + $0x128] sm:$0x3f] }
0x119d   :  { %10805 = vmatprep.subr.bf16.mxu0 %v14732_v37 }
0x11a0   :  { %10807 = vmatpush1.bf16.msra.mxu0 %v15012_v17  ;;  %v6909_v17 = vpop.f32.mrb[104].mxu1 }
0x11a1   :  { %10808 = vmatprep.subr.bf16.mxu0 %v14732_v37  ;;  %v6911_v43 = vpop.f32.mrb[105].mxu1 }
0x11a4   :  { %10810 = vmatpush1.bf16.msra.mxu0 %v15013_v57  ;;  %v6914_v57 = vpop.f32.mrb[106].mxu1 }
0x11a5   :  { %6785 = vmatprep.subr.mxu0 %v14754_v49  ;;  %v6916_v48 = vpop.f32.mrb[107].mxu1 }
0x11a6   :  { %v6919_v40 = vpop.f32.mrb[108].mxu1 }
0x11a7   :  { %v6921_v62 = vpop.f32.mrb[109].mxu1 }
0x11a8   :  { %8812 = vmatpush1.msk.msra.mxu0 %vm620_vm4, %v11288_v61  ;;  %v15014_v61 = vld [vmem:[#allocation80_spill] sm:$0xff] }
0x11a9   :  { %6814 = vmatmul.mubr.f32.vlgmr.msra.gmra.mrb[90].mxu0 %v13912_v8  ;;  %v11289_v8 = vld [vmem:[%s14440_s4] sm:$0xff] }
0x11aa   :  { %8814 = vmatprep.mubr.msk.f32.mxu0 %vm607_vm5, %v13934_v47 }
0x11ad   :  { %6819 = vmatmul.mubr.f32.gmra.mrb[92].mxu0 %v13932_v25 }
0x11ae   :  { %8815 = vmatprep.mubr.msk.f32.mxu0 %vm607_vm5, %v13944_v26 }
0x11b1   :  { %6824 = vmatmul.mubr.f32.gmra.mrb[94].mxu0 %v13942_v10 }
0x11b2   :  { %8816 = vmatprep.mubr.msk.f32.mxu0 %vm607_vm5, %v13955_v7 }
0x11b5   :  { %6829 = vmatmul.mubr.f32.gmra.mrb[96].mxu0 %v13953_v3 }
0x11b6   :  { %9545 = vmatprep.mubr.msk.f32.mxu0 %vm935_vm6, %v11289_v8 }
0x1256   :  { %v6194_v25 = vpop.f32.mrb[88].mxu0 }
0x1257   :  { %v8116_v47 = vrot.slane %v6194_v25, 6  ;;  %v9536_v26 = vpop.f32.mrb[89].mxu0 }
0x1259   :  { %v14105_v43 = vsel %vm8122_vm15, %v15014_v61, %v8116_v47 }
0x127c   :  { %v6815_v10 = vpop.f32.mrb[90].mxu0 }
0x127d   :  { %v6834_v48 = vmax.f32 %v6730_v63, %v6815_v10  ;;  %v6817_v7 = vpop.f32.mrb[91].mxu0 }
0x127f   :  { %v6923_v31 = vmax.f32 %v6834_v48, %v6904_v21  ;;  %v11295_v48 = vld [vmem:[%s14441_s5] ss:$0 sm:$0xff] }
0x1280   :  { %v6820_v62 = vpop.f32.mrb[92].mxu0 }
0x1281   :  { %v6835_v22 = vmax.f32 %v6735_v14, %v6820_v62  ;;  %v6822_v3 = vpop.f32.mrb[93].mxu0 }
0x1282   :  { %v11296_v3 = vld [vmem:[%s14442_s6] ss:$0 sm:$0xff] }
0x1283   :  { %v6924_v50 = vmax.f32 %v6835_v22, %v6909_v17  ;;  %v15016_v22 = vld [vmem:[#allocation53_spill] sm:$0xff] }
0x1284   :  { %v6825_v32 = vpop.f32.mrb[94].mxu0 }
0x1285   :  { %v10838_v30 = vpack.c.bf16 %v6924_v50, %v6923_v31  ;;  %v6836_v42 = vmax.f32 %v6740_v16, %v6825_v32  ;;  %v6827_v33 = vpop.f32.mrb[95].mxu0  ;;  %v11290_v32 = vld [vmem:[%s14440_s4 + $0x8] sm:$0xf] }
0x1286   :  { %v11292_v33 = vld [vmem:[%s14440_s4 + $0x18] sm:$0xf]  ;;  %v11294_v50 = vld [vmem:[%s14440_s4 + $0x28] sm:$0xf] }
0x1287   :  { %v6925_v8 = vmax.f32 %v6836_v42, %v6914_v57  ;;  %10839 = vmatprep.subr.bf16.mxu0 %v10838_v30  ;;  %v11293_v42 = vld [vmem:[%s14440_s4 + $0x20] sm:$0xff] }
0x1288   :  { %v6830_v45 = vpop.f32.mrb[96].mxu0  ;;  %10841 = vmatpush3.bf16.msra.mxu0 %v10838_v30 }
0x1289   :  { %v6837_v25 = vmax.f32 %v6745_v58, %v6830_v45  ;;  %v6832_v26 = vpop.f32.mrb[97].mxu0  ;;  %v11291_v45 = vld [vmem:[%s14440_s4 + $0x10] sm:$0xff] }
0x128b   :  { %v6926_v47 = vmax.f32 %v6837_v25, %v6919_v40 }
0x128d   :  { %v10842_v61 = vpack.c.bf16 %v6926_v47, %v6925_v8 }
0x128f   :  { %10844 = vmatprep.subr.msk.bf16.mxu0 %vm12020_vm8, %v10842_v61 }
0x1290   :  { %10847 = vmatpush3.bf16.msk.msra.mxu0 %vm12020_vm8, %v10842_v61 }
0x1291   :  { %10849 = vmatprep.subr.bf16.mxu0 %v10838_v30 }
0x1293   :  { %9546 = vmatmul.mubr.msk.f32.vlgmr.msra.gmra.mrb[98].mxu0 %vm935_vm6, %v11290_v32 }
0x1294   :  { %10851 = vmatpush3.bf16.msra.mxu0 %v10838_v30  ;;  %9556 = vmatprep.mubr.msk.f32.mxu0 %vm935_vm6, %v11291_v45 }
0x1295   :  { %10854 = vmatprep.subr.msk.bf16.mxu0 %vm12020_vm8, %v10842_v61 }
0x1298   :  { %10857 = vmatpush3.bf16.msk.msra.mxu0 %vm12020_vm8, %v10842_v61 }
0x1299   :  { %10859 = vmatprep.subr.bf16.mxu0 %v10838_v30 }
0x129b   :  { %9557 = vmatmul.mubr.msk.f32.vlgmr.msra.gmra.mrb[100].mxu0 %vm935_vm6, %v11292_v33 }
0x129c   :  { %10861 = vmatpush3.bf16.msra.mxu0 %v10838_v30  ;;  %9567 = vmatprep.mubr.msk.f32.mxu0 %vm935_vm6, %v11293_v42  ;;  %v15015_v30 = vld [vmem:[#allocation52_spill] sm:$0xff] }
0x129d   :  { %10864 = vmatprep.subr.msk.bf16.mxu0 %vm12020_vm8, %v10842_v61 }
0x12a0   :  { %10867 = vmatpush3.bf16.msk.msra.mxu0 %vm12020_vm8, %v10842_v61 }
0x12a1   :  { %10932 = vmatprep.subr.bf16.mxu0 %v14732_v37 }
0x12a3   :  { %9568 = vmatmul.mubr.msk.f32.vlgmr.msra.gmra.mrb[102].mxu0 %vm935_vm6, %v11294_v50 }
0x12a4   :  { %10934 = vmatpush1.bf16.msra.mxu0 %v14920_v53  ;;  %v15017_v53 = vld [vmem:[#allocation54_spill] sm:$0xff] }
0x12a5   :  { %10935 = vmatprep.subr.bf16.mxu0 %v14732_v37 }
0x12a8   :  { %10937 = vmatpush1.bf16.msra.mxu0 %v14921_v35  ;;  %v15018_v35 = vld [vmem:[#allocation55_spill] sm:$0xff] }
0x12a9   :  { %10938 = vmatprep.subr.bf16.mxu0 %v14732_v37 }
0x12ac   :  { %10940 = vmatpush1.bf16.msra.mxu0 %v14922_v19  ;;  %v15019_v19 = vld [vmem:[#allocation56_spill] sm:$0xff] }
0x12ad   :  { %10941 = vmatprep.subr.bf16.mxu0 %v14732_v37 }
0x12b0   :  { %10943 = vmatpush1.bf16.msra.mxu0 %v14923_v46  ;;  %v15020_v46 = vld [vmem:[#allocation78_spill] sm:$0xff] }
0x12b1   :  { %10944 = vmatprep.subr.bf16.mxu0 %v14732_v37 }
0x12b4   :  { %10946 = vmatpush1.bf16.msra.mxu0 %v15015_v30 }
0x12b5   :  { %10947 = vmatprep.subr.bf16.mxu0 %v14732_v37 }
0x12b8   :  { %10949 = vmatpush1.bf16.msra.mxu0 %v15016_v22  ;;  %v15030_v22 = vld [vmem:[#allocation77_spill] sm:$0xff] }
0x12b9   :  { %10950 = vmatprep.subr.bf16.mxu0 %v14732_v37 }
0x12bc   :  { %10952 = vmatpush1.bf16.msra.mxu0 %v15017_v53  ;;  %v11301_v53 = vld [vmem:[%s14443_s7 + $0x238] sm:$0xff] }
0x12bd   :  { %10953 = vmatprep.subr.bf16.mxu0 %v14732_v37 }
0x12c0   :  { %10955 = vmatpush1.bf16.msra.mxu0 %v15018_v35  ;;  %v11302_v35 = vld [vmem:[%s14443_s7 + $0x230] sm:$0xff] }
0x12c1   :  { %10956 = vmatprep.subr.bf16.mxu0 %v14732_v37 }
0x12c4   :  { %10958 = vmatpush1.bf16.msra.mxu0 %v15019_v19 }
0x12c5   :  { %10959 = vmatprep.subr.bf16.mxu0 %v14732_v37 }
0x12c8   :  { %10962 = vmatpush1.bf16.msk.msra.mxu0 %vm12020_vm8, %v15020_v46 }
0x12c9   :  { %10963 = vmatprep.subr.bf16.mxu0 %v14732_v37 }
0x1366   :  { %v9547_v31 = vpop.f32.mrb[98].mxu0 }
0x1367   :  { %v6996_v63 = vpop.f32.mrb[99].mxu0 }
0x136e   :  { %v9558_v14 = vpop.f32.mrb[100].mxu0 }
0x136f   :  { %v7081_v16 = vmax.f32 %v9547_v31, %v9558_v14  ;;  %v7071_v58 = vpop.f32.mrb[101].mxu0 }
0x1370   :  { %v7080_v21 = vmax.f32 %v6996_v63, %v7071_v58 }
0x1376   :  { %v9569_v17 = vpop.f32.mrb[102].mxu0 }
0x1377   :  { %v7158_v57 = vmax.f32 %v7081_v16, %v9569_v17  ;;  %v7148_v40 = vpop.f32.mrb[103].mxu0 }
0x1378   :  { %v7157_v10 = vmax.f32 %v7080_v21, %v7148_v40 }
0x1379   :  { %v7160_v7 = vmul.f32 %v11295_v48, %v7158_v57 }
0x137a   :  { %v7159_v62 = vmul.f32 %v11295_v48, %v7157_v10 }
0x137b   :  { %v7162_v8 = vadd.f32 %v11296_v3, %v7160_v7  ;;  %v8139_v7 = vld [vmem:[%s14451_s15 + $0x20] sm:$0xff] }
0x137c   :  { %v7161_v25 = vadd.f32 %v11296_v3, %v7159_v62  ;;  %v8140_v62 = vld [vmem:[%s14451_s15 + $0x28] sm:$0xff] }
0x137d   :  { %v7166_v26 = vrot.slane %v7162_v8, 1  ;;  %v7331_v47 = vrot.slane %v7162_v8, 2  ;;  %v7419_v61 = vrot.slane %v7162_v8, 3  ;;  %v11057_v3 = vpack.c.bf16 %v8140_v62, %v8139_v7 }
0x137e   :  { %v7165_v32 = vrot.slane %v7161_v25, 1  ;;  %v7330_v45 = vrot.slane %v7161_v25, 2  ;;  %v7418_v33 = vrot.slane %v7161_v25, 3 }
0x1380   :  { %v7167_v42 = vsel %vm1250_vm9, %v7165_v32, %v7166_v26  ;;  %v7332_v50 = vsel %vm620_vm4, %v7330_v45, %v7331_v47  ;;  %v7420_v30 = vsel %vm1543_vm10, %v7418_v33, %v7419_v61 }
0x1381   :  { %8831 = vmatmul.mubr.msk.f32.vlgmr.msra.gmra.mrb[110].mxu1 %vm1254_vm11, %v7167_v42  ;;  %v15033_v42 = vld [vmem:[#allocation82_spill] sm:$0xff] }
0x1382   :  { %10887 = vmatpush1.bf16.msra.mxu1 %v12248_v1  ;;  %7242 = vmatprep.mubr.f32.mxu1 %v14754_v49  ;;  %v11297_v1 = vld [vmem:[%s14443_s7 + $0x88] sm:$0xff] }
0x1383   :  { %10889 = vmatprep.subr.bf16.mxu1 %v14837_v41  ;;  %v11298_v41 = vld [vmem:[%s14443_s7 + $0x80] sm:$0xff] }
0x1385   :  { %8832 = vmatmul.mubr.msk.f32.gmra.mrb[112].mxu1 %vm1254_vm11, %v7166_v26 }
0x1386   :  { %10891 = vmatpush1.bf16.msra.mxu1 %v14838_v34  ;;  %7317 = vmatprep.mubr.f32.mxu1 %v14754_v49  ;;  %v15021_v34 = vld [vmem:[#allocation68_spill] sm:$0xff] }
0x1387   :  { %10893 = vmatprep.subr.bf16.mxu1 %v14931_v13  ;;  %v15022_v13 = vld [vmem:[#allocation69_spill] sm:$0xff] }
0x138a   :  { %10895 = vmatpush1.bf16.msra.mxu1 %v14932_v15  ;;  %v11300_v15 = vld [vmem:[%s14443_s7 + $0x1a0] sm:$0xff] }
0x138b   :  { %10897 = vmatprep.subr.bf16.mxu1 %v14933_v24  ;;  %v15023_v24 = vld [vmem:[#allocation70_spill] sm:$0xff] }
0x138e   :  { %10899 = vmatpush1.bf16.msra.mxu1 %v14934_v4  ;;  %v15024_v4 = vld [vmem:[#allocation71_spill] sm:$0xff] }
0x138f   :  { %7269 = vmatprep.subr.mxu1 %v11297_v1 }
0x1392   :  { %7270 = vmatpush1.msra.mxu1 %v11298_v41 }
0x1393   :  { %8833 = vmatmul.mubr.msk.f32.vlgmr.msra.gmra.mrb[110].mxu1 %vm1254_vm11, %v7161_v25  ;;  %10901 = vmatprep.subr.bf16.mxu1 %v12347_v38  ;;  %v11299_v38 = vld [vmem:[%s14443_s7 + $0x1a8] sm:$0xff]  ;;  %v8142_v25 = vld [vmem:[%s14451_s15 + $0x38] sm:$0xff] }
0x1394   :  { %10903 = vmatpush1.bf16.msra.mxu1 %v14937_v28  ;;  %7323 = vmatprep.mubr.f32.mxu1 %v14754_v49  ;;  %v15025_v28 = vld [vmem:[#allocation72_spill] sm:$0xff] }
0x1395   :  { %10905 = vmatprep.subr.bf16.mxu1 %v14938_v18  ;;  %v15026_v18 = vld [vmem:[#allocation73_spill] sm:$0xff] }
0x1397   :  { %8834 = vmatmul.mubr.msk.f32.gmra.mrb[112].mxu1 %vm1254_vm11, %v7162_v8  ;;  %v8141_v8 = vld [vmem:[%s14451_s15 + $0x30] sm:$0xff] }
0x1398   :  { %10907 = vmatpush1.bf16.msra.mxu1 %v14939_v20  ;;  %7401 = vmatprep.mubr.f32.mxu1 %v14754_v49  ;;  %v15027_v20 = vld [vmem:[#allocation74_spill] sm:$0xff]  ;;  %v11060_v26 = vpack.c.bf16 %v8142_v25, %v8141_v8 }
0x1399   :  { %10909 = vmatprep.subr.bf16.mxu1 %v14940_v27  ;;  %v15028_v27 = vld [vmem:[#allocation75_spill] sm:$0xff] }
0x139c   :  { %10911 = vmatpush1.bf16.msra.mxu1 %v14941_v51  ;;  %v15029_v51 = vld [vmem:[#allocation76_spill] sm:$0xff] }
0x139d   :  { %10913 = vmatprep.subr.bf16.mxu1 %v15021_v34  ;;  %v15035_v34 = vld [vmem:[#allocation87_spill] sm:$0xff] }
0x13a0   :  { %10915 = vmatpush1.bf16.msra.mxu1 %v15022_v13  ;;  %v15036_v13 = vld [vmem:[#allocation88_spill] sm:$0xff] }
0x13a1   :  { %7353 = vmatprep.subr.mxu1 %v11299_v38  ;;  %v15037_v38 = vld [vmem:[#allocation89_spill] sm:$0xff] }
0x13a4   :  { %7354 = vmatpush1.msra.mxu1 %v11300_v15  ;;  %v15038_v15 = vld [vmem:[#allocation90_spill] sm:$0xff] }
0x13a5   :  { %8835 = vmatmul.mubr.msk.f32.vlgmr.msra.gmra.mrb[110].mxu1 %vm1254_vm11, %v7332_v50  ;;  %10917 = vmatprep.subr.bf16.mxu1 %v15023_v24  ;;  %v15039_v24 = vld [vmem:[#allocation6_spill] sm:$0xff] }
0x13a6   :  { %10919 = vmatpush1.bf16.msra.mxu1 %v15024_v4  ;;  %7407 = vmatprep.mubr.f32.mxu1 %v14754_v49  ;;  %v15040_v4 = vld [vmem:[#allocation92_spill] sm:$0xff] }
0x13a7   :  { %10921 = vmatprep.subr.bf16.mxu1 %v15025_v28  ;;  %v15041_v28 = vld [vmem:[#allocation93_spill] sm:$0xff] }
0x13a9   :  { %8836 = vmatmul.mubr.msk.f32.gmra.mrb[112].mxu1 %vm1254_vm11, %v7331_v47 }
0x13aa   :  { %10923 = vmatpush1.bf16.msra.mxu1 %v15026_v18  ;;  %7489 = vmatprep.mubr.f32.mxu1 %v14754_v49  ;;  %v15042_v18 = vld [vmem:[#allocation94_spill] sm:$0xff] }
0x13ab   :  { %10925 = vmatprep.subr.bf16.mxu1 %v15027_v20  ;;  %v15043_v20 = vld [vmem:[#allocation95_spill] sm:$0xff] }
0x13ae   :  { %10927 = vmatpush1.bf16.msra.mxu1 %v15028_v27 }
0x13af   :  { %10929 = vmatprep.subr.bf16.mxu1 %v15029_v51  ;;  %v15044_v51 = vld [vmem:[#allocation7_spill] sm:$0xff] }
0x13b2   :  { %10931 = vmatpush1.bf16.msra.mxu1 %v15030_v22  ;;  %v15045_v22 = vld [vmem:[#allocation97_spill] sm:$0xff] }
0x13b3   :  { %7441 = vmatprep.subr.mxu1 %v11301_v53  ;;  %v15046_v53 = vld [vmem:[#allocation98_spill] sm:$0xff] }
0x13b6   :  { %7442 = vmatpush1.msra.mxu1 %v11302_v35  ;;  %v15047_v35 = vld [vmem:[#allocation99_spill] sm:$0xff] }
0x13b7   :  { %8837 = vmatmul.mubr.msk.f32.vlgmr.msra.gmra.mrb[110].mxu1 %vm1254_vm11, %v7420_v30  ;;  %10994 = vmatprep.subr.bf16.mxu1 %v14732_v37  ;;  %v15034_v30 = vld [vmem:[#allocation5_spill] sm:$0xff] }
0x13b8   :  { %7495 = vmatprep.mubr.f32.mxu1 %v14754_v49 }
0x13bb   :  { %8838 = vmatmul.mubr.msk.f32.gmra.mrb[112].mxu1 %vm1254_vm11, %v7419_v61 }
0x13bc   :  { %9574 = vmatprep.mubr.msk.f32.mxu1 %vm11330_vm12, %v14754_v49 }
0x148a   :  { %v7491_v19 = vpop.f32.mrb[110].mxu1 }
0x148b   :  { %v7506_v46 = vadd.f32 %v7491_v19, %v12521_v56  ;;  %v7493_v31 = vpop.f32.mrb[111].mxu1  ;;  %v15048_v19 = vld [vmem:[#allocation100_spill] sm:$0xff] }
0x148c   :  { %v7507_v63 = vadd.f32 %v7493_v31, %v12525_v0  ;;  %v15049_v31 = vld [vmem:[#allocation8_spill] sm:$0xff] }
0x148d   :  { %v7510_v58 = vmax.f32 %v7506_v46, 0.0 }
0x148e   :  { %v7511_v14 = vmax.f32 %v7507_v63, 0.0  ;;  %v7497_v16 = vpop.f32.mrb[112].mxu1  ;;  %v8143_v63 = vld [vmem:[%s14451_s15 + $0x40] sm:$0xff] }
0x148f   :  { %v7508_v21 = vadd.f32 %v7497_v16, %v12521_v56  ;;  %v7499_v17 = vpop.f32.mrb[113].mxu1 }
0x1490   :  { %v7509_v57 = vadd.f32 %v7499_v17, %v12525_v0  ;;  %8840 = vmatprep.mubr.msk.f32.mxu0 %vm935_vm6, %v7511_v14 }
0x1491   :  { %7585 = vmatmul.mubr.f32.vlgmr.msra.gmra.mrb[104].mxu0 %v7510_v58  ;;  %v7512_v10 = vmax.f32 %v7508_v21, 0.0 }
0x1492   :  { %v7513_v40 = vmax.f32 %v7509_v57, 0.0  ;;  %10965 = vmatpush1.bf16.msra.mxu0 %v12537_v36  ;;  %v8857_v57 = vld [vmem:[%s14450_s14] ss:$0 sm:$0xff] }
0x1493   :  { %10966 = vmatprep.subr.bf16.mxu0 %v14732_v37 }
0x1494   :  { %8841 = vmatprep.mubr.msk.f32.mxu0 %vm935_vm6, %v7513_v40 }
0x1495   :  { %7590 = vmatmul.mubr.f32.gmra.mrb[106].mxu0 %v7512_v10 }
0x1496   :  { %10968 = vmatpush1.bf16.msra.mxu0 %v12550_v44  ;;  %8843 = vmatprep.mubr.msk.f32.mxu0 %vm935_vm6, %v7511_v14  ;;  %v8144_v14 = vld [vmem:[%s14451_s15 + $0x48] sm:$0xff] }
0x1497   :  { %10969 = vmatprep.subr.bf16.mxu0 %v14732_v37  ;;  %v11063_v16 = vpack.c.bf16 %v8144_v14, %v8143_v63 }
0x149a   :  { %10971 = vmatpush1.bf16.msra.mxu0 %v12562_v12 }
0x149b   :  { %10972 = vmatprep.subr.bf16.mxu0 %v14732_v37 }
0x149e   :  { %10974 = vmatpush1.bf16.msra.mxu0 %v12572_v6 }
0x149f   :  { %10975 = vmatprep.subr.bf16.mxu0 %v14732_v37 }
0x14a2   :  { %10977 = vmatpush1.bf16.msra.mxu0 %v14864_v52 }
0x14a3   :  { %10978 = vmatprep.subr.bf16.mxu0 %v14732_v37 }
0x14a6   :  { %10980 = vmatpush1.bf16.msra.mxu0 %v14865_v59 }
0x14a7   :  { %10981 = vmatprep.subr.bf16.mxu0 %v14732_v37 }
0x14aa   :  { %10983 = vmatpush1.bf16.msra.mxu0 %v14866_v60 }
0x14ab   :  { %10984 = vmatprep.subr.bf16.mxu0 %v14732_v37 }
0x14ae   :  { %10986 = vmatpush1.bf16.msra.mxu0 %v12612_v11 }
0x14af   :  { %10987 = vmatprep.subr.bf16.mxu0 %v14732_v37 }
0x14b2   :  { %10989 = vmatpush1.bf16.msra.mxu0 %v12622_v54 }
0x14b3   :  { %10990 = vmatprep.subr.bf16.mxu0 %v14732_v37 }
0x14b6   :  { %10993 = vmatpush1.bf16.msk.msra.mxu0 %vm12020_vm8, %v14867_v2  ;;  %v15032_v2 = vld [vmem:[#allocation81_spill] sm:$0xff] }
0x14b7   :  { %11050 = vmatprep.subr.bf16.mxu0 %v14732_v37 }
0x14b9   :  { %7660 = vmatmul.mubr.f32.vlgmr.msra.gmra.mrb[108].mxu0 %v7510_v58  ;;  %v8145_v58 = vld [vmem:[%s14451_s15 + $0x50] sm:$0xf] }
0x14ba   :  { %8844 = vmatprep.mubr.msk.f32.mxu0 %vm935_vm6, %v7513_v40 }
0x14bd   :  { %7665 = vmatmul.mubr.f32.gmra.mrb[110].mxu0 %v7512_v10  ;;  %v8231_v10 = vld [vmem:[%s14453_s17] sm:$0xff] }
0x14be   :  { %9690 = vmatprep.mubr.msk.f32.mxu0 %vm11330_vm12, %v14754_v49 }
0x1564   :  { %v7586_v56 = vpop.f32.mrb[104].mxu0 }
0x1565   :  { %v7588_v0 = vpop.f32.mrb[105].mxu0 }
0x1568   :  { %v7591_v36 = vpop.f32.mrb[106].mxu0 }
0x1569   :  { %v7593_v44 = vpop.f32.mrb[107].mxu0 }
0x158c   :  { %v7661_v12 = vpop.f32.mrb[108].mxu0 }
0x158d   :  { %v7670_v6 = vmax.f32 %v7586_v56, %v7661_v12  ;;  %v7663_v11 = vpop.f32.mrb[109].mxu0  ;;  %v8232_v56 = vld [vmem:[%s14453_s17 + $0x8] sm:$0xff] }
0x158e   :  { %v11066_v44 = vpack.c.bf16 %v8232_v56, %v8231_v10  ;;  %v8234_v11 = vld [vmem:[%s14453_s17 + $0x18] sm:$0xff] }
0x1590   :  { %v7666_v54 = vpop.f32.mrb[110].mxu0 }
0x1591   :  { %v7671_v52 = vmax.f32 %v7591_v36, %v7666_v54  ;;  %v7668_v59 = vpop.f32.mrb[111].mxu0 }
0x1593   :  { %v10995_v60 = vpack.c.bf16 %v7671_v52, %v7670_v6  ;;  %v8233_v6 = vld [vmem:[%s14453_s17 + $0x10] sm:$0xff]  ;;  %v8236_v52 = vld [vmem:[%s14453_s17 + $0x28] sm:$0xff] }
0x1594   :  { %v11069_v54 = vpack.c.bf16 %v8234_v11, %v8233_v6 }
0x1595   :  { %10997 = vmatpush3.bf16.msk.msra.mxu1 %vm12020_vm8, %v10995_v60 }
0x1596   :  { %10998 = vmatprep.subr.bf16.mxu1 %v14732_v37 }
0x1598   :  { %9575 = vmatmul.mubr.msk.f32.vlgmr.msra.gmra.mrb[114].mxu1 %vm1858_vm13, %v13876_v55  ;;  %v8135_v55 = vld [vmem:[%s14451_s15] sm:$0xff] }
0x1599   :  { %11001 = vmatpush3.bf16.msk.msra.mxu1 %vm12020_vm8, %v10995_v60  ;;  %9581 = vmatprep.mubr.msk.f32.mxu1 %vm11330_vm12, %v14754_v49  ;;  %v8237_v60 = vld [vmem:[%s14453_s17 + $0x30] sm:$0xff] }
0x159a   :  { %11002 = vmatprep.subr.bf16.mxu1 %v14732_v37 }
0x159c   :  { %9582 = vmatmul.mubr.msk.f32.vlgmr.msra.gmra.mrb[116].mxu1 %vm1858_vm13, %v13888_v9  ;;  %v8136_v9 = vld [vmem:[%s14451_s15 + $0x8] sm:$0xff] }
0x159d   :  { %11004 = vmatpush3.bf16.msra.mxu1 %v14970_v29  ;;  %9602 = vmatprep.mubr.msk.f32.mxu1 %vm11330_vm12, %v14754_v49  ;;  %v8137_v29 = vld [vmem:[%s14451_s15 + $0x10] sm:$0xff] }
0x159e   :  { %11005 = vmatprep.subr.bf16.mxu1 %v14732_v37 }
0x15a1   :  { %11007 = vmatpush3.bf16.msra.mxu1 %v14971_v39  ;;  %v11051_v39 = vpack.c.bf16 %v8136_v9, %v8135_v55  ;;  %v8239_v55 = vld [vmem:[%s14453_s17 + $0x40] sm:$0xff]  ;;  %v8240_v9 = vld [vmem:[%s14453_s17 + $0x48] sm:$0xff] }
0x15a2   :  { %11008 = vmatprep.subr.bf16.mxu1 %v14732_v37 }
0x15a3   :  { %11052 = vmatpush3.bf16.msra.mxu0 %v11051_v39  ;;  %v8241_v39 = vld [vmem:[%s14453_s17 + $0x50] sm:$0xf] }
0x15a4   :  { %11053 = vmatprep.subr.bf16.mxu0 %v14732_v37 }
0x15a5   :  { %11010 = vmatpush3.bf16.msra.mxu1 %v14972_v23  ;;  %v8138_v23 = vld [vmem:[%s14451_s15 + $0x18] sm:$0xff] }
0x15a6   :  { %11011 = vmatprep.subr.bf16.mxu1 %v14732_v37  ;;  %v11054_v48 = vpack.c.bf16 %v8138_v23, %v8137_v29  ;;  %v11078_v29 = vpack.c.bf16 %v8240_v9, %v8239_v55 }
0x15a8   :  { %11055 = vmatpush3.bf16.msra.mxu0 %v11054_v48 }
0x15a9   :  { %11013 = vmatpush3.bf16.msra.mxu1 %v15031_v5  ;;  %11056 = vmatprep.subr.bf16.mxu0 %v14732_v37  ;;  %v8238_v5 = vld [vmem:[%s14453_s17 + $0x38] sm:$0xff] }
0x15aa   :  { %9600 = vmatprep.subr.mxu1 %v14754_v49 }
0x15ac   :  { %11058 = vmatpush3.bf16.msra.mxu0 %v11057_v3 }
0x15ad   :  { %9601 = vmatpush3.msk.msra.mxu1 %vm101_vm0, %v15032_v2  ;;  %11059 = vmatprep.subr.bf16.mxu0 %v14732_v37  ;;  %v11075_v2 = vpack.c.bf16 %v8238_v5, %v8237_v60 }
0x15ae   :  { %11014 = vmatprep.subr.bf16.mxu1 %v14732_v37 }
0x15b0   :  { %11061 = vmatpush3.bf16.msra.mxu0 %v11060_v26 }
0x15b1   :  { %11062 = vmatprep.subr.bf16.mxu0 %v14732_v37 }
0x15b4   :  { %11064 = vmatpush3.bf16.msra.mxu0 %v11063_v16 }
0x15b5   :  { %9688 = vmatprep.subr.mxu0 %v14754_v49 }
0x15b8   :  { %9689 = vmatpush3.msk.msra.mxu0 %vm101_vm0, %v8145_v58 }
0x15b9   :  { %11065 = vmatprep.subr.bf16.mxu0 %v14732_v37 }
0x166b   :  { %v7741_v47 = vpop.f32.mrb[114].mxu1 }
0x166c   :  { %v9576_v61 = vpop.f32.mrb[115].mxu1 }
0x166f   :  { %v7811_v32 = vpop.f32.mrb[116].mxu1 }
0x1670   :  { %v7815_v45 = vmax.f32 %v7741_v47, %v7811_v32  ;;  %v9583_v33 = vpop.f32.mrb[117].mxu1 }
0x1672   :  { %v7816_v50 = vmul.f32 %v15033_v42, %v7815_v45 }
0x1674   :  { %v7817_v1 = vadd.f32 %v15034_v30, %v7816_v50 }
0x1676   :  { %v7819_v41 = vrot.slane %v7817_v1, 1  ;;  %v7964_v27 = vrot.slane %v7817_v1, 2  ;;  %v8038_v46 = vrot.slane %v7817_v1, 3 }
0x1678   :  { %9603 = vmatmul.mubr.msk.f32.vlgmr.msra.gmra.mrb[118].mxu1 %vm2048_vm14, %v7819_v41 }
0x1679   :  { %11016 = vmatpush3.bf16.msra.mxu1 %v15035_v34  ;;  %9623 = vmatprep.mubr.msk.f32.mxu1 %vm11330_vm12, %v14754_v49 }
0x167a   :  { %11017 = vmatprep.subr.bf16.mxu1 %v14732_v37 }
0x167d   :  { %11019 = vmatpush3.bf16.msra.mxu1 %v15036_v13 }
0x167e   :  { %11020 = vmatprep.subr.bf16.mxu1 %v14732_v37 }
0x1681   :  { %11022 = vmatpush3.bf16.msra.mxu1 %v15037_v38 }
0x1682   :  { %11023 = vmatprep.subr.bf16.mxu1 %v14732_v37 }
0x1685   :  { %11025 = vmatpush3.bf16.msra.mxu1 %v15038_v15 }
0x1686   :  { %9621 = vmatprep.subr.mxu1 %v14754_v49 }
0x1689   :  { %9622 = vmatpush3.msk.msra.mxu1 %vm101_vm0, %v15039_v24 }
0x168a   :  { %9624 = vmatmul.mubr.msk.f32.vlgmr.msra.gmra.mrb[118].mxu1 %vm2048_vm14, %v7817_v1  ;;  %11026 = vmatprep.subr.bf16.mxu1 %v14732_v37 }
0x168b   :  { %11028 = vmatpush3.bf16.msra.mxu1 %v15040_v4  ;;  %9644 = vmatprep.mubr.msk.f32.mxu1 %vm11330_vm12, %v14754_v49 }
0x168c   :  { %11029 = vmatprep.subr.bf16.mxu1 %v14732_v37 }
0x168f   :  { %11031 = vmatpush3.bf16.msra.mxu1 %v15041_v28 }
0x1690   :  { %11032 = vmatprep.subr.bf16.mxu1 %v14732_v37 }
0x1693   :  { %11034 = vmatpush3.bf16.msra.mxu1 %v15042_v18 }
0x1694   :  { %11035 = vmatprep.subr.bf16.mxu1 %v14732_v37 }
0x1697   :  { %11037 = vmatpush3.bf16.msra.mxu1 %v15043_v20 }
0x1698   :  { %9642 = vmatprep.subr.mxu1 %v14754_v49 }
0x169b   :  { %9643 = vmatpush3.msk.msra.mxu1 %vm101_vm0, %v15044_v51 }
0x169c   :  { %9645 = vmatmul.mubr.msk.f32.vlgmr.msra.gmra.mrb[118].mxu1 %vm2048_vm14, %v7964_v27  ;;  %11038 = vmatprep.subr.bf16.mxu1 %v14732_v37 }
0x169d   :  { %11040 = vmatpush3.bf16.msra.mxu1 %v15045_v22  ;;  %9665 = vmatprep.mubr.msk.f32.mxu1 %vm11330_vm12, %v14754_v49 }
0x169e   :  { %11041 = vmatprep.subr.bf16.mxu1 %v14732_v37 }
0x16a1   :  { %11043 = vmatpush3.bf16.msra.mxu1 %v15046_v53 }
0x16a2   :  { %11044 = vmatprep.subr.bf16.mxu1 %v14732_v37 }
0x16a5   :  { %11046 = vmatpush3.bf16.msra.mxu1 %v15047_v35 }
0x16a6   :  { %11047 = vmatprep.subr.bf16.mxu1 %v14732_v37 }
0x16a9   :  { %11049 = vmatpush3.bf16.msra.mxu1 %v15048_v19 }
0x16aa   :  { %9663 = vmatprep.subr.mxu1 %v14754_v49 }
0x16ad   :  { %9664 = vmatpush3.msk.msra.mxu1 %vm101_vm0, %v15049_v31 }
0x16ae   :  { %9666 = vmatmul.mubr.msk.f32.vlgmr.msra.gmra.mrb[118].mxu1 %vm2048_vm14, %v8038_v46 }
0x1781   :  { %v8107_v21 = vpop.f32.mrb[118].mxu1 }
0x1782   :  { %v8119_v17 = vrot.slane %v8107_v21, 5  ;;  %v9667_v40 = vpop.f32.mrb[119].mxu1 }
0x1784   :  { %v8125_v0 = vsel %vm8124_vm1, %v14105_v43, %v8119_v17  ;;  %v8235_v43 = vld [vmem:[%s14453_s17 + $0x20] sm:$0xff]  ;;  %s11303_s17 = scalar_lea.vmem %s8334_s1, 64 }
0x1785   :  { %v8133_v36 = vadd.f32 %v8857_v57, %v8125_v0  ;;  %v11072_v59 = vpack.c.bf16 %v8236_v52, %v8235_v43  ;;  %p11304_p0 = scmp.ne.s32.totalorder %s8334_s1, %s11303_s17  ;;  %p11309_p2 = scmp.lt.s32.totalorder %s11303_s17, %s11303_s17 }
0x1787   :  { %v8134_v12 = vmax.f32 %v8133_v36, 0.0  ;;  %p11310_p3 = por %p11309_p2, %p11308_p1 }
0x1789   :  { %9691 = vmatmul.mubr.msk.f32.vlgmr.msra.gmra.mrb[112].mxu0 %vm8153_vm2, %v8134_v12  ;;  %p11311_p4 = pnand %p11310_p3, %p11304_p0 }
0x178a   :  { %11067 = vmatpush3.bf16.msra.mxu0 %v11066_v44  ;;  %9715 = vmatprep.mubr.msk.f32.mxu0 %vm11330_vm12, %v14754_v49 }
0x178b   :  { %11068 = vmatprep.subr.bf16.mxu0 %v14732_v37 }
0x178e   :  { %11070 = vmatpush3.bf16.msra.mxu0 %v11069_v54 }
0x178f   :  { %11071 = vmatprep.subr.bf16.mxu0 %v14732_v37 }
0x1792   :  { %11073 = vmatpush3.bf16.msra.mxu0 %v11072_v59 }
0x1793   :  { %11074 = vmatprep.subr.bf16.mxu0 %v14732_v37 }
0x1796   :  { %11076 = vmatpush3.bf16.msra.mxu0 %v11075_v2 }
0x1797   :  { %11077 = vmatprep.subr.bf16.mxu0 %v14732_v37  ;;  %v8858_v37 = vld [vmem:[%s14452_s16] ss:$0 sm:$0xff] }
0x179a   :  { %11079 = vmatpush3.bf16.msra.mxu0 %v11078_v29 }
0x179b   :  { %9713 = vmatprep.subr.mxu0 %v14754_v49  ;;  %v8861_v49 = vld [vmem:[%s14454_s18] ss:$0 sm:$0xff] }
0x179e   :  { %9714 = vmatpush3.msk.msra.mxu0 %vm101_vm0, %v8241_v39 }
0x185c   :  { %v8226_v23 = vpop.f32.mrb[112].mxu0 }
0x185d   :  { %v8227_v48 = vadd.f32 %v8858_v37, %v8226_v23  ;;  %v9692_v7 = vpop.f32.mrb[113].mxu0 }
0x185f   :  { %v8230_v62 = vmax.f32 %v8227_v48, 0.0 }
0x1861   :  { %9716 = vmatmul.mubr.msk.f32.vlgmr.msra.gmra.mrb[114].mxu0 %vm8153_vm2, %v8230_v62 }
0x1934   :  { %v8321_v3 = vpop.f32.mrb[114].mxu0 }
0x1935   :  { %v8322_v8 = vadd.f32 %v8861_v49, %v8321_v3  ;;  %v9717_v25 = vpop.f32.mrb[115].mxu0 }
0x1937   :  { %8326 = vst.msk [vmem:[#allocation2] sm:$0xf] %vm8325_vm3, %v8322_v8 }
0x1938   :  { %11314 = shalt.err (!%p11311_p4)
}
0x1939   :  { %s11315_s2 = scalar_lea.hbm %s14455_s19, 64 }
0x193a   :  { %p11316_p5 = scmp.ne.s32.totalorder %s14455_s19, %s11315_s2  ;;  %p11319_p6 = scmp.lt.u32.totalorder %s11315_s2, %s14455_s19 }
0x193c   :  { %p11321_p7 = pnand %p11319_p6, %p11316_p5 }
0x193e   :  { %11324 = shalt.err (!%p11321_p7)
}
0x193f   :  { %8336 = dma.vmem_to_hbm [thread:$0]  %s8334_s1, 64, %s14455_s19, [#allocation3]  }
0x1940   :  { %11325 = dma.done.wait [#allocation3], 64  }
0x1941   :  { %11326 = vsyncadd [#allocation3], 4294967232 }
0x1942   :  { %8340 = vsyncpa [#allocation3], 1 }

</bundles_post_ra>
